<compile_context>
chip_gen: v7x
topology: tpu7x:2x2x1
jax: 0.10.0
libtpu: 0.0.40
codegen_flags: <defaults>
</compile_context>

<pallas_src>
import jax
import jax.numpy as jnp
from jax import lax
from jax.experimental import pallas as pl
from jax.experimental.pallas import tpu as pltpu

EPS = 1e-5
LANE = 128


def _residual_block_kernel(x_ref, w1_ref, w2_ref, o_ref, shift_ref):
    # x_ref:     (1, H, W, Cp)    f32  current image (NHWC block, channels padded)
    # w*_ref:    (3, 3*Cp, Cp)    bf16 per-kh fused weights; row index dw*Cp + ci
    # o_ref:     (1, H, W, Cp)    f32
    # shift_ref: (H+2, W, 3*Cp)   bf16 scratch; lane group dw holds the conv input
    #            shifted by dw along W and zero-padded by 1 along H:
    #            shift_ref[i, j, dw*Cp + c] = padded(img)[i, j + dw, c]
    _, H, W, Cp = x_ref.shape
    C3 = 3 * Cp
    HW = H * W
    inv_hw = 1.0 / float(HW)

    # Zero the H-halo rows once per image (full-tile stores). The interior rows
    # are fully overwritten by every fill below.
    zrow = jnp.zeros((1, W, C3), jnp.bfloat16)
    shift_ref[0:1, :, :] = zrow
    shift_ref[H + 1:H + 2, :, :] = zrow

    def fill_shift(img):
        # img: (H, W, Cp) f32.  Three full-width, lane-aligned (unmasked) stores.
        # The W shift is paid on the XLU (pltpu.roll, matches jnp.roll semantics);
        # the wrapped halo column is cleared in-register with an iota mask, so no
        # masked stores are needed.
        col = lax.broadcasted_iota(jnp.int32, (H, W, Cp), 1)
        left = jnp.where(col == 0, 0.0, pltpu.roll(img, 1, 1))            # x[:, j-1]
        right = jnp.where(col == W - 1, 0.0, pltpu.roll(img, W - 1, 1))   # x[:, j+1]
        shift_ref[1:H + 1, :, 0:Cp] = left.astype(jnp.bfloat16)           # dw = 0
        shift_ref[1:H + 1, :, Cp:2 * Cp] = img.astype(jnp.bfloat16)       # dw = 1
        shift_ref[1:H + 1, :, 2 * Cp:3 * Cp] = right.astype(jnp.bfloat16)  # dw = 2

    def conv3x3(w_ref):
        # kw taps are fused along the lane-packed K axis: 3 dots of
        # (HW, 3Cp) x (3Cp, Cp), bf16 x bf16 -> f32 accumulate on the MXU.
        # The kh taps are leading-axis slices of the scratch (no relayout).
        acc = jnp.dot(shift_ref[0:H, :, :].reshape(HW, C3), w_ref[0],
                      preferred_element_type=jnp.float32)
        acc = acc + jnp.dot(shift_ref[1:H + 1, :, :].reshape(HW, C3), w_ref[1],
                            preferred_element_type=jnp.float32)
        acc = acc + jnp.dot(shift_ref[2:H + 2, :, :].reshape(HW, C3), w_ref[2],
                            preferred_element_type=jnp.float32)
        return acc  # (HW, Cp) f32.  (Conv bias omitted: cancelled exactly by IN.)

    def instance_norm(h):
        # Two-pass (centered) statistics in f32; biased variance (PyTorch).
        mean = jnp.sum(h, axis=0, keepdims=True) * inv_hw
        hc = h - mean
        var = jnp.sum(hc * hc, axis=0, keepdims=True) * inv_hw
        return hc * lax.rsqrt(var + EPS)

    # conv1 -> IN -> ReLU.  x is read only to fill the scratch (not kept live).
    fill_shift(x_ref[0])
    h = jnp.maximum(instance_norm(conv3x3(w1_ref)), 0.0)

    # conv2 -> IN
    fill_shift(h.reshape(H, W, Cp))
    h = instance_norm(conv3x3(w2_ref))

    # Residual add in f32 (re-read the input block here).
    o_ref[0] = x_ref[0] + h.reshape(H, W, Cp)


def residual_block_nhwc(x_nhwc, w1, b1, w2, b2):
    """Pix2PixHD ResidualBlock forward, NHWC fast path (no HBM transposes).

    x_nhwc: (N, H, W, C); w*: (C, C, 3, 3) PyTorch OIHW; b*: (C,).
    b1/b2 are no-ops before InstanceNorm2d(affine=False) and are dropped.
    """
    del b1, b2
    N, H, W, C = x_nhwc.shape
    Cp = ((C + LANE - 1) // LANE) * LANE  # lane-dense channel axis

    x = x_nhwc.astype(jnp.float32)
    if Cp != C:
        x = jnp.pad(x, ((0, 0), (0, 0), (0, 0), (0, Cp - C)))

    def pack_w(w):
        # (co, ci, kh, kw) -> (kh, kw, ci, co), pad ci/co to Cp, fuse kw into K:
        # (3, 3*Cp, Cp) with row index kw*Cp + ci (matches the scratch lane packing).
        wt = jnp.transpose(w, (2, 3, 1, 0)).astype(jnp.float32)
        wt = jnp.pad(wt, ((0, 0), (0, 0), (0, Cp - C), (0, Cp - C)))
        return wt.reshape(3, 3 * Cp, Cp).astype(jnp.bfloat16)

    w1k, w2k = pack_w(w1), pack_w(w2)

    # --- VMEM budget: actual footprint, capped generation-aware ---
    img_f32 = H * W * Cp * 4
    w_bf16 = 3 * 3 * Cp * Cp * 2
    shift_bf16 = (H + 2) * W * 3 * Cp * 2
    footprint = (2 * img_f32           # input block, double-buffered
                 + 2 * img_f32         # output block, double-buffered
                 + 2 * 2 * w_bf16      # two weight arrays, double-buffered
                 + shift_bf16          # shift scratch
                 + 6 * img_f32)        # in-flight f32 intermediates (acc / IN / rolls)
    try:
        vmem_cap = int(pltpu.get_tpu_info().vmem_capacity_bytes)
    except Exception:
        vmem_cap = 64 << 20            # conservative (v7x-sized) fallback
    vmem_limit = int(min(max(int(footprint * 1.25), 16 << 20),
                         int(vmem_cap * 0.85)))

    out = pl.pallas_call(
        _residual_block_kernel,
        out_shape=jax.ShapeDtypeStruct((N, H, W, Cp), jnp.float32),
        grid_spec=pltpu.PrefetchScalarGridSpec(
            num_scalar_prefetch=0,
            grid=(N,),
            in_specs=[
                pl.BlockSpec((1, H, W, Cp), lambda n: (n, 0, 0, 0)),
                pl.BlockSpec((3, 3 * Cp, Cp), lambda n: (0, 0, 0)),
                pl.BlockSpec((3, 3 * Cp, Cp), lambda n: (0, 0, 0)),
            ],
            out_specs=pl.BlockSpec((1, H, W, Cp), lambda n: (n, 0, 0, 0)),
            scratch_shapes=[pltpu.VMEM((H + 2, W, 3 * Cp), jnp.bfloat16)],
        ),
        compiler_params=pltpu.CompilerParams(
            dimension_semantics=("parallel",),  # images independent -> megacore split
            vmem_limit_bytes=vmem_limit,
        ),
    )(x, w1k, w2k)

    return out[..., :C] if Cp != C else out


def residual_block(x_nchw, w1, b1, w2, b2):
    """NCHW adapter kept only for PyTorch API parity (prefer the NHWC entry)."""
    y = residual_block_nhwc(jnp.transpose(x_nchw, (0, 2, 3, 1)), w1, b1, w2, b2)
    return jnp.transpose(y, (0, 3, 1, 2))


def _reference(x, w1, b1, w2, b2, matmul_dtype=jnp.float32):
    # Pure-JAX reference matching PyTorch semantics (NCHW). `matmul_dtype`
    # controls the conv input/weight precision so we can check the bf16-MXU
    # kernel tightly as well as the full-f32 math approximately.
    def conv(t, w, b):
        y = lax.conv_general_dilated(
            t.astype(matmul_dtype), w.astype(matmul_dtype),
            window_strides=(1, 1), padding=((1, 1), (1, 1)),
            dimension_numbers=("NCHW", "OIHW", "NCHW"),
            preferred_element_type=jnp.float32)
        return y + b.reshape(1, -1, 1, 1)

    def inorm(t):
        mean = t.mean(axis=(2, 3), keepdims=True)
        var = ((t - mean) ** 2).mean(axis=(2, 3), keepdims=True)
        return (t - mean) / jnp.sqrt(var + EPS)

    h = jnp.maximum(inorm(conv(x, w1, b1)), 0.0)
    h = inorm(conv(h, w2, b2))
    return x + h


if __name__ == "__main__":
    key = jax.random.PRNGKey(0)
    k_x, k_w1, k_b1, k_w2, k_b2 = jax.random.split(key, 5)

    N, C, H, W = 2, 4, 16, 16
    x = jax.random.normal(k_x, (N, C, H, W), dtype=jnp.float32)
    w1 = 0.1 * jax.random.normal(k_w1, (C, C, 3, 3), dtype=jnp.float32)
    b1 = 0.1 * jax.random.normal(k_b1, (C,), dtype=jnp.float32)
    w2 = 0.1 * jax.random.normal(k_w2, (C, C, 3, 3), dtype=jnp.float32)
    b2 = 0.1 * jax.random.normal(k_b2, (C,), dtype=jnp.float32)

    out = jax.block_until_ready(residual_block(x, w1, b1, w2, b2))
    assert out.shape == (N, C, H, W)

    # Tight check vs a reference that rounds conv inputs/weights to bf16 at the
    # same points the kernel does (isolates implementation correctness).
    ref_bf16 = jax.block_until_ready(_reference(x, w1, b1, w2, b2, jnp.bfloat16))
    assert jnp.allclose(out, ref_bf16, atol=5e-3, rtol=5e-3), "mismatch vs bf16 reference"

    # Ballpark check vs the full-f32 reference (bf16 MXU inputs cost ~1e-3 abs).
    ref_f32 = jax.block_until_ready(_reference(x, w1, b1, w2, b2, jnp.float32))
    assert jnp.allclose(out, ref_f32, atol=5e-2, rtol=5e-2), "mismatch vs f32 reference"

    print("KERNEL_OK")
</pallas_src>

<mosaic_0001>
module attributes {stable_mosaic.version = 11 : i64} {
  func.func @_residual_block_kernel(%arg0: i32, %arg1: memref<1x16x16x128xf32, #tpu.memory_space<vmem>>, %arg2: memref<3x384x128xbf16, #tpu.memory_space<vmem>>, %arg3: memref<3x384x128xbf16, #tpu.memory_space<vmem>>, %arg4: memref<1x16x16x128xf32, #tpu.memory_space<vmem>>, %arg5: memref<18x16x384xbf16, #tpu.memory_space<vmem>>) attributes {dimension_semantics = [#tpu.dimension_semantics<parallel>], iteration_bounds = array<i64: 2>, scalar_prefetch = 0 : i64, scratch_operands = 1 : i64, tpu.core_type = #tpu.core_type<tc>, window_params = [{transform_indices = @transform_0, window_bounds = array<i64: 1, 16, 16, 128>}, {pipeline_mode = #tpu.pipeline_mode<synchronous>, transform_indices = @transform_1, window_bounds = array<i64: 3, 384, 128>}, {pipeline_mode = #tpu.pipeline_mode<synchronous>, transform_indices = @transform_2, window_bounds = array<i64: 3, 384, 128>}, {transform_indices = @transform_3, window_bounds = array<i64: 1, 16, 16, 128>}]} {
    %cst = arith.constant 0.000000e+00 : bf16
    %0 = vector.broadcast %cst : bf16 to vector<1x16x384xbf16>
    %c0 = arith.constant 0 : index
    %c0_0 = arith.constant 0 : index
    %c0_1 = arith.constant 0 : index
    %1 = vector.load %arg5[%c0, %c0_0, %c0_1] : memref<18x16x384xbf16, #tpu.memory_space<vmem>>, vector<1x16x384xbf16>
    tpu.vector_store %arg5[%c0, %c0_0, %c0_1], %0 {strides = array<i32>} : memref<18x16x384xbf16, #tpu.memory_space<vmem>>, vector<1x16x384xbf16>,
    %c17 = arith.constant 17 : index
    %c0_2 = arith.constant 0 : index
    %c0_3 = arith.constant 0 : index
    %2 = vector.load %arg5[%c17, %c0_2, %c0_3] : memref<18x16x384xbf16, #tpu.memory_space<vmem>>, vector<1x16x384xbf16>
    tpu.vector_store %arg5[%c17, %c0_2, %c0_3], %0 {strides = array<i32>} : memref<18x16x384xbf16, #tpu.memory_space<vmem>>, vector<1x16x384xbf16>,
    %c0_4 = arith.constant 0 : index
    %c0_5 = arith.constant 0 : index
    %c0_6 = arith.constant 0 : index
    %c0_7 = arith.constant 0 : index
    %3 = vector.load %arg1[%c0_4, %c0_5, %c0_6, %c0_7] : memref<1x16x16x128xf32, #tpu.memory_space<vmem>>, vector<1x16x16x128xf32>
    %4 = vector.shape_cast %3 : vector<1x16x16x128xf32> to vector<16x16x128xf32>
    %5 = tpu.iota {dimensions = array<i32: 1>} : vector<16x16x128xi32>
    %c0_i32 = arith.constant 0 : i32
    %6 = vector.broadcast %c0_i32 : i32 to vector<16x16x128xi32>
    %7 = arith.cmpi eq, %5, %6 : vector<16x16x128xi32>
    %c1_i32 = arith.constant 1 : i32
    %8 = tpu.dynamic_rotate %4 by %c1_i32 dim 1 : vector<16x16x128xf32>, i32 -> vector<16x16x128xf32>
    %cst_8 = arith.constant 0.000000e+00 : f32
    %9 = vector.broadcast %cst_8 : f32 to vector<16x16x128xf32>
    %10 = arith.select %7, %9, %8 : vector<16x16x128xi1>, vector<16x16x128xf32>
    %c15_i32 = arith.constant 15 : i32
    %11 = vector.broadcast %c15_i32 : i32 to vector<16x16x128xi32>
    %12 = arith.cmpi eq, %5, %11 : vector<16x16x128xi32>
    %c15_i32_9 = arith.constant 15 : i32
    %13 = tpu.dynamic_rotate %4 by %c15_i32_9 dim 1 : vector<16x16x128xf32>, i32 -> vector<16x16x128xf32>
    %cst_10 = arith.constant 0.000000e+00 : f32
    %14 = vector.broadcast %cst_10 : f32 to vector<16x16x128xf32>
    %15 = arith.select %12, %14, %13 : vector<16x16x128xi1>, vector<16x16x128xf32>
    %16 = arith.truncf %10 : vector<16x16x128xf32> to vector<16x16x128xbf16>
    %c1 = arith.constant 1 : index
    %c0_11 = arith.constant 0 : index
    %c0_12 = arith.constant 0 : index
    %17 = vector.load %arg5[%c1, %c0_11, %c0_12] : memref<18x16x384xbf16, #tpu.memory_space<vmem>>, vector<16x16x128xbf16>
    tpu.vector_store %arg5[%c1, %c0_11, %c0_12], %16 {strides = array<i32>} : memref<18x16x384xbf16, #tpu.memory_space<vmem>>, vector<16x16x128xbf16>,
    %18 = arith.truncf %4 : vector<16x16x128xf32> to vector<16x16x128xbf16>
    %c1_13 = arith.constant 1 : index
    %c0_14 = arith.constant 0 : index
    %c128 = arith.constant 128 : index
    %19 = vector.load %arg5[%c1_13, %c0_14, %c128] : memref<18x16x384xbf16, #tpu.memory_space<vmem>>, vector<16x16x128xbf16>
    tpu.vector_store %arg5[%c1_13, %c0_14, %c128], %18 {strides = array<i32>} : memref<18x16x384xbf16, #tpu.memory_space<vmem>>, vector<16x16x128xbf16>,
    %20 = arith.truncf %15 : vector<16x16x128xf32> to vector<16x16x128xbf16>
    %c1_15 = arith.constant 1 : index
    %c0_16 = arith.constant 0 : index
    %c256 = arith.constant 256 : index
    %21 = vector.load %arg5[%c1_15, %c0_16, %c256] : memref<18x16x384xbf16, #tpu.memory_space<vmem>>, vector<16x16x128xbf16>
    tpu.vector_store %arg5[%c1_15, %c0_16, %c256], %20 {strides = array<i32>} : memref<18x16x384xbf16, #tpu.memory_space<vmem>>, vector<16x16x128xbf16>,
    %c0_17 = arith.constant 0 : index
    %c0_18 = arith.constant 0 : index
    %c0_19 = arith.constant 0 : index
    %22 = vector.load %arg5[%c0_17, %c0_18, %c0_19] : memref<18x16x384xbf16, #tpu.memory_space<vmem>>, vector<16x16x384xbf16>
    %23 = vector.shape_cast %22 : vector<16x16x384xbf16> to vector<256x384xbf16>
    %c0_20 = arith.constant 0 : index
    %c0_21 = arith.constant 0 : index
    %c0_22 = arith.constant 0 : index
    %24 = vector.load %arg2[%c0_20, %c0_21, %c0_22] : memref<3x384x128xbf16, #tpu.memory_space<vmem>>, vector<1x384x128xbf16>
    %25 = vector.shape_cast %24 : vector<1x384x128xbf16> to vector<384x128xbf16>
    %cst_23 = arith.constant dense<0.000000e+00> : vector<256x128xf32>
    %26 = tpu.matmul %23, %25, %cst_23 {dimension_numbers = #tpu.dot_dimension_numbers<[1], [0], [0], [1], [0, 0, 1, 1], [], []>} : vector<256x384xbf16>, vector<384x128xbf16>, vector<256x128xf32> -> vector<256x128xf32>
    %c1_24 = arith.constant 1 : index
    %c0_25 = arith.constant 0 : index
    %c0_26 = arith.constant 0 : index
    %27 = vector.load %arg5[%c1_24, %c0_25, %c0_26] : memref<18x16x384xbf16, #tpu.memory_space<vmem>>, vector<16x16x384xbf16>
    %28 = vector.shape_cast %27 : vector<16x16x384xbf16> to vector<256x384xbf16>
    %c1_27 = arith.constant 1 : index
    %c0_28 = arith.constant 0 : index
    %c0_29 = arith.constant 0 : index
    %29 = vector.load %arg2[%c1_27, %c0_28, %c0_29] : memref<3x384x128xbf16, #tpu.memory_space<vmem>>, vector<1x384x128xbf16>
    %30 = vector.shape_cast %29 : vector<1x384x128xbf16> to vector<384x128xbf16>
    %cst_30 = arith.constant dense<0.000000e+00> : vector<256x128xf32>
    %31 = tpu.matmul %28, %30, %cst_30 {dimension_numbers = #tpu.dot_dimension_numbers<[1], [0], [0], [1], [0, 0, 1, 1], [], []>} : vector<256x384xbf16>, vector<384x128xbf16>, vector<256x128xf32> -> vector<256x128xf32>
    %32 = arith.addf %26, %31 : vector<256x128xf32>
    %c2 = arith.constant 2 : index
    %c0_31 = arith.constant 0 : index
    %c0_32 = arith.constant 0 : index
    %33 = vector.load %arg5[%c2, %c0_31, %c0_32] : memref<18x16x384xbf16, #tpu.memory_space<vmem>>, vector<16x16x384xbf16>
    %34 = vector.shape_cast %33 : vector<16x16x384xbf16> to vector<256x384xbf16>
    %c2_33 = arith.constant 2 : index
    %c0_34 = arith.constant 0 : index
    %c0_35 = arith.constant 0 : index
    %35 = vector.load %arg2[%c2_33, %c0_34, %c0_35] : memref<3x384x128xbf16, #tpu.memory_space<vmem>>, vector<1x384x128xbf16>
    %36 = vector.shape_cast %35 : vector<1x384x128xbf16> to vector<384x128xbf16>
    %cst_36 = arith.constant dense<0.000000e+00> : vector<256x128xf32>
    %37 = tpu.matmul %34, %36, %cst_36 {dimension_numbers = #tpu.dot_dimension_numbers<[1], [0], [0], [1], [0, 0, 1, 1], [], []>} : vector<256x384xbf16>, vector<384x128xbf16>, vector<256x128xf32> -> vector<256x128xf32>
    %38 = arith.addf %32, %37 : vector<256x128xf32>
    %cst_37 = arith.constant dense<0.000000e+00> : vector<128xf32>
    %39 = vector.multi_reduction <add>, %38, %cst_37 [0] : vector<256x128xf32> to vector<128xf32>
    %40 = vector.shape_cast %39 : vector<128xf32> to vector<1x128xf32>
    %cst_38 = arith.constant 3.906250e-03 : f32
    %41 = vector.broadcast %cst_38 : f32 to vector<1x128xf32>
    %42 = arith.mulf %40, %41 : vector<1x128xf32>
    %43 = vector.broadcast %42 : vector<1x128xf32> to vector<256x128xf32>
    %44 = arith.subf %38, %43 : vector<256x128xf32>
    %45 = arith.mulf %44, %44 : vector<256x128xf32>
    %cst_39 = arith.constant dense<0.000000e+00> : vector<128xf32>
    %46 = vector.multi_reduction <add>, %45, %cst_39 [0] : vector<256x128xf32> to vector<128xf32>
    %47 = vector.shape_cast %46 : vector<128xf32> to vector<1x128xf32>
    %cst_40 = arith.constant 3.906250e-03 : f32
    %48 = vector.broadcast %cst_40 : f32 to vector<1x128xf32>
    %49 = arith.mulf %47, %48 : vector<1x128xf32>
    %cst_41 = arith.constant 9.99999974E-6 : f32
    %50 = vector.broadcast %cst_41 : f32 to vector<1x128xf32>
    %51 = arith.addf %49, %50 : vector<1x128xf32>
    %52 = math.rsqrt %51 : vector<1x128xf32>
    %53 = vector.broadcast %52 : vector<1x128xf32> to vector<256x128xf32>
    %54 = arith.mulf %44, %53 : vector<256x128xf32>
    %cst_42 = arith.constant 0.000000e+00 : f32
    %55 = vector.broadcast %cst_42 : f32 to vector<256x128xf32>
    %56 = arith.maximumf %54, %55 : vector<256x128xf32>
    %57 = vector.shape_cast %56 : vector<256x128xf32> to vector<16x16x128xf32>
    %58 = tpu.iota {dimensions = array<i32: 1>} : vector<16x16x128xi32>
    %c0_i32_43 = arith.constant 0 : i32
    %59 = vector.broadcast %c0_i32_43 : i32 to vector<16x16x128xi32>
    %60 = arith.cmpi eq, %58, %59 : vector<16x16x128xi32>
    %c1_i32_44 = arith.constant 1 : i32
    %61 = tpu.dynamic_rotate %57 by %c1_i32_44 dim 1 : vector<16x16x128xf32>, i32 -> vector<16x16x128xf32>
    %cst_45 = arith.constant 0.000000e+00 : f32
    %62 = vector.broadcast %cst_45 : f32 to vector<16x16x128xf32>
    %63 = arith.select %60, %62, %61 : vector<16x16x128xi1>, vector<16x16x128xf32>
    %c15_i32_46 = arith.constant 15 : i32
    %64 = vector.broadcast %c15_i32_46 : i32 to vector<16x16x128xi32>
    %65 = arith.cmpi eq, %58, %64 : vector<16x16x128xi32>
    %c15_i32_47 = arith.constant 15 : i32
    %66 = tpu.dynamic_rotate %57 by %c15_i32_47 dim 1 : vector<16x16x128xf32>, i32 -> vector<16x16x128xf32>
    %cst_48 = arith.constant 0.000000e+00 : f32
    %67 = vector.broadcast %cst_48 : f32 to vector<16x16x128xf32>
    %68 = arith.select %65, %67, %66 : vector<16x16x128xi1>, vector<16x16x128xf32>
    %69 = arith.truncf %63 : vector<16x16x128xf32> to vector<16x16x128xbf16>
    %c1_49 = arith.constant 1 : index
    %c0_50 = arith.constant 0 : index
    %c0_51 = arith.constant 0 : index
    %70 = vector.load %arg5[%c1_49, %c0_50, %c0_51] : memref<18x16x384xbf16, #tpu.memory_space<vmem>>, vector<16x16x128xbf16>
    tpu.vector_store %arg5[%c1_49, %c0_50, %c0_51], %69 {strides = array<i32>} : memref<18x16x384xbf16, #tpu.memory_space<vmem>>, vector<16x16x128xbf16>,
    %71 = arith.truncf %57 : vector<16x16x128xf32> to vector<16x16x128xbf16>
    %c1_52 = arith.constant 1 : index
    %c0_53 = arith.constant 0 : index
    %c128_54 = arith.constant 128 : index
    %72 = vector.load %arg5[%c1_52, %c0_53, %c128_54] : memref<18x16x384xbf16, #tpu.memory_space<vmem>>, vector<16x16x128xbf16>
    tpu.vector_store %arg5[%c1_52, %c0_53, %c128_54], %71 {strides = array<i32>} : memref<18x16x384xbf16, #tpu.memory_space<vmem>>, vector<16x16x128xbf16>,
    %73 = arith.truncf %68 : vector<16x16x128xf32> to vector<16x16x128xbf16>
    %c1_55 = arith.constant 1 : index
    %c0_56 = arith.constant 0 : index
    %c256_57 = arith.constant 256 : index
    %74 = vector.load %arg5[%c1_55, %c0_56, %c256_57] : memref<18x16x384xbf16, #tpu.memory_space<vmem>>, vector<16x16x128xbf16>
    tpu.vector_store %arg5[%c1_55, %c0_56, %c256_57], %73 {strides = array<i32>} : memref<18x16x384xbf16, #tpu.memory_space<vmem>>, vector<16x16x128xbf16>,
    %c0_58 = arith.constant 0 : index
    %c0_59 = arith.constant 0 : index
    %c0_60 = arith.constant 0 : index
    %75 = vector.load %arg5[%c0_58, %c0_59, %c0_60] : memref<18x16x384xbf16, #tpu.memory_space<vmem>>, vector<16x16x384xbf16>
    %76 = vector.shape_cast %75 : vector<16x16x384xbf16> to vector<256x384xbf16>
    %c0_61 = arith.constant 0 : index
    %c0_62 = arith.constant 0 : index
    %c0_63 = arith.constant 0 : index
    %77 = vector.load %arg3[%c0_61, %c0_62, %c0_63] : memref<3x384x128xbf16, #tpu.memory_space<vmem>>, vector<1x384x128xbf16>
    %78 = vector.shape_cast %77 : vector<1x384x128xbf16> to vector<384x128xbf16>
    %cst_64 = arith.constant dense<0.000000e+00> : vector<256x128xf32>
    %79 = tpu.matmul %76, %78, %cst_64 {dimension_numbers = #tpu.dot_dimension_numbers<[1], [0], [0], [1], [0, 0, 1, 1], [], []>} : vector<256x384xbf16>, vector<384x128xbf16>, vector<256x128xf32> -> vector<256x128xf32>
    %c1_65 = arith.constant 1 : index
    %c0_66 = arith.constant 0 : index
    %c0_67 = arith.constant 0 : index
    %80 = vector.load %arg5[%c1_65, %c0_66, %c0_67] : memref<18x16x384xbf16, #tpu.memory_space<vmem>>, vector<16x16x384xbf16>
    %81 = vector.shape_cast %80 : vector<16x16x384xbf16> to vector<256x384xbf16>
    %c1_68 = arith.constant 1 : index
    %c0_69 = arith.constant 0 : index
    %c0_70 = arith.constant 0 : index
    %82 = vector.load %arg3[%c1_68, %c0_69, %c0_70] : memref<3x384x128xbf16, #tpu.memory_space<vmem>>, vector<1x384x128xbf16>
    %83 = vector.shape_cast %82 : vector<1x384x128xbf16> to vector<384x128xbf16>
    %cst_71 = arith.constant dense<0.000000e+00> : vector<256x128xf32>
    %84 = tpu.matmul %81, %83, %cst_71 {dimension_numbers = #tpu.dot_dimension_numbers<[1], [0], [0], [1], [0, 0, 1, 1], [], []>} : vector<256x384xbf16>, vector<384x128xbf16>, vector<256x128xf32> -> vector<256x128xf32>
    %85 = arith.addf %79, %84 : vector<256x128xf32>
    %c2_72 = arith.constant 2 : index
    %c0_73 = arith.constant 0 : index
    %c0_74 = arith.constant 0 : index
    %86 = vector.load %arg5[%c2_72, %c0_73, %c0_74] : memref<18x16x384xbf16, #tpu.memory_space<vmem>>, vector<16x16x384xbf16>
    %87 = vector.shape_cast %86 : vector<16x16x384xbf16> to vector<256x384xbf16>
    %c2_75 = arith.constant 2 : index
    %c0_76 = arith.constant 0 : index
    %c0_77 = arith.constant 0 : index
    %88 = vector.load %arg3[%c2_75, %c0_76, %c0_77] : memref<3x384x128xbf16, #tpu.memory_space<vmem>>, vector<1x384x128xbf16>
    %89 = vector.shape_cast %88 : vector<1x384x128xbf16> to vector<384x128xbf16>
    %cst_78 = arith.constant dense<0.000000e+00> : vector<256x128xf32>
    %90 = tpu.matmul %87, %89, %cst_78 {dimension_numbers = #tpu.dot_dimension_numbers<[1], [0], [0], [1], [0, 0, 1, 1], [], []>} : vector<256x384xbf16>, vector<384x128xbf16>, vector<256x128xf32> -> vector<256x128xf32>
    %91 = arith.addf %85, %90 : vector<256x128xf32>
    %cst_79 = arith.constant dense<0.000000e+00> : vector<128xf32>
    %92 = vector.multi_reduction <add>, %91, %cst_79 [0] : vector<256x128xf32> to vector<128xf32>
    %93 = vector.shape_cast %92 : vector<128xf32> to vector<1x128xf32>
    %cst_80 = arith.constant 3.906250e-03 : f32
    %94 = vector.broadcast %cst_80 : f32 to vector<1x128xf32>
    %95 = arith.mulf %93, %94 : vector<1x128xf32>
    %96 = vector.broadcast %95 : vector<1x128xf32> to vector<256x128xf32>
    %97 = arith.subf %91, %96 : vector<256x128xf32>
    %98 = arith.mulf %97, %97 : vector<256x128xf32>
    %cst_81 = arith.constant dense<0.000000e+00> : vector<128xf32>
    %99 = vector.multi_reduction <add>, %98, %cst_81 [0] : vector<256x128xf32> to vector<128xf32>
    %100 = vector.shape_cast %99 : vector<128xf32> to vector<1x128xf32>
    %cst_82 = arith.constant 3.906250e-03 : f32
    %101 = vector.broadcast %cst_82 : f32 to vector<1x128xf32>
    %102 = arith.mulf %100, %101 : vector<1x128xf32>
    %cst_83 = arith.constant 9.99999974E-6 : f32
    %103 = vector.broadcast %cst_83 : f32 to vector<1x128xf32>
    %104 = arith.addf %102, %103 : vector<1x128xf32>
    %105 = math.rsqrt %104 : vector<1x128xf32>
    %106 = vector.broadcast %105 : vector<1x128xf32> to vector<256x128xf32>
    %107 = arith.mulf %97, %106 : vector<256x128xf32>
    %c0_84 = arith.constant 0 : index
    %c0_85 = arith.constant 0 : index
    %c0_86 = arith.constant 0 : index
    %c0_87 = arith.constant 0 : index
    %108 = vector.load %arg1[%c0_84, %c0_85, %c0_86, %c0_87] : memref<1x16x16x128xf32, #tpu.memory_space<vmem>>, vector<1x16x16x128xf32>
    %109 = vector.shape_cast %108 : vector<1x16x16x128xf32> to vector<16x16x128xf32>
    %110 = vector.shape_cast %107 : vector<256x128xf32> to vector<16x16x128xf32>
    %111 = arith.addf %109, %110 : vector<16x16x128xf32>
    %c0_88 = arith.constant 0 : index
    %c0_89 = arith.constant 0 : index
    %c0_90 = arith.constant 0 : index
    %c0_91 = arith.constant 0 : index
    %112 = vector.load %arg4[%c0_88, %c0_89, %c0_90, %c0_91] : memref<1x16x16x128xf32, #tpu.memory_space<vmem>>, vector<1x16x16x128xf32>
    %113 = vector.shape_cast %112 : vector<1x16x16x128xf32> to vector<16x16x128xf32>
    %114 = vector.shape_cast %111 : vector<16x16x128xf32> to vector<1x16x16x128xf32>
    tpu.vector_store %arg4[%c0_88, %c0_89, %c0_90, %c0_91], %114 {strides = array<i32>} : memref<1x16x16x128xf32, #tpu.memory_space<vmem>>, vector<1x16x16x128xf32>,
    return
  }
  func.func @transform_0(%arg0: i32) -> (i32, i32, i32, i32) {
    %c0_i32 = arith.constant 0 : i32
    %c0_i32_0 = arith.constant 0 : i32
    %c0_i32_1 = arith.constant 0 : i32
    %c0_i32_2 = arith.constant 0 : i32
    return %arg0, %c0_i32, %c0_i32_0, %c0_i32_1 : i32, i32, i32, i32
  }
  func.func @transform_1(%arg0: i32) -> (i32, i32, i32) {
    %c0_i32 = arith.constant 0 : i32
    %c0_i32_0 = arith.constant 0 : i32
    %c0_i32_1 = arith.constant 0 : i32
    %c0_i32_2 = arith.constant 0 : i32
    return %c0_i32, %c0_i32_0, %c0_i32_1 : i32, i32, i32
  }
  func.func @transform_2(%arg0: i32) -> (i32, i32, i32) {
    %c0_i32 = arith.constant 0 : i32
    %c0_i32_0 = arith.constant 0 : i32
    %c0_i32_1 = arith.constant 0 : i32
    %c0_i32_2 = arith.constant 0 : i32
    return %c0_i32, %c0_i32_0, %c0_i32_1 : i32, i32, i32
  }
  func.func @transform_3(%arg0: i32) -> (i32, i32, i32, i32) {
    %c0_i32 = arith.constant 0 : i32
    %c0_i32_0 = arith.constant 0 : i32
    %c0_i32_1 = arith.constant 0 : i32
    %c0_i32_2 = arith.constant 0 : i32
    return %arg0, %c0_i32, %c0_i32_0, %c0_i32_1 : i32, i32, i32, i32
  }
}

</mosaic_0001>

<bundles_post_ra>
// kernel: tpu_custom_call.1
= control target key start
LH: loop header
LB: loop body
LE: loop exit
PB: predicated region body
PF: predicated region fallthrough
CT: control target
= control target key end

     0   :  { %8 = vsyncpa [#allocation4], 0  ;;  %s10584_s0 = inlined_call_operand.hbm [shape: f32[2,16,16,128], index: 0, kind: input, shape index: {}]   ;;  %s10585_s1 = inlined_call_operand.hbm [shape: bf16[3,384,128], index: 1, kind: input, shape index: {}]   ;;  %s10586_s2 = inlined_call_operand.hbm [shape: bf16[3,384,128], index: 2, kind: input, shape index: {}]   ;;  %s10587_s3 = inlined_call_operand.hbm [shape: f32[2,16,16,128], index: 3, kind: output, shape index: {}]  }
   0x1   :  { %10 = vsyncpa [#allocation4 + $0x1], 0 }
   0x2   :  { %11 = vsyncpa [#allocation7], 0 }
   0x3   :  { %12 = vsyncpa [#allocation5], 0 }
   0x4   :  { %14 = vsyncpa [#allocation5 + $0x1], 0  ;;  %s7606_s12 = smov 0   ;;  %s7608_s13 = smov 0  }
   0x5   :  { %s7610_s14 = smov 0   ;;  %s7612_s15 = smov 0  }
   0x6 LB: > { %s7627_s16 = sadd.s32 4294967295, %s7572_s15   ;;  %s4867_s17 = sadd.s32 4294967294, %s7572_s15   ;;  %s7572_s15 = sphi %s7612_s15, %s10693_s15   ;;  %s7568_s14 = sphi %s7610_s14, %s10692_s14   ;;  %s7564_s13 = sphi %s7608_s13, %s10691_s13   ;;  %s7560_s12 = sphi %s7606_s12, %s10690_s12  }
   0x7   : > { %p40_p0 = scmp.ne.s32.totalorder %s7564_s13, %s7560_s12  ;;  %p10588_p1 = scmp.eq.s32.totalorder %s7627_s16, 0 }
   0x8   : > { %p112_p3 = scmp.eq.s32.totalorder %s4867_s17, 1  ;;  %p4868_p5 = scmp.ge.s32.totalorder %s7572_s15, 1 }
   0x9   : > { %p7636_p4 = por %p10588_p1, %p40_p0  ;;  %p119_p7 = scmp.lt.s32.totalorder %s7572_s15, 3 }
   0xa   : > { %p7641_p6 = por %p112_p3, %p40_p0  ;;  %s7574_s21 = smov [#allocation6]  }
   0xb   : > { %s10607_s18 = scalar_select %p7636_p4, 1, 0 }
   0xc   : > { %s10608_s19 = scalar_select %p7641_p6, 1, 0 }
   0xd   : > { %p7646_p8 = pnand %p4868_p5, %p119_p7  ;;  %s131_s22 = sshll.u32 %s7574_s21, 4  ;;  %s7650_s22 = int_to_ptr.vmem [resolvable:$true] %s131_s22 }
   0xe   : > { %s7575_s24 = smov [#allocation8]   ;;  %s7416_s28 = scalar_lea.hbm %s10585_s1, 9216 }
   0xf   : > { %p7203_p9 = pneg %p7646_p8  ;;  %s144_s25 = sshll.u32 %s7575_s24, 4  ;;  %s7661_s25 = int_to_ptr.vmem [resolvable:$true] %s144_s25 }
  0x10   : > { %p7417_p12 = scmp.ne.s32.totalorder %s10585_s1, %s7416_s28  ;;  %p7423_p5 = scmp.lt.u32.totalorder %s7416_s28, %s10585_s1 }
  0x11   : > { %p7657_p11 = pnand %p7203_p9, %p10588_p1 }
  0x13   : > { %p7418_p13 = pneg %p7657_p11 }
  0x15   : > { %p7419_p0 = pnand %p7418_p13, %p7417_p12 }
  0x17   : > { %p7420_p3 = pneg %p7419_p0 }
  0x19   : > { %p7425_p7 = pnand %p7423_p5, %p7420_p3 }
  0x1b   : > { %7428 = shalt.err (!%p7425_p7)
}
  0x1c   : > { %s7429_s6 = scalar_lea.vmem %s7650_s22, 9216  ;;  %p7437_p2 = scmp.lt.s32.totalorder %s7650_s22, %s7650_s22 }
  0x1d   : > { %p7430_p9 = scmp.ne.s32.totalorder %s7650_s22, %s7429_s6  ;;  %p7438_p12 = scmp.lt.s32.totalorder %s7429_s6, %s7429_s6 }
  0x1f   : > { %p7432_p10 = pnand %p7430_p9, %p7418_p13  ;;  %p7439_p0 = por %p7438_p12, %p7437_p2 }
  0x21   : > { %p7433_p1 = pneg %p7432_p10 }
  0x23   : > { %p7440_p6 = pnand %p7439_p0, %p7433_p1 }
  0x25   : > { %7443 = shalt.err (!%p7440_p6)
}
  0x26   : > { %s7576_s7 = smov 64   ;;  %s7577_s8 = smov 4  }
  0x27   : > { %7206 = dma.hbm_to_vmem [thread:$0]  (!%p7657_p11), %s10585_s1, 9216, %s7650_s22, [#allocation7], %s7576_s7, %s7576_s7, %s7577_s8  }
  0x28   : > { %s7444_s21 = scalar_lea.hbm %s10586_s2, 9216 }
  0x29   : > { %p7445_p2 = scmp.ne.s32.totalorder %s10586_s2, %s7444_s21  ;;  %p7451_p10 = scmp.lt.u32.totalorder %s7444_s21, %s10586_s2 }
  0x2b   : > { %p7447_p1 = pnand %p7445_p2, %p7418_p13 }
  0x2d   : > { %p7448_p6 = pneg %p7447_p1 }
  0x2f   : > { %p7453_p3 = pnand %p7451_p10, %p7448_p6 }
  0x31   : > { %7456 = shalt.err (!%p7453_p3)
}
  0x32   : > { %s7457_s22 = scalar_lea.vmem %s7661_s25, 9216  ;;  %p7465_p12 = scmp.lt.s32.totalorder %s7661_s25, %s7661_s25 }
  0x33   : > { %p7458_p5 = scmp.ne.s32.totalorder %s7661_s25, %s7457_s22  ;;  %p7466_p0 = scmp.lt.s32.totalorder %s7457_s22, %s7457_s22 }
  0x35   : > { %p7460_p7 = pnand %p7458_p5, %p7418_p13  ;;  %p7467_p2 = por %p7466_p0, %p7465_p12 }
  0x37   : > { %p7461_p9 = pneg %p7460_p7 }
  0x39   : > { %p7468_p1 = pnand %p7467_p2, %p7461_p9 }
  0x3b   : > { %7471 = shalt.err (!%p7468_p1)
}
  0x3c   : > { %7209 = dma.hbm_to_vmem [thread:$0]  (!%p7657_p11), %s10586_s2, 9216, %s7661_s25, [#allocation7], %s7576_s7, %s7576_s7, %s7577_s8  }
  0x3d   : > { %s7716_s4 = sadd.s32 1, %s7572_s15   ;;  %s27_s23 = sadd.s32 1, %s7568_s14 }
  0x3e   : > { %s24_s5 = ssub.s32 %s7572_s15, %s7716_s4  ;;  %p34_p13 = scmp.ne.s32.totalorder %s7568_s14, %s7564_s13 }
  0x3f   : > { %p25_p6 = scmp.eq.s32.totalorder %s24_s5, 0  ;;  %p35_p10 = scmp.eq.s32.totalorder %s7572_s15, 0 }
  0x40   : > { %p10611_p3 = scmp.eq.s32.totalorder %s7627_s16, 1  ;;  %p7220_p7 = scmp.lt.s32.totalorder %s7572_s15, 2 }
  0x41   : > { %s7732_s9 = scalar_select %p25_p6, %s7568_s14, %s27_s23  }
  0x42   : > { %p7726_p5 = por %p10611_p3, %p34_p13  ;;  %p36_p9 = por %p35_p10, %p34_p13 }
  0x43   : > { %s158_s10 = sand.u32 1, %s7568_s14   ;;  %s5029_s25 = sshll.u32 %s7572_s15, 12 }
  0x44   : > { %s10612_s6 = scalar_select %p7726_p5, 1, 0 }
  0x45   : > { %s4872_s11 = sshll.u32 %s158_s10, 8  ;;  %s7739_s17 = scalar_lea.hbm %s10584_s0, %s5029_s25 }
  0x46   : > { %s162_s21 = scalar_lea.vmem [#allocation3], %s4872_s11  ;;  %p7743_p11 = pnand %p7220_p7, %p36_p9 }
  0x47   : > { %s169_s24 = sshll.u32 %s162_s21, 4  ;;  %s7747_s27 = scalar_lea.sflag [#allocation4], %s158_s10  ;;  %s7741_s24 = int_to_ptr.vmem [resolvable:$true] %s169_s24 }
  0x48   : > { %s7472_s28 = scalar_lea.hbm %s7739_s17, 4096  ;;  %p7474_p0 = pneg %p7743_p11 }
  0x49   : > { %p7473_p12 = scmp.ne.s32.totalorder %s7739_s17, %s7472_s28  ;;  %s7477_s30 = scalar_lea.hbm %s10584_s0, 8192 }
  0x4a   : > { %p7478_p13 = scmp.lt.u32.totalorder %s7739_s17, %s10584_s0  ;;  %p7479_p6 = scmp.lt.u32.totalorder %s7477_s30, %s7472_s28 }
  0x4b   : > { %p7475_p2 = pnand %p7474_p0, %p7473_p12  ;;  %p7481_p3 = scmp.lt.u32.totalorder %s7472_s28, %s7739_s17 }
  0x4c   : > { %p7480_p10 = por %p7479_p6, %p7478_p13 }
  0x4d   : > { %p7476_p1 = pneg %p7475_p2 }
  0x4e   : > { %p7482_p7 = por %p7481_p3, %p7480_p10 }
  0x50   : > { %p7483_p9 = pnand %p7482_p7, %p7476_p1 }
  0x52   : > { %7486 = shalt.err (!%p7483_p9)
}
  0x53   : > { %s7487_s10 = scalar_lea.vmem %s7741_s24, 4096  ;;  %s7578_s11 = smov [#allocation3]  }
  0x54   : > { %p7488_p12 = scmp.ne.s32.totalorder %s7741_s24, %s7487_s10  ;;  %s7492_s25 = sshll.u32 %s7578_s11, 4  ;;  %s7493_s25 = int_to_ptr.vmem [resolvable:$false] %s7492_s25 }
  0x55   : > { %s7494_s7 = scalar_lea.vmem %s7493_s25, 8192  ;;  %p7495_p4 = scmp.lt.s32.totalorder %s7741_s24, %s7493_s25 }
  0x56   : > { %p7490_p2 = pnand %p7488_p12, %p7474_p0  ;;  %p7496_p13 = scmp.lt.s32.totalorder %s7494_s7, %s7487_s10 }
  0x58   : > { %p7491_p5 = pneg %p7490_p2  ;;  %p7497_p6 = por %p7496_p13, %p7495_p4 }
  0x5a   : > { %p7498_p10 = pnand %p7497_p6, %p7491_p5 }
  0x5c   : > { %7501 = shalt.err (!%p7498_p10)
}
  0x5d   : > { %s7579_s8 = smov 128   ;;  %s7580_s21 = smov 8  }
  0x5e   : > { %7213 = dma.hbm_to_vmem [thread:$0]  (!%p7743_p11), %s7739_s17, 4096, %s7741_s24, %s7747_s27, %s7579_s8, %s7579_s8, %s7580_s21  }
  0x5f   : > { %181 = sbr.rel (%p7646_p8) target bundleno = 1489 (0x5d1), region = 32 }
  0x66   : > { %s7778_s28 = sand.u32 1, %s7564_s13   ;;  %p10614_p4 = scmp.ne.s32.totalorder %s10607_s18, 0 }
  0x67   : > { %s4876_s22 = sshll.u32 %s7778_s28, 8  ;;  %s184_s29 = scalar_lea.sflag [#allocation4], %s7778_s28 }
  0x68   : > { %s7784_s30 = scalar_lea.vmem [#allocation3], %s4876_s22 }
  0x69   : > { %7547 = dma.done.wait (%p10614_p4), %s184_s29, 4096  }
  0x6a   : > { %7549 = vsyncadd (%p10614_p4), %s184_s29, 4294963200  ;;  %p10615_p5 = scmp.eq.s32.totalorder %s7627_s16, 0 }
  0x6c   : > { %7551 = dma.done.wait (%p10615_p5), [#allocation7], 18432   ;;  %p10616_p8 = pmov %p10615_p5 }
  0x6d   : > { %v258_v0 = vlaneseq  ;;  %v10591_v1 = vmov 0   ;;  %v7268_v4 = vld [vmem:[#allocation6 + $0x100] sm:$0xff]   ;;  %v7272_v8 = vld [vmem:[#allocation6 + $0x108] sm:$0xff]   ;;  %v7276_v12 = vld [vmem:[#allocation6 + $0x110] sm:$0xff]   ;;  %vm7582_vm3 = vmmov 1   ;;  %v10618_v38 = vmov 0 }
  0x6e   : > { %7553 = vsyncadd (%p10616_p8), [#allocation7], 4294948864  ;;  %1391 = vmatprep.mubr.bf16.mxu1 %v10591_v1  ;;  %v7269_v5 = vld [vmem:[#allocation6 + $0x40] sm:$0xff]   ;;  %5767 = vmatprep.subr.bf16.mxu0 %v7268_v4  ;;  %v7273_v9 = vld [vmem:[#allocation6 + $0x48] sm:$0xff]   ;;  %v10621_v46 = vmov 0  ;;  %s10411_s18 = scalar_lea.vmem [#allocation9], %s4876_s22 }
  0x6f   : > { %v7795_v2 = vshrl.u32 %v258_v0, 7  ;;  %v7270_v6 = vld [vmem:[#allocation6 + $0xc0] sm:$0xff]   ;;  %5903 = vmatprep.subr.bf16.mxu1 %v7269_v5  ;;  %v7274_v10 = vld [vmem:[#allocation6 + $0xc8] sm:$0xff]   ;;  %v7277_v13 = vld [vmem:[#allocation6 + $0x50] sm:$0xff]   ;;  %s5030_s20 = sshll.u32 %s7627_s16, 12  ;;  %s4775_s17 = sshll.u32 %s10411_s18, 4  ;;  %s10524_s17 = int_to_ptr.vmem [resolvable:$true] %s4775_s17 }
  0x70   : > { %v7271_v7 = vld [vmem:[#allocation6] sm:$0xff]   ;;  %5768 = vmatpush3.bf16.msra.mxu0 %v7270_v6  ;;  %v7275_v11 = vld [vmem:[#allocation6 + $0x8] sm:$0xff]   ;;  %v7278_v14 = vld [vmem:[#allocation6 + $0xd0] sm:$0xff]   ;;  %s10520_s27 = scalar_lea.hbm %s10587_s3, %s5030_s20  ;;  %s4762_s16 = scalar_lea.sflag [#allocation5], %s7778_s28 }
  0x71   : > { %10617 = vst [vmem:[#allocation13_spill] sm:$0xff] %v7795_v2  ;;  %v7798_v3 = vadd.s32 8, %v7795_v2  ;;  %5904 = vmatpush3.bf16.msra.mxu1 %v7271_v7  ;;  %5769 = vmatprep.subr.bf16.mxu0 %v7272_v8  ;;  %v7279_v15 = vld [vmem:[#allocation6 + $0x10] sm:$0xff]   ;;  %v7280_v16 = vld [vmem:[#allocation6 + $0x118] sm:$0xff]   ;;  %v7284_v20 = vld [vmem:[#allocation6 + $0x120] sm:$0xff]   ;;  %vm295_vm1 = vcmp.lt.s32.totalorder %v7795_v2, 1 }
  0x72   : > { %5905 = vmatprep.subr.bf16.mxu1 %v7273_v9  ;;  %v7281_v17 = vld [vmem:[#allocation6 + $0x58] sm:$0xff]   ;;  %v7285_v21 = vld [vmem:[#allocation6 + $0x60] sm:$0xff]   ;;  %v7288_v24 = vld [vmem:[#allocation6 + $0x128] sm:$0xff]   ;;  %vm7223_vm2 = vcmp.ne.s32.totalorder %v7795_v2, 0  ;;  %vm394_vm5 = vcmp.lt.s32.totalorder %v7795_v2, 7  ;;  %s7502_s23 = scalar_lea.vmem %s10524_s17, 4096 }
  0x73   : > { %v7282_v18 = vld [vmem:[#allocation6 + $0xd8] sm:$0xff]   ;;  %v7286_v22 = vld [vmem:[#allocation6 + $0xe0] sm:$0xff]   ;;  %v7289_v25 = vld [vmem:[#allocation6 + $0x68] sm:$0xff]   ;;  %vm7224_vm0 = vcmp.ne.s32.totalorder %v7798_v3, 15  ;;  %p7503_p11 = scmp.ne.s32.totalorder %s10524_s17, %s7502_s23  ;;  %p10687_p0 = scmp.ne.s32.totalorder %s10612_s6, 0 }
  0x74   : > { %5770 = vmatpush3.bf16.msra.mxu0 %v7274_v10  ;;  %v7283_v19 = vld [vmem:[#allocation6 + $0x18] sm:$0xff]   ;;  %v7287_v23 = vld [vmem:[#allocation6 + $0x20] sm:$0xff]   ;;  %v7290_v26 = vld [vmem:[#allocation6 + $0xe8] sm:$0xff]   ;;  %s7583_s5 = smov [#allocation9]  }
  0x75   : > { %5906 = vmatpush3.bf16.msra.mxu1 %v7275_v11  ;;  %5771 = vmatprep.subr.bf16.mxu0 %v7276_v12  ;;  %v7291_v27 = vld [vmem:[#allocation6 + $0x28] sm:$0xff]   ;;  %v7292_v28 = vld [vmem:[#allocation6 + $0x130] sm:$0xff]   ;;  %v7296_v32 = vld [vmem:[#allocation6 + $0x138] sm:$0xff]   ;;  %p7504_p1 = pnand %p7503_p11, %p10687_p0  ;;  %s7506_s10 = sshll.u32 %s7583_s5, 4  ;;  %s7507_s10 = int_to_ptr.vmem [resolvable:$false] %s7506_s10 }
  0x76   : > { %5907 = vmatprep.subr.bf16.mxu1 %v7277_v13  ;;  %v7293_v29 = vld [vmem:[#allocation6 + $0x70] sm:$0xff]   ;;  %v7297_v33 = vld [vmem:[#allocation6 + $0x78] sm:$0xff]   ;;  %v7802_v36 = vld [vmem:[%s7784_s30] sm:$0xff]  ;;  %s7508_s11 = scalar_lea.vmem %s7507_s10, 8192  ;;  %p7509_p7 = scmp.lt.s32.totalorder %s10524_s17, %s7507_s10 }
  0x77   : > { %v7294_v30 = vld [vmem:[#allocation6 + $0xf0] sm:$0xff]   ;;  %v7298_v34 = vld [vmem:[#allocation6 + $0xf8] sm:$0xff]   ;;  %v7805_v37 = vld [vmem:[%s7784_s30 + $0x8] sm:$0xff]  ;;  %v263_v39 = vrot.slane %v7802_v36, 7  ;;  %v362_v13 = vrot.slane %v7802_v36, 1  ;;  %p7505_p3 = pneg %p7504_p1  ;;  %p7510_p9 = scmp.lt.s32.totalorder %s7508_s11, %s7502_s23 }
  0x78   : > { %5772 = vmatpush3.bf16.msra.mxu0 %v7278_v14  ;;  %v7295_v31 = vld [vmem:[#allocation6 + $0x30] sm:$0xff]   ;;  %v7299_v35 = vld [vmem:[#allocation6 + $0x38] sm:$0xff]   ;;  %vm7809_vm4 = vmpackc.low %vm7224_vm0, %vm7582_vm3  ;;  %v279_v40 = vrot.slane %v7805_v37, 7  ;;  %v492_v41 = vpack.c.bf16 %v7805_v37, %v7802_v36 }
  0x79   : > { %5908 = vmatpush3.bf16.msra.mxu1 %v7279_v15  ;;  %5773 = vmatprep.subr.bf16.mxu0 %v7280_v16  ;;  %v10619_v38 = vsel %vm7809_vm4, 4294967295, %v10618_v38  ;;  %v7300_v42 = vld [vmem:[#allocation6 + $0x140] sm:$0xff]   ;;  %v228_v43 = vld [vmem:[%s7784_s30 + $0x10] sm:$0xff]  ;;  %vm7823_vm6 = vmpackc.low %vm7582_vm3, %vm7223_vm2  ;;  %p7511_p12 = por %p7510_p9, %p7509_p7 }
  0x7a   : > { %5909 = vmatprep.subr.bf16.mxu1 %v7281_v17  ;;  %10620 = vst [vmem:[#allocation14_spill] sm:$0xff] %v10619_v38  ;;  %v296_v44 = vsel %vm295_vm1, %v263_v39, %v279_v40  ;;  %v312_v45 = vsel %vm295_vm1, %v279_v40, %v263_v39  ;;  %v10622_v46 = vsel %vm7823_vm6, 4294967295, %v10621_v46  ;;  %v229_v47 = vld [vmem:[%s7784_s30 + $0x18] sm:$0xff]  ;;  %v264_v48 = vrot.slane %v228_v43, 7  ;;  %925 = vmatprep.mubr.bf16.mxu0 %v492_v41  ;;  %v7301_v54 = vld [vmem:[#allocation6 + $0x148] sm:$0xff]   ;;  %v7845_v60 = vld [vmem:[%s7784_s30 + $0x20] sm:$0xff] }
  0x7b   : > { %10623 = vst [vmem:[#allocation15_spill] sm:$0xff] %v10622_v46  ;;  %v363_v49 = vrot.slane %v228_v43, 1  ;;  %v5033_v50 = vpack.c.bf16 %v296_v44, %v312_v45  ;;  %v280_v51 = vrot.slane %v229_v47, 7  ;;  %v379_v52 = vrot.slane %v229_v47, 1  ;;  %v7848_v61 = vld [vmem:[%s7784_s30 + $0x28] sm:$0xff]  ;;  %v7302_v62 = vld [vmem:[#allocation6 + $0x150] sm:$0xff]   ;;  %p7512_p2 = pnand %p7511_p12, %p7505_p3 }
  0x7c   : > { %5774 = vmatpush3.bf16.msra.mxu0 %v7282_v18  ;;  %v7828_v53 = vpack.c.bf16 %v229_v47, %v228_v43  ;;  %v265_v0 = vrot.slane %v7845_v60, 7  ;;  %v281_v3 = vrot.slane %v7848_v61, 7  ;;  %v7856_v4 = vpack.c.bf16 %v7848_v61, %v7845_v60  ;;  %v7303_v5 = vld [vmem:[#allocation6 + $0x158] sm:$0xff]   ;;  %v7305_v6 = vld [vmem:[#allocation6 + $0x80] sm:$0xff]   ;;  %v7870_v9 = vld [vmem:[%s7784_s30 + $0x30] sm:$0xff] }
  0x7d   : > { %5910 = vmatpush3.bf16.msra.mxu1 %v7283_v19  ;;  %5775 = vmatprep.subr.bf16.mxu0 %v7284_v20  ;;  %v396_v55 = vsel %vm394_vm5, %v363_v49, %v379_v52  ;;  %v412_v56 = vsel %vm394_vm5, %v379_v52, %v363_v49  ;;  %v297_v58 = vsel %vm295_vm1, %v264_v48, %v280_v51  ;;  %v7873_v10 = vld [vmem:[%s7784_s30 + $0x38] sm:$0xff]  ;;  %v7304_v11 = vld [vmem:[#allocation6 + $0x160] sm:$0xff]   ;;  %v7307_v12 = vld [vmem:[#allocation6 + $0x88] sm:$0xff]   ;;  %v266_v15 = vrot.slane %v7870_v9, 7 }
  0x7e   : > { %5911 = vmatprep.subr.bf16.mxu1 %v7285_v21  ;;  %v7838_v57 = vpack.c.bf16 %v412_v56, %v396_v55  ;;  %v313_v59 = vsel %vm295_vm1, %v280_v51, %v264_v48  ;;  %v298_v7 = vsel %vm295_vm1, %v265_v0, %v281_v3  ;;  %v314_v8 = vsel %vm295_vm1, %v281_v3, %v265_v0  ;;  %v7885_v18 = vld [vmem:[%s7784_s30 + $0x40] sm:$0xff]  ;;  %v7890_v21 = vld [vmem:[%s7784_s30 + $0x48] sm:$0xff]  ;;  %v7926_v40 = vld [vmem:[%s7784_s30 + $0x78] sm:$0xff] }
  0x7f   : > { %v7850_v63 = vpack.c.bf16 %v297_v58, %v313_v59  ;;  %v7876_v14 = vpack.c.bf16 %v298_v7, %v314_v8  ;;  %v282_v16 = vrot.slane %v7873_v10, 7  ;;  %v7882_v17 = vpack.c.bf16 %v7873_v10, %v7870_v9  ;;  %v7931_v44 = vld [vmem:[%s7784_s30 + $0x80] sm:$0xff]  ;;  %v7310_v45 = vld [vmem:[#allocation6 + $0x98] sm:$0xff]   ;;  %v7963_v8 = vld [vmem:[%s7784_s30 + $0x90] sm:$0xff] }
  0x80   : > { %5776 = vmatpush3.bf16.msra.mxu0 %v7286_v22  ;;  %v378_v19 = vrot.slane %v7805_v37, 1  ;;  %v364_v20 = vrot.slane %v7845_v60, 1  ;;  %v7306_v22 = vld [vmem:[#allocation6 + $0x168] sm:$0xff]   ;;  %v366_v39 = vrot.slane %v7885_v18, 1  ;;  %v382_v48 = vrot.slane %v7890_v21, 1  ;;  %v7311_v0 = vld [vmem:[#allocation6 + $0x178] sm:$0xff]  }
  0x81   : > { %5912 = vmatpush3.bf16.msra.mxu1 %v7287_v23  ;;  %5777 = vmatprep.subr.bf16.mxu0 %v7288_v24  ;;  %v380_v23 = vrot.slane %v7848_v61, 1  ;;  %v365_v24 = vrot.slane %v7870_v9, 1  ;;  %v7938_v49 = vpack.c.bf16 %v7890_v21, %v7885_v18  ;;  %v8027_v59 = vld [vmem:[%s7784_s30 + $0xc0] sm:$0xff]  ;;  %v7314_v9 = vld [vmem:[#allocation6 + $0xb0] sm:$0xff]  }
  0x82   : > { %5913 = vmatprep.subr.bf16.mxu1 %v7289_v25  ;;  %v7898_v25 = vld [vmem:[%s7784_s30 + $0x50] sm:$0xff]  ;;  %v399_v61 = vsel %vm394_vm5, %v366_v39, %v382_v48 }
  0x83   : > { %v397_v55 = vsel %vm394_vm5, %v364_v20, %v380_v23  ;;  %v413_v36 = vsel %vm394_vm5, %v380_v23, %v364_v20  ;;  %v374_v20 = vrot.slane %v8027_v59, 1  ;;  %v415_v23 = vsel %vm394_vm5, %v382_v48, %v366_v39 }
  0x84   : > { %5778 = vmatpush3.bf16.msra.mxu0 %v7290_v26  ;;  %v7309_v26 = vld [vmem:[#allocation6 + $0x90] sm:$0xff]  }
  0x85   : > { %5914 = vmatpush3.bf16.msra.mxu1 %v7291_v27  ;;  %5779 = vmatprep.subr.bf16.mxu0 %v7292_v28  ;;  %v381_v27 = vrot.slane %v7873_v10, 1  ;;  %v7906_v28 = vld [vmem:[%s7784_s30 + $0x58] sm:$0xff] }
  0x86   : > { %5915 = vmatprep.subr.bf16.mxu1 %v7293_v29  ;;  %v299_v29 = vsel %vm295_vm1, %v266_v15, %v282_v16  ;;  %v284_v43 = vrot.slane %v7906_v28, 7  ;;  %v383_v52 = vrot.slane %v7906_v28, 1 }
  0x87   : > { %v398_v37 = vsel %vm394_vm5, %v365_v24, %v381_v27  ;;  %v414_v60 = vsel %vm394_vm5, %v381_v27, %v365_v24  ;;  %v10627_v24 = vrot.slane %v7898_v25, 1 }
  0x88   : > { %5780 = vmatpush3.bf16.msra.mxu0 %v7294_v30  ;;  %v315_v30 = vsel %vm295_vm1, %v282_v16, %v266_v15  ;;  %v385_v15 = vrot.slane %v7926_v40, 1  ;;  %v7993_v16 = vld [vmem:[%s7784_s30 + $0xb0] sm:$0xff]  ;;  %v8065_v10 = vpack.c.bf16 %v414_v60, %v398_v37  ;;  %v8115_v60 = vld [vmem:[%s7784_s30 + $0xd8] sm:$0xff] }
  0x89   : > { %5916 = vmatpush3.bf16.msra.mxu1 %v7295_v31  ;;  %5781 = vmatprep.subr.bf16.mxu0 %v7296_v32  ;;  %v267_v31 = vrot.slane %v7885_v18, 7  ;;  %v283_v32 = vrot.slane %v7890_v21, 7  ;;  %v7933_v47 = vpack.c.bf16 %v299_v29, %v315_v30  ;;  %v370_v29 = vrot.slane %v7931_v44, 1  ;;  %v8112_v37 = vld [vmem:[%s7784_s30 + $0xd0] sm:$0xff] }
  0x8a   : > { %5917 = vmatprep.subr.bf16.mxu1 %v7297_v33  ;;  %v7916_v33 = vld [vmem:[%s7784_s30 + $0x60] sm:$0xff]  ;;  %v373_v58 = vrot.slane %v7993_v16, 1  ;;  %v400_v27 = vsel %vm394_vm5, %v10627_v24, %v383_v52  ;;  %v10628_v21 = vmov %v10627_v24 }
  0x8b   : > { %v300_v56 = vsel %vm295_vm1, %v267_v31, %v283_v32  ;;  %v316_v3 = vsel %vm295_vm1, %v283_v32, %v267_v31  ;;  %v7980_v31 = vld [vmem:[%s7784_s30 + $0xa0] sm:$0xff]  ;;  %v7983_v32 = vld [vmem:[%s7784_s30 + $0xa8] sm:$0xff]  ;;  %v416_v39 = vsel %vm394_vm5, %v383_v52, %v10628_v21  ;;  %v7315_v21 = vld [vmem:[#allocation6 + $0xb8] sm:$0xff]  }
  0x8c   : > { %5782 = vmatpush3.bf16.msra.mxu0 %v7298_v34  ;;  %v7919_v34 = vld [vmem:[%s7784_s30 + $0x68] sm:$0xff] }
  0x8d   : > { %5918 = vmatpush3.bf16.msra.mxu1 %v7299_v35  ;;  %6583 = vmatprep.subr.bf16.mxu0 %v7300_v42  ;;  %v7922_v35 = vld [vmem:[%s7784_s30 + $0x70] sm:$0xff]  ;;  %v7999_v7 = vpack.c.bf16 %v7919_v34, %v7916_v33  ;;  %v10629_v48 = vrot.slane %v7919_v34, 1 }
  0x8e   : > { %6631 = vmatprep.subr.bf16.mxu1 %v7305_v6 }
  0x8f   : > { %5034 = vmatmul.mubr.msk.bf16.vlgmr.msra.gmra.mrb[0].mxu0 %vm7823_vm6, %v5033_v50  ;;  %10626 = vst [vmem:[#allocation18_spill] sm:$0xff] %v7999_v7 }
  0x90   : > { %1392 = vmatmul.mubr.bf16.vlgmr.msra.gmra.mrb[0].mxu1 %v10591_v1  ;;  %6584 = vmatpush3.bf16.msra.mxu0 %v7300_v42  ;;  %v268_v42 = vrot.slane %v7898_v25, 7  ;;  %v371_v1 = vrot.slane %v7963_v8, 1 }
  0x91   : > { %1399 = vmatprep.mubr.bf16.mxu1 %v492_v41  ;;  %933 = vmatprep.mubr.bf16.mxu0 %v7828_v53  ;;  %v7308_v41 = vld [vmem:[#allocation6 + $0x170] sm:$0xff]  }
  0x92   : > { %6585 = vmatprep.subr.bf16.mxu0 %v7301_v54  ;;  %6632 = vmatpush3.bf16.msra.mxu1 %v7305_v6  ;;  %v317_v6 = vsel %vm295_vm1, %v284_v43, %v268_v42 }
  0x93   : > { %6633 = vmatprep.subr.bf16.mxu1 %v7307_v12 }
  0x94   : > { %6586 = vmatpush3.bf16.msra.mxu0 %v7301_v54  ;;  %v411_v54 = vsel %vm394_vm5, %v378_v19, %v362_v13 }
  0x95   : > { %6587 = vmatprep.subr.bf16.mxu0 %v7302_v62 }
  0x96   : > { %6634 = vmatpush3.bf16.msra.mxu1 %v7307_v12  ;;  %v369_v12 = vrot.slane %v7922_v35, 1 }
  0x97   : > { %5038 = vmatmul.mubr.msk.bf16.gmra.mrb[4].mxu0 %vm7823_vm6, %v7850_v63  ;;  %6635 = vmatprep.subr.bf16.mxu1 %v7309_v26 }
  0x98   : > { %5162 = vmatmul.mubr.msk.bf16.gmra.mrb[4].mxu1 %vm7823_vm6, %v5033_v50  ;;  %941 = vmatprep.mubr.bf16.mxu0 %v7856_v4  ;;  %v7941_v50 = vld [vmem:[%s7784_s30 + $0x88] sm:$0xff]  ;;  %v402_v52 = vsel %vm394_vm5, %v369_v12, %v385_v15 }
  0x99   : > { %1407 = vmatprep.mubr.bf16.mxu1 %v7828_v53  ;;  %6588 = vmatpush3.bf16.msra.mxu0 %v7302_v62  ;;  %v386_v30 = vrot.slane %v7941_v50, 1 }
  0x9a   : > { %6589 = vmatprep.subr.bf16.mxu0 %v7303_v5  ;;  %6636 = vmatpush3.bf16.msra.mxu1 %v7309_v26  ;;  %v7974_v26 = vld [vmem:[%s7784_s30 + $0x98] sm:$0xff] }
  0x9b   : > { %6637 = vmatprep.subr.bf16.mxu1 %v7310_v45  ;;  %v403_v24 = vsel %vm394_vm5, %v370_v29, %v386_v30 }
  0x9d   : > { %6590 = vmatpush3.bf16.msra.mxu0 %v7303_v5  ;;  %v301_v5 = vsel %vm295_vm1, %v268_v42, %v284_v43  ;;  %v7985_v42 = vpack.c.bf16 %v300_v56, %v316_v3  ;;  %v7989_v43 = vpack.c.bf16 %v7906_v28, %v7898_v25  ;;  %v8003_v56 = vld [vmem:[%s7784_s30 + $0xb8] sm:$0xff]  ;;  %v7313_v3 = vld [vmem:[#allocation6 + $0xa8] sm:$0xff]   ;;  %v10632_v25 = vmov %v10629_v48 }
  0x9e   : > { %6591 = vmatprep.subr.bf16.mxu0 %v7304_v11  ;;  %6638 = vmatpush3.bf16.msra.mxu1 %v7310_v45  ;;  %v7995_v62 = vpack.c.bf16 %v301_v5, %v317_v6  ;;  %v395_v45 = vsel %vm394_vm5, %v362_v13, %v378_v19  ;;  %v372_v5 = vrot.slane %v7980_v31, 1  ;;  %v388_v6 = vrot.slane %v7983_v32, 1  ;;  %v8045_v19 = vld [vmem:[%s7784_s30 + $0xc8] sm:$0xff] }
  0x9f   : > { %5042 = vmatmul.mubr.msk.bf16.gmra.mrb[8].mxu0 %vm7823_vm6, %v7876_v14  ;;  %10624 = vst [vmem:[#allocation16_spill] sm:$0xff] %v7989_v43  ;;  %v8029_v51 = vpack.c.bf16 %v411_v54, %v395_v45  ;;  %v389_v13 = vrot.slane %v8003_v56, 1  ;;  %v8047_v54 = vpack.c.bf16 %v413_v36, %v397_v55  ;;  %v390_v18 = vrot.slane %v8045_v19, 1 }
  0xa0   : > { %5166 = vmatmul.mubr.msk.bf16.gmra.mrb[8].mxu1 %vm7823_vm6, %v7850_v63  ;;  %949 = vmatprep.mubr.bf16.mxu0 %v7882_v17  ;;  %10625 = vst [vmem:[#allocation17_spill] sm:$0xff] %v7995_v62  ;;  %v8084_v55 = vpack.c.bf16 %v415_v23, %v399_v61  ;;  %v418_v36 = vsel %vm394_vm5, %v385_v15, %v369_v12 }
  0xa1   : > { %1415 = vmatprep.mubr.bf16.mxu1 %v7856_v4  ;;  %6592 = vmatpush3.bf16.msra.mxu0 %v7304_v11  ;;  %v7312_v11 = vld [vmem:[#allocation6 + $0xa0] sm:$0xff]   ;;  %v8119_v23 = vpack.c.bf16 %v418_v36, %v402_v52 }
  0xa2   : > { %6593 = vmatprep.subr.bf16.mxu0 %v7306_v22  ;;  %6639 = vmatprep.subr.bf16.mxu1 %v7312_v11 }
  0xa3   : > { %6640 = vmatpush3.bf16.msra.mxu1 %v7312_v11 }
  0xa4   : > { %6641 = vmatprep.subr.bf16.mxu1 %v7313_v3 }
  0xa5   : > { %6594 = vmatpush3.bf16.msra.mxu0 %v7306_v22  ;;  %v7316_v22 = vld [vmem:[#allocation6 + $0x1c0] sm:$0xff]  }
  0xa6   : > { %6595 = vmatprep.subr.bf16.mxu0 %v7308_v41 }
  0xa7   : > { %5046 = vmatmul.mubr.msk.bf16.gmra.mrb[12].mxu0 %vm7823_vm6, %v7933_v47  ;;  %6642 = vmatpush3.bf16.msra.mxu1 %v7313_v3 }
  0xa8   : > { %5170 = vmatmul.mubr.msk.bf16.gmra.mrb[12].mxu1 %vm7823_vm6, %v7876_v14  ;;  %957 = vmatprep.mubr.bf16.mxu0 %v7938_v49 }
  0xa9   : > { %1423 = vmatprep.mubr.bf16.mxu1 %v7882_v17  ;;  %6596 = vmatpush3.bf16.msra.mxu0 %v7308_v41  ;;  %v387_v41 = vrot.slane %v7974_v26, 1 }
  0xaa   : > { %6597 = vmatprep.subr.bf16.mxu0 %v7311_v0  ;;  %6643 = vmatprep.subr.bf16.mxu1 %v7314_v9 }
  0xab   : > { %v404_v15 = vsel %vm394_vm5, %v371_v1, %v387_v41  ;;  %v420_v3 = vsel %vm394_vm5, %v387_v41, %v371_v1  ;;  %v391_v1 = vrot.slane %v8115_v60, 1  ;;  %v8147_v41 = vld [vmem:[%s7784_s30 + $0xe8] sm:$0xff]  ;;  %6644 = vmatpush3.bf16.msra.mxu1 %v7314_v9 }
  0xac   : > { %6645 = vmatprep.subr.bf16.mxu1 %v7315_v21 }
  0xad   : > { %6598 = vmatpush3.bf16.msra.mxu0 %v7311_v0  ;;  %v10630_v0 = vrot.slane %v7916_v33, 1 }
  0xae   : > { %6039 = vmatprep.subr.bf16.mxu0 %v7316_v22  ;;  %v8099_v22 = vpack.c.bf16 %v416_v39, %v400_v27  ;;  %v419_v27 = vsel %vm394_vm5, %v386_v30, %v370_v29  ;;  %v405_v39 = vsel %vm394_vm5, %v372_v5, %v388_v6  ;;  %v421_v29 = vsel %vm394_vm5, %v388_v6, %v372_v5  ;;  %v8157_v6 = vld [vmem:[#allocation6 + $0x200] sm:$0xff]  }
  0xaf   : > { %5050 = vmatmul.mubr.msk.bf16.gmra.mrb[16].mxu0 %vm7823_vm6, %v7985_v42  ;;  %v401_v11 = vsel %vm394_vm5, %v10630_v0, %v10629_v48  ;;  %v10631_v45 = vmov %v10630_v0  ;;  %v8125_v12 = vpack.c.bf16 %v419_v27, %v403_v24  ;;  %v8134_v48 = vld [vmem:[%s7784_s30 + $0xe0] sm:$0xff]  ;;  %v8136_v0 = vpack.c.bf16 %v420_v3, %v404_v15  ;;  %v8180_v3 = vld [vmem:[%s7784_s30 + $0xf8] sm:$0xff]  ;;  %6646 = vmatpush3.bf16.msra.mxu1 %v7315_v21 }
  0xb0   : > { %5174 = vmatmul.mubr.msk.bf16.gmra.mrb[16].mxu1 %vm7823_vm6, %v7933_v47  ;;  %965 = vmatprep.mubr.bf16.mxu0 %v7989_v43  ;;  %v417_v28 = vsel %vm394_vm5, %v10632_v25, %v10631_v45  ;;  %v406_v30 = vsel %vm394_vm5, %v373_v58, %v389_v13  ;;  %v375_v45 = vrot.slane %v8112_v37, 1  ;;  %v8150_v25 = vld [vmem:[%s7784_s30 + $0xf0] sm:$0xff]  ;;  %v376_v5 = vrot.slane %v8134_v48, 1 }
  0xb1   : > { %1431 = vmatprep.mubr.bf16.mxu1 %v7938_v49  ;;  %v8117_v61 = vpack.c.bf16 %v417_v28, %v401_v11  ;;  %v422_v11 = vsel %vm394_vm5, %v389_v13, %v373_v58  ;;  %v8152_v28 = vpack.c.bf16 %v421_v29, %v405_v39  ;;  %v10633_v58 = vrot.slane %v7919_v34, 7  ;;  %6679 = vmatprep.subr.bf16.mxu1 %v8157_v6 }
  0xb2   : > { %v8154_v52 = vpack.c.bf16 %v422_v11, %v406_v30  ;;  %v10634_v13 = vrot.slane %v7916_v33, 7  ;;  %v392_v15 = vrot.slane %v8147_v41, 1  ;;  %v377_v39 = vrot.slane %v8150_v25, 1 }
  0xb3   : > { %v10636_v27 = vmov %v10633_v58  ;;  %v407_v33 = vsel %vm394_vm5, %v374_v20, %v390_v18  ;;  %v423_v34 = vsel %vm394_vm5, %v390_v18, %v374_v20  ;;  %v393_v29 = vrot.slane %v8180_v3, 1 }
  0xb4   : > { %v302_v36 = vsel %vm295_vm1, %v10634_v13, %v10633_v58  ;;  %v10635_v24 = vmov %v10634_v13  ;;  %v8189_v30 = vpack.c.bf16 %v423_v34, %v407_v33  ;;  %v408_v11 = vsel %vm394_vm5, %v375_v45, %v391_v1 }
  0xb5   : > { %v318_v9 = vsel %vm295_vm1, %v10636_v27, %v10635_v24  ;;  %v424_v58 = vsel %vm394_vm5, %v391_v1, %v375_v45  ;;  %v8202_v20 = vpack.c.bf16 %v7926_v40, %v7922_v35  ;;  %v272_v18 = vrot.slane %v7963_v8, 7 }
  0xb6   : > { %v8195_v13 = vpack.c.bf16 %v424_v58, %v408_v11  ;;  %v8198_v24 = vpack.c.bf16 %v302_v36, %v318_v9  ;;  %v288_v27 = vrot.slane %v7974_v26, 7  ;;  %v10639_v21 = vrot.slane %v7926_v40, 7 }
  0xb7   : > { %5054 = vmatmul.mubr.msk.bf16.gmra.mrb[20].mxu0 %vm7823_vm6, %v7995_v62  ;;  %10638 = vst [vmem:[#allocation20_spill] sm:$0xff] %v8202_v20  ;;  %v10640_v45 = vrot.slane %v7922_v35, 7  ;;  %v273_v36 = vrot.slane %v7980_v31, 7  ;;  %v289_v9 = vrot.slane %v7983_v32, 7  ;;  %v409_v33 = vsel %vm394_vm5, %v376_v5, %v392_v15 }
  0xb8   : > { %5178 = vmatmul.mubr.msk.bf16.gmra.mrb[20].mxu1 %vm7823_vm6, %v7985_v42  ;;  %973 = vmatprep.mubr.bf16.mxu0 %v7999_v7  ;;  %10637 = vst [vmem:[#allocation19_spill] sm:$0xff] %v8198_v24  ;;  %v425_v34 = vsel %vm394_vm5, %v392_v15, %v376_v5  ;;  %v10642_v58 = vmov %v10639_v21  ;;  %v8244_v35 = vpack.c.bf16 %v7941_v50, %v7931_v44  ;;  %v274_v40 = vrot.slane %v7993_v16, 7 }
  0xb9   : > { %1439 = vmatprep.mubr.bf16.mxu1 %v7989_v43  ;;  %v303_v1 = vsel %vm295_vm1, %v10640_v45, %v10639_v21  ;;  %v10641_v11 = vmov %v10640_v45  ;;  %v8232_v45 = vpack.c.bf16 %v425_v34, %v409_v33  ;;  %v290_v15 = vrot.slane %v8003_v56, 7 }
  0xba   : > { %v319_v21 = vsel %vm295_vm1, %v10642_v58, %v10641_v11  ;;  %v10644_v33 = vrot.slane %v7931_v44, 7  ;;  %v305_v44 = vsel %vm295_vm1, %v272_v18, %v288_v27 }
  0xbb   : > { %v8240_v5 = vpack.c.bf16 %v303_v1, %v319_v21  ;;  %v10643_v1 = vrot.slane %v7941_v50, 7  ;;  %v321_v50 = vsel %vm295_vm1, %v288_v27, %v272_v18  ;;  %v306_v18 = vsel %vm295_vm1, %v273_v36, %v289_v9 }
  0xbc   : > { %v10645_v11 = vmov %v10644_v33  ;;  %v322_v27 = vsel %vm295_vm1, %v289_v9, %v273_v36  ;;  %v307_v36 = vsel %vm295_vm1, %v274_v40, %v290_v15  ;;  %v323_v9 = vsel %vm295_vm1, %v290_v15, %v274_v40 }
  0xbd   : > { %v304_v34 = vsel %vm295_vm1, %v10644_v33, %v10643_v1  ;;  %v10646_v58 = vmov %v10643_v1  ;;  %v293_v1 = vrot.slane %v8147_v41, 7  ;;  %v8368_v33 = vpack.c.bf16 %v8147_v41, %v8134_v48 }
  0xbe   : > { %v320_v21 = vsel %vm295_vm1, %v10646_v58, %v10645_v11  ;;  %v278_v41 = vrot.slane %v8150_v25, 7  ;;  %v8388_v11 = vpack.c.bf16 %v8180_v3, %v8150_v25 }
  0xbf   : > { %5058 = vmatmul.mubr.msk.bf16.gmra.mrb[24].mxu0 %vm7823_vm6, %v8198_v24 }
  0xc0   : > { %5182 = vmatmul.mubr.msk.bf16.gmra.mrb[24].mxu1 %vm7823_vm6, %v7995_v62  ;;  %981 = vmatprep.mubr.bf16.mxu0 %v8202_v20  ;;  %v426_v62 = vsel %vm394_vm5, %v393_v29, %v377_v39 }
  0xc1   : > { %1447 = vmatprep.mubr.bf16.mxu1 %v7999_v7  ;;  %v410_v7 = vsel %vm394_vm5, %v377_v39, %v393_v29  ;;  %v276_v39 = vrot.slane %v8112_v37, 7  ;;  %v292_v29 = vrot.slane %v8115_v60, 7 }
  0xc2   : > { %v8238_v43 = vpack.c.bf16 %v426_v62, %v410_v7  ;;  %v275_v62 = vrot.slane %v8027_v59, 7  ;;  %v291_v7 = vrot.slane %v8045_v19, 7 }
  0xc4   : > { %v308_v40 = vsel %vm295_vm1, %v275_v62, %v291_v7  ;;  %v324_v15 = vsel %vm295_vm1, %v291_v7, %v275_v62  ;;  %v309_v62 = vsel %vm295_vm1, %v276_v39, %v292_v29  ;;  %v325_v7 = vsel %vm295_vm1, %v292_v29, %v276_v39 }
  0xc7   : > { %5062 = vmatmul.mubr.msk.bf16.gmra.mrb[28].mxu0 %vm7823_vm6, %v8240_v5 }
  0xc8   : > { %5186 = vmatmul.mubr.msk.bf16.gmra.mrb[28].mxu1 %vm7823_vm6, %v8198_v24  ;;  %989 = vmatprep.mubr.bf16.mxu0 %v8244_v35  ;;  %v8276_v24 = vpack.c.bf16 %v7974_v26, %v7963_v8  ;;  %v8290_v8 = vpack.c.bf16 %v305_v44, %v321_v50  ;;  %v8294_v26 = vpack.c.bf16 %v7983_v32, %v7980_v31  ;;  %v7317_v44 = vld [vmem:[#allocation6 + $0x180] sm:$0xff]   ;;  %v7318_v50 = vld [vmem:[#allocation6 + $0x1c8] sm:$0xff]  }
  0xc9   : > { %1455 = vmatprep.mubr.bf16.mxu1 %v8202_v20  ;;  %v8272_v20 = vpack.c.bf16 %v304_v34, %v320_v21  ;;  %v8308_v31 = vpack.c.bf16 %v306_v18, %v322_v27  ;;  %v8312_v32 = vpack.c.bf16 %v8003_v56, %v7993_v16  ;;  %v8326_v16 = vpack.c.bf16 %v307_v36, %v323_v9  ;;  %v7327_v18 = vld [vmem:[#allocation6 + $0x208] sm:$0xff]   ;;  %v7320_v36 = vld [vmem:[#allocation6 + $0x1d0] sm:$0xff]  }
  0xca   : > { %v8330_v56 = vpack.c.bf16 %v8045_v19, %v8027_v59  ;;  %v8344_v59 = vpack.c.bf16 %v308_v40, %v324_v15  ;;  %v8348_v19 = vpack.c.bf16 %v8115_v60, %v8112_v37  ;;  %v8362_v37 = vpack.c.bf16 %v309_v62, %v325_v7  ;;  %v7319_v27 = vld [vmem:[#allocation6 + $0x188] sm:$0xff]   ;;  %v7321_v9 = vld [vmem:[#allocation6 + $0x190] sm:$0xff]   ;;  %v7322_v40 = vld [vmem:[#allocation6 + $0x1d8] sm:$0xff]  }
  0xcb   : > { %v277_v60 = vrot.slane %v8134_v48, 7  ;;  %v294_v34 = vrot.slane %v8180_v3, 7  ;;  %v10647_v3 = vmov 0   ;;  %v7331_v15 = vld [vmem:[#allocation6 + $0x218] sm:$0xff]   ;;  %v7324_v62 = vld [vmem:[#allocation6 + $0x1e0] sm:$0xff]  }
  0xcc   : > { %v7333_v7 = vld [vmem:[#allocation6 + $0x220] sm:$0xff]  }
  0xcd   : > { %v310_v39 = vsel %vm295_vm1, %v277_v60, %v293_v1  ;;  %v326_v29 = vsel %vm295_vm1, %v293_v1, %v277_v60  ;;  %v311_v58 = vsel %vm295_vm1, %v278_v41, %v294_v34  ;;  %v327_v21 = vsel %vm295_vm1, %v294_v34, %v278_v41  ;;  %v7326_v60 = vld [vmem:[#allocation6 + $0x1a0] sm:$0xff]   ;;  %v7328_v1 = vld [vmem:[#allocation6 + $0x1e8] sm:$0xff]   ;;  %v7332_v41 = vld [vmem:[#allocation6 + $0x1f0] sm:$0xff]  }
  0xce   : > { %v8382_v48 = vpack.c.bf16 %v310_v39, %v326_v29  ;;  %v8402_v25 = vpack.c.bf16 %v311_v58, %v327_v21  ;;  %v7335_v39 = vld [vmem:[#allocation6 + $0x228] sm:$0xff]   ;;  %v7337_v34 = vld [vmem:[#allocation6 + $0x230] sm:$0xff]   ;;  %v7336_v21 = vld [vmem:[#allocation6 + $0x1f8] sm:$0xff]  }
  0xcf   : > { %5066 = vmatmul.mubr.msk.bf16.gmra.mrb[32].mxu0 %vm7823_vm6, %v8272_v20  ;;  %v7330_v29 = vld [vmem:[#allocation6 + $0x1a8] sm:$0xff]   ;;  %v7334_v58 = vld [vmem:[#allocation6 + $0x1b0] sm:$0xff]  }
  0xd0   : > { %5190 = vmatmul.mubr.msk.bf16.gmra.mrb[32].mxu1 %vm7823_vm6, %v8240_v5  ;;  %997 = vmatprep.mubr.bf16.mxu0 %v8276_v24 }
  0xd1   : > { %1463 = vmatprep.mubr.bf16.mxu1 %v8244_v35 }
  0xd7   : > { %5070 = vmatmul.mubr.msk.bf16.gmra.mrb[36].mxu0 %vm7823_vm6, %v8290_v8 }
  0xd8   : > { %5194 = vmatmul.mubr.msk.bf16.gmra.mrb[36].mxu1 %vm7823_vm6, %v8272_v20  ;;  %1005 = vmatprep.mubr.bf16.mxu0 %v8294_v26 }
  0xd9   : > { %1471 = vmatprep.mubr.bf16.mxu1 %v8276_v24 }
  0xdf   : > { %5074 = vmatmul.mubr.msk.bf16.gmra.mrb[40].mxu0 %vm7823_vm6, %v8308_v31 }
  0xe0   : > { %5198 = vmatmul.mubr.msk.bf16.gmra.mrb[40].mxu1 %vm7823_vm6, %v8290_v8  ;;  %1013 = vmatprep.mubr.bf16.mxu0 %v8312_v32 }
  0xe1   : > { %1479 = vmatprep.mubr.bf16.mxu1 %v8294_v26 }
  0xe7   : > { %5078 = vmatmul.mubr.msk.bf16.gmra.mrb[44].mxu0 %vm7823_vm6, %v8326_v16 }
  0xe8   : > { %5202 = vmatmul.mubr.msk.bf16.gmra.mrb[44].mxu1 %vm7823_vm6, %v8308_v31  ;;  %1021 = vmatprep.mubr.bf16.mxu0 %v8330_v56 }
  0xe9   : > { %1487 = vmatprep.mubr.bf16.mxu1 %v8312_v32 }
  0xef   : > { %5082 = vmatmul.mubr.msk.bf16.gmra.mrb[48].mxu0 %vm7823_vm6, %v8344_v59 }
  0xf0   : > { %5206 = vmatmul.mubr.msk.bf16.gmra.mrb[48].mxu1 %vm7823_vm6, %v8326_v16  ;;  %1029 = vmatprep.mubr.bf16.mxu0 %v8348_v19 }
  0xf1   : > { %1495 = vmatprep.mubr.bf16.mxu1 %v8330_v56 }
  0xf7   : > { %5086 = vmatmul.mubr.msk.bf16.gmra.mrb[52].mxu0 %vm7823_vm6, %v8362_v37 }
  0xf8   : > { %5210 = vmatmul.mubr.msk.bf16.gmra.mrb[52].mxu1 %vm7823_vm6, %v8344_v59  ;;  %1037 = vmatprep.mubr.bf16.mxu0 %v8368_v33 }
  0xf9   : > { %1503 = vmatprep.mubr.bf16.mxu1 %v8348_v19 }
  0xff   : > { %5090 = vmatmul.mubr.msk.bf16.gmra.mrb[56].mxu0 %vm7823_vm6, %v8382_v48 }
 0x100   : > { %5214 = vmatmul.mubr.msk.bf16.gmra.mrb[56].mxu1 %vm7823_vm6, %v8362_v37  ;;  %1045 = vmatprep.mubr.bf16.mxu0 %v8388_v11 }
 0x101   : > { %1511 = vmatprep.mubr.bf16.mxu1 %v8368_v33 }
 0x107   : > { %5094 = vmatmul.mubr.msk.bf16.gmra.mrb[60].mxu0 %vm7823_vm6, %v8402_v25 }
 0x108   : > { %5218 = vmatmul.mubr.msk.bf16.gmra.mrb[60].mxu1 %vm7823_vm6, %v8382_v48  ;;  %6599 = vmatprep.mubr.msk.bf16.mxu0 %vm7809_vm4, %v8029_v51 }
 0x109   : > { %6647 = vmatprep.mubr.bf16.mxu1 %v10647_v3 }
 0x10f   : > { %6600 = vmatmul.mubr.msk.bf16.vlgmr.msra.gmra.mrb[64].mxu0 %vm7809_vm4, %v7838_v57 }
 0x110   : > { %6648 = vmatmul.mubr.msk.bf16.vlgmr.msra.gmra.mrb[64].mxu1 %vm7809_vm4, %v8029_v51  ;;  %6040 = vmatpush3.bf16.msra.mxu0 %v7317_v44  ;;  %v7329_v51 = vld [vmem:[#allocation6 + $0x210] sm:$0xff]   ;;  %v7339_v44 = vld [vmem:[#allocation6 + $0x238] sm:$0xff]  }
 0x111   : > { %6651 = vmatprep.mubr.msk.bf16.mxu1 %vm7809_vm4, %v7838_v57  ;;  %6603 = vmatprep.mubr.msk.bf16.mxu0 %vm7809_vm4, %v8047_v54 }
 0x112   : > { %6041 = vmatprep.subr.bf16.mxu0 %v7318_v50  ;;  %6680 = vmatpush3.bf16.msra.mxu1 %v8157_v6  ;;  %v7323_v6 = vld [vmem:[#allocation6 + $0x198] sm:$0xff]  }
 0x113   : > { %6681 = vmatprep.subr.bf16.mxu1 %v7327_v18  ;;  %v7338_v50 = vld [vmem:[#allocation6 + $0x1b8] sm:$0xff]  }
 0x114   : > { %6042 = vmatpush3.bf16.msra.mxu0 %v7319_v27 }
 0x115   : > { %6043 = vmatprep.subr.bf16.mxu0 %v7320_v36 }
 0x116   : > { %6682 = vmatpush3.bf16.msra.mxu1 %v7327_v18 }
 0x117   : > { %6683 = vmatprep.subr.bf16.mxu1 %v7329_v51  ;;  %6604 = vmatmul.mubr.msk.bf16.gmra.mrb[68].mxu0 %vm7809_vm4, %v8065_v10 }
 0x118   : > { %6652 = vmatmul.mubr.msk.bf16.gmra.mrb[68].mxu1 %vm7809_vm4, %v8047_v54  ;;  %6607 = vmatprep.mubr.msk.bf16.mxu0 %vm7809_vm4, %v8084_v55 }
 0x119   : > { %6655 = vmatprep.mubr.msk.bf16.mxu1 %vm7809_vm4, %v8065_v10  ;;  %6044 = vmatpush3.bf16.msra.mxu0 %v7321_v9 }
 0x11a   : > { %6045 = vmatprep.subr.bf16.mxu0 %v7322_v40  ;;  %6684 = vmatpush3.bf16.msra.mxu1 %v7329_v51 }
 0x11b   : > { %6685 = vmatprep.subr.bf16.mxu1 %v7331_v15 }
 0x11d   : > { %6046 = vmatpush3.bf16.msra.mxu0 %v7323_v6 }
 0x11e   : > { %6047 = vmatprep.subr.bf16.mxu0 %v7324_v62  ;;  %6686 = vmatpush3.bf16.msra.mxu1 %v7331_v15 }
 0x11f   : > { %6687 = vmatprep.subr.bf16.mxu1 %v7333_v7  ;;  %6608 = vmatmul.mubr.msk.bf16.gmra.mrb[72].mxu0 %vm7809_vm4, %v8099_v22 }
 0x120   : > { %6656 = vmatmul.mubr.msk.bf16.gmra.mrb[72].mxu1 %vm7809_vm4, %v8084_v55  ;;  %6611 = vmatprep.mubr.msk.bf16.mxu0 %vm7809_vm4, %v8117_v61 }
 0x121   : > { %6659 = vmatprep.mubr.msk.bf16.mxu1 %vm7809_vm4, %v8099_v22  ;;  %6048 = vmatpush3.bf16.msra.mxu0 %v7326_v60 }
 0x122   : > { %6049 = vmatprep.subr.bf16.mxu0 %v7328_v1  ;;  %6688 = vmatpush3.bf16.msra.mxu1 %v7333_v7  ;;  %v10650_v7 = vld [vmem:[#allocation18_spill] sm:$0xff] }
 0x123   : > { %6689 = vmatprep.subr.bf16.mxu1 %v7335_v39 }
 0x125   : > { %6050 = vmatpush3.bf16.msra.mxu0 %v7330_v29 }
 0x126   : > { %6051 = vmatprep.subr.bf16.mxu0 %v7332_v41  ;;  %6690 = vmatpush3.bf16.msra.mxu1 %v7335_v39 }
 0x127   : > { %6691 = vmatprep.subr.bf16.mxu1 %v7337_v34  ;;  %6612 = vmatmul.mubr.msk.bf16.gmra.mrb[76].mxu0 %vm7809_vm4, %v8119_v23 }
 0x128   : > { %6660 = vmatmul.mubr.msk.bf16.gmra.mrb[76].mxu1 %vm7809_vm4, %v8117_v61  ;;  %6615 = vmatprep.mubr.msk.bf16.mxu0 %vm7809_vm4, %v8125_v12 }
 0x129   : > { %6663 = vmatprep.mubr.msk.bf16.mxu1 %vm7809_vm4, %v8119_v23  ;;  %6052 = vmatpush3.bf16.msra.mxu0 %v7334_v58 }
 0x12a   : > { %6053 = vmatprep.subr.bf16.mxu0 %v7336_v21  ;;  %6692 = vmatpush3.bf16.msra.mxu1 %v7337_v34 }
 0x12b   : > { %6693 = vmatprep.subr.bf16.mxu1 %v7339_v44 }
 0x12d   : > { %6054 = vmatpush3.bf16.msra.mxu0 %v7338_v50 }
 0x12e   : > { %6694 = vmatpush3.bf16.msra.mxu1 %v7339_v44 }
 0x12f   : > { %6616 = vmatmul.mubr.msk.bf16.gmra.mrb[80].mxu0 %vm7809_vm4, %v8136_v0 }
 0x130   : > { %6664 = vmatmul.mubr.msk.bf16.gmra.mrb[80].mxu1 %vm7809_vm4, %v8125_v12  ;;  %6619 = vmatprep.mubr.msk.bf16.mxu0 %vm7809_vm4, %v8152_v28 }
 0x131   : > { %6667 = vmatprep.mubr.msk.bf16.mxu1 %vm7809_vm4, %v8136_v0 }
 0x137   : > { %6620 = vmatmul.mubr.msk.bf16.gmra.mrb[84].mxu0 %vm7809_vm4, %v8154_v52 }
 0x138   : > { %6668 = vmatmul.mubr.msk.bf16.gmra.mrb[84].mxu1 %vm7809_vm4, %v8152_v28  ;;  %6623 = vmatprep.mubr.msk.bf16.mxu0 %vm7809_vm4, %v8189_v30 }
 0x139   : > { %6671 = vmatprep.mubr.msk.bf16.mxu1 %vm7809_vm4, %v8154_v52 }
 0x13f   : > { %6624 = vmatmul.mubr.msk.bf16.gmra.mrb[88].mxu0 %vm7809_vm4, %v8195_v13 }
 0x140   : > { %6672 = vmatmul.mubr.msk.bf16.gmra.mrb[88].mxu1 %vm7809_vm4, %v8189_v30  ;;  %6627 = vmatprep.mubr.msk.bf16.mxu0 %vm7809_vm4, %v8232_v45 }
 0x141   : > { %6675 = vmatprep.mubr.msk.bf16.mxu1 %vm7809_vm4, %v8195_v13 }
 0x147   : > { %6628 = vmatmul.mubr.msk.bf16.gmra.mrb[92].mxu0 %vm7809_vm4, %v8238_v43 }
 0x148   : > { %6676 = vmatmul.mubr.msk.bf16.gmra.mrb[92].mxu1 %vm7809_vm4, %v8232_v45  ;;  %1955 = vmatprep.mubr.bf16.mxu0 %v7828_v53 }
 0x149   : > { %6695 = vmatprep.mubr.msk.bf16.mxu1 %vm7809_vm4, %v7838_v57 }
 0x14f   : > { %5282 = vmatmul.mubr.msk.bf16.vlgmr.msra.gmra.mrb[96].mxu0 %vm7823_vm6, %v7850_v63 }
 0x150   : > { %6696 = vmatmul.mubr.msk.bf16.vlgmr.msra.gmra.mrb[64].mxu1 %vm7809_vm4, %v8047_v54  ;;  %1963 = vmatprep.mubr.bf16.mxu0 %v7856_v4 }
 0x151   : > { %6699 = vmatprep.mubr.msk.bf16.mxu1 %vm7809_vm4, %v8065_v10 }
 0x157   : > { %5286 = vmatmul.mubr.msk.bf16.gmra.mrb[100].mxu0 %vm7823_vm6, %v7876_v14 }
 0x158   : > { %6700 = vmatmul.mubr.msk.bf16.gmra.mrb[68].mxu1 %vm7809_vm4, %v8084_v55  ;;  %1971 = vmatprep.mubr.bf16.mxu0 %v7882_v17 }
 0x159   : > { %6703 = vmatprep.mubr.msk.bf16.mxu1 %vm7809_vm4, %v8099_v22 }
 0x15f   : > { %5290 = vmatmul.mubr.msk.bf16.gmra.mrb[104].mxu0 %vm7823_vm6, %v7933_v47 }
 0x160   : > { %6704 = vmatmul.mubr.msk.bf16.gmra.mrb[72].mxu1 %vm7809_vm4, %v8117_v61  ;;  %1979 = vmatprep.mubr.bf16.mxu0 %v7938_v49  ;;  %v10648_v49 = vld [vmem:[#allocation16_spill] sm:$0xff] }
 0x161   : > { %6707 = vmatprep.mubr.msk.bf16.mxu1 %vm7809_vm4, %v8119_v23 }
 0x162   : > { %v5783_v57 = vpop.f32.mrb[0].mxu0 }
 0x163   : > { %v5919_v53 = vpop.f32.mrb[0].mxu1  ;;  %v5784_v4 = vpop.f32.mrb[1].mxu0 }
 0x164   : > { %v5920_v63 = vpop.f32.mrb[1].mxu1  ;;  %v5786_v54 = vpop.f32.mrb[2].mxu0  ;;  %v8541_v55 = vadd.f32 %v5784_v4, %v5783_v57  ;;  %v10652_v57 = vld [vmem:[#allocation20_spill] sm:$0xff] }
 0x165   : > { %v8539_v14 = vadd.f32 %v5920_v63, %v5919_v53  ;;  %v5922_v17 = vpop.f32.mrb[2].mxu1  ;;  %v5787_v22 = vpop.f32.mrb[3].mxu0  ;;  %v10651_v53 = vld [vmem:[#allocation19_spill] sm:$0xff] }
 0x166   : > { %v5923_v10 = vpop.f32.mrb[3].mxu1  ;;  %v8548_v47 = vadd.f32 %v5787_v22, %v5786_v54 }
 0x167   : > { %v8543_v61 = vadd.f32 %v5923_v10, %v5922_v17  ;;  %5294 = vmatmul.mubr.msk.bf16.gmra.mrb[108].mxu0 %vm7823_vm6, %v7985_v42 }
 0x168   : > { %6708 = vmatmul.mubr.msk.bf16.gmra.mrb[76].mxu1 %vm7809_vm4, %v8125_v12  ;;  %1987 = vmatprep.mubr.bf16.mxu0 %v10648_v49 }
 0x169   : > { %6711 = vmatprep.mubr.msk.bf16.mxu1 %vm7809_vm4, %v8136_v0  ;;  %v10649_v0 = vld [vmem:[#allocation17_spill] sm:$0xff] }
 0x16a   : > { %v5789_v18 = vpop.f32.mrb[4].mxu0 }
 0x16b   : > { %v5925_v23 = vpop.f32.mrb[4].mxu1  ;;  %v5790_v36 = vpop.f32.mrb[5].mxu0 }
 0x16c   : > { %v5926_v27 = vpop.f32.mrb[5].mxu1  ;;  %v5792_v12 = vpop.f32.mrb[6].mxu0  ;;  %v8559_v15 = vadd.f32 %v5790_v36, %v5789_v18 }
 0x16d   : > { %v8557_v51 = vadd.f32 %v5926_v27, %v5925_v23  ;;  %v5928_v9 = vpop.f32.mrb[6].mxu1  ;;  %v5793_v6 = vpop.f32.mrb[7].mxu0 }
 0x16e   : > { %v5929_v40 = vpop.f32.mrb[7].mxu1  ;;  %v8566_v42 = vadd.f32 %v5793_v6, %v5792_v12 }
 0x16f   : > { %v8561_v62 = vadd.f32 %v5929_v40, %v5928_v9  ;;  %5298 = vmatmul.mubr.msk.bf16.gmra.mrb[112].mxu0 %vm7823_vm6, %v10649_v0 }
 0x170   : > { %6712 = vmatmul.mubr.msk.bf16.gmra.mrb[80].mxu1 %vm7809_vm4, %v8152_v28  ;;  %1995 = vmatprep.mubr.bf16.mxu0 %v10650_v7 }
 0x171   : > { %6715 = vmatprep.mubr.msk.bf16.mxu1 %vm7809_vm4, %v8154_v52 }
 0x172   : > { %v5795_v1 = vpop.f32.mrb[8].mxu0 }
 0x173   : > { %v5931_v60 = vpop.f32.mrb[8].mxu1  ;;  %v5796_v29 = vpop.f32.mrb[9].mxu0 }
 0x174   : > { %v5932_v39 = vpop.f32.mrb[9].mxu1  ;;  %v5798_v28 = vpop.f32.mrb[10].mxu0  ;;  %v8577_v21 = vadd.f32 %v5796_v29, %v5795_v1 }
 0x175   : > { %v8575_v41 = vadd.f32 %v5932_v39, %v5931_v60  ;;  %v5934_v34 = vpop.f32.mrb[10].mxu1  ;;  %v5799_v44 = vpop.f32.mrb[11].mxu0 }
 0x176   : > { %v5935_v58 = vpop.f32.mrb[11].mxu1  ;;  %v8584_v52 = vadd.f32 %v5799_v44, %v5798_v28 }
 0x177   : > { %v8579_v50 = vadd.f32 %v5935_v58, %v5934_v34  ;;  %5302 = vmatmul.mubr.msk.bf16.gmra.mrb[116].mxu0 %vm7823_vm6, %v10651_v53 }
 0x178   : > { %6716 = vmatmul.mubr.msk.bf16.gmra.mrb[84].mxu1 %vm7809_vm4, %v8189_v30  ;;  %2003 = vmatprep.mubr.bf16.mxu0 %v10652_v57 }
 0x179   : > { %6719 = vmatprep.mubr.msk.bf16.mxu1 %vm7809_vm4, %v8195_v13 }
 0x17a   : > { %v5801_v4 = vpop.f32.mrb[12].mxu0 }
 0x17b   : > { %v5937_v63 = vpop.f32.mrb[12].mxu1  ;;  %v5802_v54 = vpop.f32.mrb[13].mxu0 }
 0x17c   : > { %v5938_v17 = vpop.f32.mrb[13].mxu1  ;;  %v5804_v30 = vpop.f32.mrb[14].mxu0  ;;  %v8595_v23 = vadd.f32 %v5802_v54, %v5801_v4 }
 0x17d   : > { %v8593_v10 = vadd.f32 %v5938_v17, %v5937_v63  ;;  %v5940_v22 = vpop.f32.mrb[14].mxu1  ;;  %v5805_v18 = vpop.f32.mrb[15].mxu0 }
 0x17e   : > { %v5941_v49 = vpop.f32.mrb[15].mxu1  ;;  %v8602_v13 = vadd.f32 %v5805_v18, %v5804_v30 }
 0x17f   : > { %v8597_v27 = vadd.f32 %v5941_v49, %v5940_v22  ;;  %5306 = vmatmul.mubr.msk.bf16.gmra.mrb[120].mxu0 %vm7823_vm6, %v8240_v5 }
 0x180   : > { %6720 = vmatmul.mubr.msk.bf16.gmra.mrb[88].mxu1 %vm7809_vm4, %v8232_v45  ;;  %2011 = vmatprep.mubr.bf16.mxu0 %v8244_v35 }
 0x181   : > { %6723 = vmatprep.mubr.msk.bf16.mxu1 %vm7809_vm4, %v8238_v43 }
 0x182   : > { %v5807_v9 = vpop.f32.mrb[16].mxu0 }
 0x183   : > { %v5943_v36 = vpop.f32.mrb[16].mxu1  ;;  %v5808_v40 = vpop.f32.mrb[17].mxu0 }
 0x184   : > { %v5944_v12 = vpop.f32.mrb[17].mxu1  ;;  %v5810_v45 = vpop.f32.mrb[18].mxu0  ;;  %v8613_v60 = vadd.f32 %v5808_v40, %v5807_v9 }
 0x185   : > { %v8611_v6 = vadd.f32 %v5944_v12, %v5943_v36  ;;  %v5946_v0 = vpop.f32.mrb[18].mxu1  ;;  %v5811_v1 = vpop.f32.mrb[19].mxu0 }
 0x186   : > { %v5947_v7 = vpop.f32.mrb[19].mxu1  ;;  %v8618_v5 = vadd.f32 %v5811_v1, %v5810_v45 }
 0x187   : > { %v8615_v39 = vadd.f32 %v5947_v7, %v5946_v0  ;;  %5310 = vmatmul.mubr.msk.bf16.gmra.mrb[124].mxu0 %vm7823_vm6, %v8272_v20 }
 0x188   : > { %6724 = vmatmul.mubr.bf16.gmra.mrb[92].mxu1 %v10647_v3  ;;  %2019 = vmatprep.mubr.bf16.mxu0 %v8276_v24 }
 0x18a   : > { %v5813_v35 = vpop.f32.mrb[20].mxu0 }
 0x18b   : > { %v5949_v43 = vpop.f32.mrb[20].mxu1  ;;  %v5814_v34 = vpop.f32.mrb[21].mxu0 }
 0x18c   : > { %v5950_v29 = vpop.f32.mrb[21].mxu1  ;;  %v5816_v44 = vpop.f32.mrb[22].mxu0  ;;  %v8626_v57 = vadd.f32 %v5814_v34, %v5813_v35 }
 0x18d   : > { %v8624_v28 = vadd.f32 %v5950_v29, %v5949_v43  ;;  %v5952_v58 = vpop.f32.mrb[22].mxu1  ;;  %v5817_v63 = vpop.f32.mrb[23].mxu0 }
 0x18e   : > { %v5953_v53 = vpop.f32.mrb[23].mxu1  ;;  %v8630_v17 = vadd.f32 %v5817_v63, %v5816_v44 }
 0x18f   : > { %v8628_v4 = vadd.f32 %v5953_v53, %v5952_v58  ;;  %5314 = vmatmul.mubr.msk.bf16.gmra.mrb[128].mxu0 %vm7823_vm6, %v8290_v8 }
 0x190   : > { %2027 = vmatprep.mubr.bf16.mxu0 %v8294_v26 }
 0x192   : > { %v5819_v20 = vpop.f32.mrb[24].mxu0 }
 0x193   : > { %v5955_v24 = vpop.f32.mrb[24].mxu1  ;;  %v5820_v22 = vpop.f32.mrb[25].mxu0 }
 0x194   : > { %v5956_v54 = vpop.f32.mrb[25].mxu1  ;;  %v5822_v18 = vpop.f32.mrb[26].mxu0  ;;  %v8638_v9 = vadd.f32 %v5820_v22, %v5819_v20 }
 0x195   : > { %v8636_v30 = vadd.f32 %v5956_v54, %v5955_v24  ;;  %v5958_v49 = vpop.f32.mrb[26].mxu1  ;;  %v5823_v12 = vpop.f32.mrb[27].mxu0 }
 0x196   : > { %v5959_v36 = vpop.f32.mrb[27].mxu1  ;;  %v8642_v0 = vadd.f32 %v5823_v12, %v5822_v18 }
 0x197   : > { %v8640_v40 = vadd.f32 %v5959_v36, %v5958_v49  ;;  %5318 = vmatmul.mubr.msk.bf16.gmra.mrb[132].mxu0 %vm7823_vm6, %v8308_v31 }
 0x198   : > { %2035 = vmatprep.mubr.bf16.mxu0 %v8312_v32 }
 0x19a   : > { %v5825_v26 = vpop.f32.mrb[28].mxu0 }
 0x19b   : > { %v5961_v8 = vpop.f32.mrb[28].mxu1  ;;  %v5826_v7 = vpop.f32.mrb[29].mxu0 }
 0x19c   : > { %v5962_v45 = vpop.f32.mrb[29].mxu1  ;;  %v5828_v35 = vpop.f32.mrb[30].mxu0  ;;  %v8650_v34 = vadd.f32 %v5826_v7, %v5825_v26 }
 0x19d   : > { %v8648_v1 = vadd.f32 %v5962_v45, %v5961_v8  ;;  %v5964_v43 = vpop.f32.mrb[30].mxu1  ;;  %v5829_v58 = vpop.f32.mrb[31].mxu0 }
 0x19e   : > { %v5965_v29 = vpop.f32.mrb[31].mxu1  ;;  %v8654_v53 = vadd.f32 %v5829_v58, %v5828_v35 }
 0x19f   : > { %v8652_v44 = vadd.f32 %v5965_v29, %v5964_v43  ;;  %5322 = vmatmul.mubr.msk.bf16.gmra.mrb[136].mxu0 %vm7823_vm6, %v8326_v16 }
 0x1a0   : > { %2043 = vmatprep.mubr.bf16.mxu0 %v8330_v56 }
 0x1a2   : > { %v5831_v32 = vpop.f32.mrb[32].mxu0 }
 0x1a3   : > { %v5967_v31 = vpop.f32.mrb[32].mxu1  ;;  %v5832_v24 = vpop.f32.mrb[33].mxu0 }
 0x1a4   : > { %v5968_v63 = vpop.f32.mrb[33].mxu1  ;;  %v8662_v22 = vadd.f32 %v5832_v24, %v5831_v32  ;;  %v5834_v49 = vpop.f32.mrb[34].mxu0 }
 0x1a5   : > { %v8660_v20 = vadd.f32 %v5968_v63, %v5967_v31  ;;  %v5970_v54 = vpop.f32.mrb[34].mxu1  ;;  %v5835_v36 = vpop.f32.mrb[35].mxu0 }
 0x1a6   : > { %v5971_v18 = vpop.f32.mrb[35].mxu1  ;;  %v8666_v8 = vadd.f32 %v5835_v36, %v5834_v49 }
 0x1a7   : > { %v8664_v12 = vadd.f32 %v5971_v18, %v5970_v54  ;;  %5326 = vmatmul.mubr.msk.bf16.gmra.mrb[140].mxu0 %vm7823_vm6, %v8344_v59 }
 0x1a8   : > { %2051 = vmatprep.mubr.bf16.mxu0 %v8348_v19 }
 0x1aa   : > { %v5837_v56 = vpop.f32.mrb[36].mxu0 }
 0x1ab   : > { %v5973_v16 = vpop.f32.mrb[36].mxu1  ;;  %v5838_v45 = vpop.f32.mrb[37].mxu0 }
 0x1ac   : > { %v5974_v26 = vpop.f32.mrb[37].mxu1  ;;  %v8674_v35 = vadd.f32 %v5838_v45, %v5837_v56  ;;  %v5840_v29 = vpop.f32.mrb[38].mxu0 }
 0x1ad   : > { %v8672_v7 = vadd.f32 %v5974_v26, %v5973_v16  ;;  %v5976_v43 = vpop.f32.mrb[38].mxu1  ;;  %v5841_v31 = vpop.f32.mrb[39].mxu0 }
 0x1ae   : > { %v5977_v58 = vpop.f32.mrb[39].mxu1  ;;  %v8678_v63 = vadd.f32 %v5841_v31, %v5840_v29 }
 0x1af   : > { %v8676_v32 = vadd.f32 %v5977_v58, %v5976_v43  ;;  %5330 = vmatmul.mubr.msk.bf16.gmra.mrb[144].mxu0 %vm7823_vm6, %v8362_v37 }
 0x1b0   : > { %2059 = vmatprep.mubr.bf16.mxu0 %v8368_v33 }
 0x1b2   : > { %v5843_v19 = vpop.f32.mrb[40].mxu0 }
 0x1b3   : > { %v5979_v59 = vpop.f32.mrb[40].mxu1  ;;  %v5844_v54 = vpop.f32.mrb[41].mxu0 }
 0x1b4   : > { %v5980_v24 = vpop.f32.mrb[41].mxu1  ;;  %v8686_v36 = vadd.f32 %v5844_v54, %v5843_v19  ;;  %v5846_v16 = vpop.f32.mrb[42].mxu0 }
 0x1b5   : > { %v8684_v49 = vadd.f32 %v5980_v24, %v5979_v59  ;;  %v5982_v18 = vpop.f32.mrb[42].mxu1  ;;  %v5847_v26 = vpop.f32.mrb[43].mxu0 }
 0x1b6   : > { %v5983_v56 = vpop.f32.mrb[43].mxu1  ;;  %v8690_v43 = vadd.f32 %v5847_v26, %v5846_v16 }
 0x1b7   : > { %v8688_v45 = vadd.f32 %v5983_v56, %v5982_v18  ;;  %5334 = vmatmul.mubr.msk.bf16.gmra.mrb[148].mxu0 %vm7823_vm6, %v8382_v48 }
 0x1b8   : > { %10654 = vst [vmem:[#allocation17_spill] sm:$0xff] %v8690_v43  ;;  %2067 = vmatprep.mubr.bf16.mxu0 %v8388_v11 }
 0x1b9   : > { %10653 = vst [vmem:[#allocation16_spill] sm:$0xff] %v8688_v45 }
 0x1ba   : > { %v5849_v33 = vpop.f32.mrb[44].mxu0 }
 0x1bb   : > { %v5985_v37 = vpop.f32.mrb[44].mxu1  ;;  %v5850_v58 = vpop.f32.mrb[45].mxu0 }
 0x1bc   : > { %v5986_v29 = vpop.f32.mrb[45].mxu1  ;;  %v8698_v19 = vadd.f32 %v5850_v58, %v5849_v33  ;;  %v5852_v24 = vpop.f32.mrb[46].mxu0 }
 0x1bd   : > { %v8696_v31 = vadd.f32 %v5986_v29, %v5985_v37  ;;  %v5988_v59 = vpop.f32.mrb[46].mxu1  ;;  %v5853_v18 = vpop.f32.mrb[47].mxu0 }
 0x1be   : > { %v5989_v54 = vpop.f32.mrb[47].mxu1  ;;  %v8702_v56 = vadd.f32 %v5853_v18, %v5852_v24 }
 0x1bf   : > { %v8700_v16 = vadd.f32 %v5989_v54, %v5988_v59  ;;  %5338 = vmatmul.mubr.msk.bf16.gmra.mrb[152].mxu0 %vm7823_vm6, %v8402_v25 }
 0x1c0   : > { %2075 = vmatprep.mubr.bf16.mxu0 %v10647_v3 }
 0x1c1   : > { %10655 = vst [vmem:[#allocation18_spill] sm:$0xff] %v8700_v16 }
 0x1c2   : > { %v5855_v11 = vpop.f32.mrb[48].mxu0 }
 0x1c3   : > { %v5991_v48 = vpop.f32.mrb[48].mxu1  ;;  %v5856_v37 = vpop.f32.mrb[49].mxu0 }
 0x1c4   : > { %v5992_v26 = vpop.f32.mrb[49].mxu1  ;;  %v8710_v58 = vadd.f32 %v5856_v37, %v5855_v11  ;;  %v5858_v38 = vpop.f32.mrb[50].mxu0 }
 0x1c5   : > { %v8708_v29 = vadd.f32 %v5992_v26, %v5991_v48  ;;  %v5994_v33 = vpop.f32.mrb[50].mxu1  ;;  %v5859_v54 = vpop.f32.mrb[51].mxu0 }
 0x1c6   : > { %10657 = vst [vmem:[#allocation20_spill] sm:$0xff] %v8710_v58  ;;  %v5995_v59 = vpop.f32.mrb[51].mxu1  ;;  %v8714_v18 = vadd.f32 %v5859_v54, %v5858_v38 }
 0x1c7   : > { %10656 = vst [vmem:[#allocation19_spill] sm:$0xff] %v8708_v29  ;;  %v8712_v24 = vadd.f32 %v5995_v59, %v5994_v33  ;;  %2076 = vmatmul.mubr.bf16.gmra.mrb[156].mxu0 %v10647_v3 }
 0x1c8   : > { %10659 = vst [vmem:[#allocation22_spill] sm:$0xff] %v8714_v18 }
 0x1c9   : > { %10658 = vst [vmem:[#allocation21_spill] sm:$0xff] %v8712_v24 }
 0x1ca   : > { %v5861_v46 = vpop.f32.mrb[52].mxu0 }
 0x1cb   : > { %v5997_v25 = vpop.f32.mrb[52].mxu1  ;;  %v5862_v45 = vpop.f32.mrb[53].mxu0 }
 0x1cc   : > { %v5998_v2 = vpop.f32.mrb[53].mxu1  ;;  %v8719_v26 = vadd.f32 %v5862_v45, %v5861_v46  ;;  %v5864_v11 = vpop.f32.mrb[54].mxu0 }
 0x1cd   : > { %v8717_v16 = vadd.f32 %v5998_v2, %v5997_v25  ;;  %v6000_v48 = vpop.f32.mrb[54].mxu1  ;;  %v5865_v29 = vpop.f32.mrb[55].mxu0 }
 0x1ce   : > { %10661 = vst [vmem:[#allocation24_spill] sm:$0xff] %v8719_v26  ;;  %v6001_v37 = vpop.f32.mrb[55].mxu1  ;;  %v8723_v33 = vadd.f32 %v5865_v29, %v5864_v11 }
 0x1cf   : > { %10660 = vst [vmem:[#allocation23_spill] sm:$0xff] %v8717_v16  ;;  %v8721_v58 = vadd.f32 %v6001_v37, %v6000_v48 }
 0x1d0   : > { %10663 = vst [vmem:[#allocation26_spill] sm:$0xff] %v8723_v33 }
 0x1d1   : > { %10662 = vst [vmem:[#allocation25_spill] sm:$0xff] %v8721_v58 }
 0x1d2   : > { %v5867_v59 = vpop.f32.mrb[56].mxu0 }
 0x1d3   : > { %v6003_v38 = vpop.f32.mrb[56].mxu1  ;;  %v5868_v3 = vpop.f32.mrb[57].mxu0 }
 0x1d4   : > { %v6004_v54 = vpop.f32.mrb[57].mxu1  ;;  %v8727_v43 = vadd.f32 %v5868_v3, %v5867_v59  ;;  %v5870_v2 = vpop.f32.mrb[58].mxu0 }
 0x1d5   : > { %v8725_v24 = vadd.f32 %v6004_v54, %v6003_v38  ;;  %v6006_v18 = vpop.f32.mrb[58].mxu1  ;;  %v5871_v46 = vpop.f32.mrb[59].mxu0 }
 0x1d6   : > { %v6007_v25 = vpop.f32.mrb[59].mxu1  ;;  %v8731_v16 = vadd.f32 %v5871_v46, %v5870_v2 }
 0x1d7   : > { %10664 = vst [vmem:[#allocation27_spill] sm:$0xff] %v8725_v24  ;;  %v8729_v45 = vadd.f32 %v6007_v25, %v6006_v18 }
 0x1d9   : > { %10665 = vst [vmem:[#allocation28_spill] sm:$0xff] %v8729_v45 }
 0x1da   : > { %v5873_v37 = vpop.f32.mrb[60].mxu0 }
 0x1db   : > { %v6009_v48 = vpop.f32.mrb[60].mxu1  ;;  %v5874_v11 = vpop.f32.mrb[61].mxu0 }
 0x1dc   : > { %v6010_v29 = vpop.f32.mrb[61].mxu1  ;;  %v8735_v26 = vadd.f32 %v5874_v11, %v5873_v37  ;;  %v5876_v38 = vpop.f32.mrb[62].mxu0 }
 0x1dd   : > { %v8733_v58 = vadd.f32 %v6010_v29, %v6009_v48  ;;  %v6012_v33 = vpop.f32.mrb[62].mxu1  ;;  %v5877_v3 = vpop.f32.mrb[63].mxu0 }
 0x1de   : > { %v6013_v54 = vpop.f32.mrb[63].mxu1  ;;  %v8739_v24 = vadd.f32 %v5877_v3, %v5876_v38 }
 0x1df   : > { %v8737_v59 = vadd.f32 %v6013_v54, %v6012_v33 }
 0x1e2   : > { %v6601_v18 = vpop.f32.mrb[64].mxu0 }
 0x1e3   : > { %v1097_v2 = vadd.f32 %v6601_v18, %v8559_v15  ;;  %v1088_v25 = vpop.f32.mrb[65].mxu0 }
 0x1e4   : > { %v1089_v46 = vadd.f32 %v8541_v55, %v1088_v25  ;;  %v6602_v45 = vpop.f32.mrb[66].mxu0 }
 0x1e5   : > { %v8744_v48 = vadd.f32 %v8557_v51, %v1097_v2  ;;  %v1100_v37 = vadd.f32 %v6602_v45, %v8566_v42  ;;  %v1091_v29 = vpop.f32.mrb[67].mxu0 }
 0x1e6   : > { %v8748_v11 = vadd.f32 %v8539_v14, %v1089_v46  ;;  %v1092_v33 = vadd.f32 %v8548_v47, %v1091_v29 }
 0x1e7   : > { %v8752_v38 = vadd.f32 %v8561_v62, %v1100_v37 }
 0x1e8   : > { %v8755_v15 = vadd.f32 %v8543_v61, %v1092_v33 }
 0x1ea   : > { %v6605_v54 = vpop.f32.mrb[68].mxu0 }
 0x1eb   : > { %v1113_v55 = vadd.f32 %v6605_v54, %v8595_v23  ;;  %v1104_v3 = vpop.f32.mrb[69].mxu0 }
 0x1ec   : > { %v1105_v51 = vadd.f32 %v8577_v21, %v1104_v3  ;;  %v6606_v18 = vpop.f32.mrb[70].mxu0 }
 0x1ed   : > { %v8760_v42 = vadd.f32 %v8593_v10, %v1113_v55  ;;  %v1116_v14 = vadd.f32 %v6606_v18, %v8602_v13  ;;  %v1107_v45 = vpop.f32.mrb[71].mxu0 }
 0x1ee   : > { %v8764_v47 = vadd.f32 %v8575_v41, %v1105_v51  ;;  %v1108_v62 = vadd.f32 %v8584_v52, %v1107_v45 }
 0x1ef   : > { %v8768_v61 = vadd.f32 %v8597_v27, %v1116_v14 }
 0x1f0   : > { %v8771_v23 = vadd.f32 %v8579_v50, %v1108_v62 }
 0x1f2   : > { %v6609_v2 = vpop.f32.mrb[72].mxu0 }
 0x1f3   : > { %v1129_v21 = vadd.f32 %v6609_v2, %v8626_v57  ;;  %v1120_v25 = vpop.f32.mrb[73].mxu0 }
 0x1f4   : > { %v1121_v10 = vadd.f32 %v8613_v60, %v1120_v25  ;;  %v6610_v46 = vpop.f32.mrb[74].mxu0 }
 0x1f5   : > { %v8776_v13 = vadd.f32 %v8624_v28, %v1129_v21  ;;  %v1132_v41 = vadd.f32 %v6610_v46, %v8630_v17  ;;  %v1123_v37 = vpop.f32.mrb[75].mxu0  ;;  %v10668_v46 = vld [vmem:[#allocation16_spill] sm:$0xff] }
 0x1f6   : > { %v8780_v52 = vadd.f32 %v8611_v6, %v1121_v10  ;;  %v1124_v27 = vadd.f32 %v8618_v5, %v1123_v37 }
 0x1f7   : > { %v8784_v50 = vadd.f32 %v8628_v4, %v1132_v41 }
 0x1f8   : > { %v8787_v57 = vadd.f32 %v8615_v39, %v1124_v27 }
 0x1fa   : > { %v6613_v29 = vpop.f32.mrb[76].mxu0 }
 0x1fb   : > { %v1145_v60 = vadd.f32 %v6613_v29, %v8650_v34  ;;  %v1136_v33 = vpop.f32.mrb[77].mxu0 }
 0x1fc   : > { %v1137_v28 = vadd.f32 %v8638_v9, %v1136_v33  ;;  %v6614_v54 = vpop.f32.mrb[78].mxu0 }
 0x1fd   : > { %v8792_v17 = vadd.f32 %v8648_v1, %v1145_v60  ;;  %v1148_v6 = vadd.f32 %v6614_v54, %v8654_v53  ;;  %v1139_v55 = vpop.f32.mrb[79].mxu0 }
 0x1fe   : > { %v8796_v5 = vadd.f32 %v8636_v30, %v1137_v28  ;;  %v1140_v4 = vadd.f32 %v8642_v0, %v1139_v55 }
 0x1ff   : > { %v8800_v39 = vadd.f32 %v8652_v44, %v1148_v6  ;;  %v10673_v6 = vld [vmem:[#allocation19_spill] sm:$0xff] }
 0x200   : > { %v8803_v34 = vadd.f32 %v8640_v40, %v1140_v4  ;;  %v10674_v4 = vld [vmem:[#allocation22_spill] sm:$0xff] }
 0x202   : > { %v6617_v3 = vpop.f32.mrb[80].mxu0 }
 0x203   : > { %v1161_v9 = vadd.f32 %v6617_v3, %v8674_v35  ;;  %v1152_v51 = vpop.f32.mrb[81].mxu0 }
 0x204   : > { %v1153_v1 = vadd.f32 %v8662_v22, %v1152_v51  ;;  %v6618_v18 = vpop.f32.mrb[82].mxu0 }
 0x205   : > { %v8808_v53 = vadd.f32 %v8672_v7, %v1161_v9  ;;  %v1164_v30 = vadd.f32 %v6618_v18, %v8678_v63  ;;  %v1155_v14 = vpop.f32.mrb[83].mxu0  ;;  %v10675_v9 = vld [vmem:[#allocation25_spill] sm:$0xff] }
 0x206   : > { %v8812_v0 = vadd.f32 %v8660_v20, %v1153_v1  ;;  %v1156_v44 = vadd.f32 %v8666_v8, %v1155_v14  ;;  %v10676_v1 = vld [vmem:[#allocation21_spill] sm:$0xff] }
 0x207   : > { %v8816_v40 = vadd.f32 %v8676_v32, %v1164_v30  ;;  %v10666_v32 = vld [vmem:[#allocation17_spill] sm:$0xff] }
 0x208   : > { %v8819_v35 = vadd.f32 %v8664_v12, %v1156_v44  ;;  %v10667_v12 = vld [vmem:[#allocation18_spill] sm:$0xff] }
 0x20a   : > { %v6621_v45 = vpop.f32.mrb[84].mxu0 }
 0x20b   : > { %v1177_v22 = vadd.f32 %v6621_v45, %v8698_v19  ;;  %v1168_v62 = vpop.f32.mrb[85].mxu0 }
 0x20c   : > { %v1169_v7 = vadd.f32 %v8686_v36, %v1168_v62  ;;  %v6622_v2 = vpop.f32.mrb[86].mxu0  ;;  %v10669_v36 = vld [vmem:[#allocation24_spill] sm:$0xff] }
 0x20d   : > { %v8824_v63 = vadd.f32 %v8696_v31, %v1177_v22  ;;  %v1180_v20 = vadd.f32 %v6622_v2, %v8702_v56  ;;  %v1171_v21 = vpop.f32.mrb[87].mxu0  ;;  %v10670_v31 = vld [vmem:[#allocation20_spill] sm:$0xff]  ;;  %v10671_v56 = vld [vmem:[#allocation23_spill] sm:$0xff] }
 0x20e   : > { %v8828_v8 = vadd.f32 %v8684_v49, %v1169_v7  ;;  %v1172_v25 = vadd.f32 %v10666_v32, %v1171_v21  ;;  %v10672_v49 = vld [vmem:[#allocation26_spill] sm:$0xff] }
 0x20f   : > { %v8832_v10 = vadd.f32 %v10667_v12, %v1180_v20  ;;  %v10677_v20 = vld [vmem:[#allocation27_spill] sm:$0xff]  ;;  %v10678_v12 = vld [vmem:[#allocation28_spill] sm:$0xff] }
 0x210   : > { %v8835_v19 = vadd.f32 %v10668_v46, %v1172_v25 }
 0x212   : > { %v6625_v41 = vpop.f32.mrb[88].mxu0 }
 0x213   : > { %v1193_v37 = vadd.f32 %v6625_v41, %v10669_v36  ;;  %v1184_v27 = vpop.f32.mrb[89].mxu0 }
 0x214   : > { %v1185_v29 = vadd.f32 %v10670_v31, %v1184_v27  ;;  %v6626_v60 = vpop.f32.mrb[90].mxu0 }
 0x215   : > { %v8840_v33 = vadd.f32 %v10671_v56, %v1193_v37  ;;  %v1196_v28 = vadd.f32 %v6626_v60, %v10672_v49  ;;  %v1187_v54 = vpop.f32.mrb[91].mxu0 }
 0x216   : > { %v8844_v55 = vadd.f32 %v10673_v6, %v1185_v29  ;;  %v1188_v3 = vadd.f32 %v10674_v4, %v1187_v54 }
 0x217   : > { %v8848_v51 = vadd.f32 %v10675_v9, %v1196_v28 }
 0x218   : > { %v8851_v18 = vadd.f32 %v10676_v1, %v1188_v3 }
 0x21a   : > { %v6629_v30 = vpop.f32.mrb[92].mxu0 }
 0x21b   : > { %v1209_v14 = vadd.f32 %v6629_v30, %v8735_v26  ;;  %v1200_v44 = vpop.f32.mrb[93].mxu0 }
 0x21c   : > { %v1201_v45 = vadd.f32 %v8727_v43, %v1200_v44  ;;  %v6630_v22 = vpop.f32.mrb[94].mxu0 }
 0x21d   : > { %v8856_v62 = vadd.f32 %v8733_v58, %v1209_v14  ;;  %v1212_v7 = vadd.f32 %v6630_v22, %v8739_v24  ;;  %v1203_v2 = vpop.f32.mrb[95].mxu0 }
 0x21e   : > { %v8860_v21 = vadd.f32 %v10677_v20, %v1201_v45  ;;  %v1204_v32 = vadd.f32 %v8731_v16, %v1203_v2 }
 0x21f   : > { %v8864_v25 = vadd.f32 %v8737_v59, %v1212_v7 }
 0x220   : > { %v8867_v26 = vadd.f32 %v10678_v12, %v1204_v32 }
 0x222   : > { %v6055_v43 = vpop.f32.mrb[96].mxu0 }
 0x223   : > { %v6697_v46 = vpop.f32.mrb[64].mxu1  ;;  %v6056_v36 = vpop.f32.mrb[97].mxu0 }
 0x224   : > { %v2118_v41 = vpop.f32.mrb[65].mxu1  ;;  %v6057_v37 = vadd.f32 %v6056_v36, %v6055_v43  ;;  %v6058_v27 = vpop.f32.mrb[98].mxu0 }
 0x225   : > { %v6698_v58 = vpop.f32.mrb[66].mxu1  ;;  %v6059_v31 = vpop.f32.mrb[99].mxu0 }
 0x226   : > { %v2121_v24 = vpop.f32.mrb[67].mxu1  ;;  %v6877_v29 = vadd.f32 %v6057_v37, %v8748_v11  ;;  %v6060_v60 = vadd.f32 %v6059_v31, %v6058_v27 }
 0x228   : > { %v8870_v56 = vadd.f32 %v6877_v29, %v2118_v41  ;;  %v6885_v16 = vadd.f32 %v6060_v60, %v8755_v15 }
 0x22a   : > { %v8873_v49 = vadd.f32 %v6885_v16, %v2121_v24  ;;  %v6061_v28 = vpop.f32.mrb[100].mxu0 }
 0x22b   : > { %v6701_v59 = vpop.f32.mrb[68].mxu1  ;;  %v6062_v6 = vpop.f32.mrb[101].mxu0 }
 0x22c   : > { %v2134_v54 = vpop.f32.mrb[69].mxu1  ;;  %v6063_v3 = vadd.f32 %v6062_v6, %v6061_v28  ;;  %v6064_v9 = vpop.f32.mrb[102].mxu0 }
 0x22d   : > { %v6702_v4 = vpop.f32.mrb[70].mxu1  ;;  %v6065_v30 = vpop.f32.mrb[103].mxu0 }
 0x22e   : > { %v2137_v1 = vpop.f32.mrb[71].mxu1  ;;  %v6873_v14 = vadd.f32 %v6063_v3, %v8744_v48  ;;  %v6066_v44 = vadd.f32 %v6065_v30, %v6064_v9 }
 0x230   : > { %v8876_v11 = vadd.f32 %v6873_v14, %v6697_v46  ;;  %v6881_v45 = vadd.f32 %v6066_v44, %v8752_v38 }
 0x232   : > { %v8879_v15 = vadd.f32 %v6881_v45, %v6698_v58  ;;  %v6067_v7 = vpop.f32.mrb[104].mxu0 }
 0x233   : > { %v6705_v22 = vpop.f32.mrb[72].mxu1  ;;  %v6068_v20 = vpop.f32.mrb[105].mxu0 }
 0x234   : > { %v2150_v2 = vpop.f32.mrb[73].mxu1  ;;  %v6069_v12 = vadd.f32 %v6068_v20, %v6067_v7  ;;  %v6070_v43 = vpop.f32.mrb[106].mxu0 }
 0x235   : > { %v6706_v32 = vpop.f32.mrb[74].mxu1  ;;  %v6071_v36 = vpop.f32.mrb[107].mxu0 }
 0x236   : > { %v2153_v41 = vpop.f32.mrb[75].mxu1  ;;  %v6893_v37 = vadd.f32 %v6069_v12, %v8764_v47  ;;  %v6072_v27 = vadd.f32 %v6071_v36, %v6070_v43 }
 0x238   : > { %v8882_v48 = vadd.f32 %v6893_v37, %v2134_v54  ;;  %v6901_v46 = vadd.f32 %v6072_v27, %v8771_v23 }
 0x23a   : > { %v8887_v38 = vadd.f32 %v6901_v46, %v2137_v1  ;;  %v6073_v58 = vpop.f32.mrb[108].mxu0  ;;  %v2277_v1 = vadd.f32 %v8873_v49, %v8870_v56 }
 0x23b   : > { %v8885_v24 = vpop.f32.mrb[76].mxu1  ;;  %v6074_v29 = vpop.f32.mrb[109].mxu0 }
 0x23c   : > { %v2166_v31 = vpop.f32.mrb[77].mxu1  ;;  %v6075_v16 = vadd.f32 %v6074_v29, %v6073_v58  ;;  %v6076_v28 = vpop.f32.mrb[110].mxu0 }
 0x23d   : > { %v8889_v60 = vpop.f32.mrb[78].mxu1  ;;  %v6077_v3 = vpop.f32.mrb[111].mxu0 }
 0x23e   : > { %v2169_v6 = vpop.f32.mrb[79].mxu1  ;;  %v6889_v47 = vadd.f32 %v6075_v16, %v8760_v42  ;;  %v6078_v9 = vadd.f32 %v6077_v3, %v6076_v28  ;;  %v2278_v42 = vadd.f32 %v8876_v11, %v2277_v1 }
 0x240   : > { %v8892_v54 = vadd.f32 %v6889_v47, %v6701_v59  ;;  %v6897_v23 = vadd.f32 %v6078_v9, %v8768_v61  ;;  %v2279_v27 = vadd.f32 %v8879_v15, %v2278_v42 }
 0x242   : > { %v8899_v14 = vadd.f32 %v6897_v23, %v6702_v4  ;;  %v6079_v44 = vpop.f32.mrb[112].mxu0  ;;  %v2280_v29 = vadd.f32 %v8882_v48, %v2279_v27 }
 0x243   : > { %v8895_v30 = vpop.f32.mrb[80].mxu1  ;;  %v6080_v7 = vpop.f32.mrb[113].mxu0 }
 0x244   : > { %v8901_v45 = vpop.f32.mrb[81].mxu1  ;;  %v6081_v12 = vadd.f32 %v6080_v7, %v6079_v44  ;;  %v6082_v59 = vpop.f32.mrb[114].mxu0  ;;  %v2281_v44 = vadd.f32 %v8887_v38, %v2280_v29 }
 0x245   : > { %v8903_v20 = vpop.f32.mrb[82].mxu1  ;;  %v6083_v61 = vpop.f32.mrb[115].mxu0 }
 0x246   : > { %v8906_v43 = vpop.f32.mrb[83].mxu1  ;;  %v6909_v36 = vadd.f32 %v6081_v12, %v8780_v52  ;;  %v6084_v37 = vadd.f32 %v6083_v61, %v6082_v59  ;;  %v2282_v42 = vadd.f32 %v8892_v54, %v2281_v44 }
 0x248   : > { %v8910_v4 = vadd.f32 %v6909_v36, %v2150_v2  ;;  %v6917_v46 = vadd.f32 %v6084_v37, %v8787_v57  ;;  %v2283_v29 = vadd.f32 %v8899_v14, %v2282_v42 }
 0x24a   : > { %v8916_v16 = vadd.f32 %v6917_v46, %v2153_v41  ;;  %v6085_v28 = vpop.f32.mrb[116].mxu0 }
 0x24b   : > { %v8913_v58 = vpop.f32.mrb[84].mxu1  ;;  %v6086_v47 = vpop.f32.mrb[117].mxu0 }
 0x24c   : > { %10679 = vst [vmem:[#allocation17_spill] sm:$0xff] %v8916_v16  ;;  %v8918_v3 = vpop.f32.mrb[85].mxu1  ;;  %v6087_v52 = vadd.f32 %v6086_v47, %v6085_v28  ;;  %v6088_v23 = vpop.f32.mrb[118].mxu0 }
 0x24d   : > { %v8920_v9 = vpop.f32.mrb[86].mxu1  ;;  %v6089_v2 = vpop.f32.mrb[119].mxu0 }
 0x24e   : > { %v8922_v1 = vpop.f32.mrb[87].mxu1  ;;  %v6905_v57 = vadd.f32 %v6087_v52, %v8776_v13  ;;  %v6090_v7 = vadd.f32 %v6089_v2, %v6088_v23  ;;  %v2284_v52 = vadd.f32 %v8910_v4, %v2283_v29 }
 0x250   : > { %v8927_v41 = vadd.f32 %v6905_v57, %v6705_v22  ;;  %v6913_v12 = vadd.f32 %v6090_v7, %v8784_v50  ;;  %v2285_v57 = vadd.f32 %v8916_v16, %v2284_v52 }
 0x252   : > { %10680 = vst [vmem:[#allocation18_spill] sm:$0xff] %v8927_v41  ;;  %v8932_v61 = vadd.f32 %v6913_v12, %v6706_v32  ;;  %v6091_v36 = vpop.f32.mrb[120].mxu0  ;;  %v2286_v29 = vadd.f32 %v8927_v41, %v2285_v57 }
 0x253   : > { %v8930_v59 = vpop.f32.mrb[88].mxu1  ;;  %v6092_v27 = vpop.f32.mrb[121].mxu0 }
 0x254   : > { %v8934_v37 = vpop.f32.mrb[89].mxu1  ;;  %v6093_v13 = vadd.f32 %v6092_v27, %v6091_v36  ;;  %v6094_v28 = vpop.f32.mrb[122].mxu0  ;;  %v2287_v52 = vadd.f32 %v8932_v61, %v2286_v29 }
 0x255   : > { %v8936_v46 = vpop.f32.mrb[90].mxu1  ;;  %v6095_v22 = vpop.f32.mrb[123].mxu0 }
 0x256   : > { %v8939_v47 = vpop.f32.mrb[91].mxu1  ;;  %v6925_v50 = vadd.f32 %v6093_v13, %v8796_v5  ;;  %v6096_v23 = vadd.f32 %v6095_v22, %v6094_v28 }
 0x258   : > { %v8943_v32 = vadd.f32 %v6925_v50, %v2166_v31  ;;  %v6933_v2 = vadd.f32 %v6096_v23, %v8803_v34 }
 0x25a   : > { %v8949_v7 = vadd.f32 %v6933_v2, %v2169_v6  ;;  %v6097_v42 = vpop.f32.mrb[124].mxu0  ;;  %v2288_v23 = vadd.f32 %v8943_v32, %v2287_v52 }
 0x25b   : > { %v8946_v44 = vpop.f32.mrb[92].mxu1  ;;  %v6098_v36 = vpop.f32.mrb[125].mxu0 }
 0x25c   : > { %v8951_v12 = vpop.f32.mrb[93].mxu1  ;;  %v6099_v5 = vadd.f32 %v6098_v36, %v6097_v42  ;;  %v6100_v13 = vpop.f32.mrb[126].mxu0 }
 0x25d   : > { %v8953_v27 = vpop.f32.mrb[94].mxu1  ;;  %v6101_v28 = vpop.f32.mrb[127].mxu0 }
 0x25e   : > { %v8956_v31 = vpop.f32.mrb[95].mxu1  ;;  %v6921_v34 = vadd.f32 %v6099_v5, %v8792_v17  ;;  %v6102_v22 = vadd.f32 %v6101_v28, %v6100_v13  ;;  %v2289_v17 = vadd.f32 %v8949_v7, %v2288_v23 }
 0x260   : > { %v8961_v6 = vadd.f32 %v6921_v34, %v8885_v24  ;;  %v6929_v50 = vadd.f32 %v6102_v22, %v8800_v39 }
 0x262   : > { %v8966_v2 = vadd.f32 %v6929_v50, %v8889_v60  ;;  %v6103_v57 = vpop.f32.mrb[128].mxu0  ;;  %v2290_v24 = vadd.f32 %v8961_v6, %v2289_v17 }
 0x263   : > { %v6104_v42 = vpop.f32.mrb[129].mxu0 }
 0x264   : > { %v6105_v36 = vadd.f32 %v6104_v42, %v6103_v57  ;;  %v6106_v41 = vpop.f32.mrb[130].mxu0  ;;  %v2291_v22 = vadd.f32 %v8966_v2, %v2290_v24 }
 0x265   : > { %v6107_v16 = vpop.f32.mrb[131].mxu0 }
 0x266   : > { %v6941_v5 = vadd.f32 %v6105_v36, %v8812_v0  ;;  %v6108_v29 = vadd.f32 %v6107_v16, %v6106_v41 }
 0x268   : > { %v8972_v13 = vadd.f32 %v6941_v5, %v8901_v45  ;;  %v6949_v39 = vadd.f32 %v6108_v29, %v8819_v35 }
 0x26a   : > { %v8976_v60 = vadd.f32 %v6949_v39, %v8906_v43  ;;  %v6109_v28 = vpop.f32.mrb[132].mxu0  ;;  %v2292_v0 = vadd.f32 %v8972_v13, %v2291_v22 }
 0x26b   : > { %v6110_v34 = vpop.f32.mrb[133].mxu0 }
 0x26c   : > { %v6111_v52 = vadd.f32 %v6110_v34, %v6109_v28  ;;  %v6112_v50 = vpop.f32.mrb[134].mxu0  ;;  %v2293_v43 = vadd.f32 %v8976_v60, %v2292_v0 }
 0x26d   : > { %v6113_v23 = vpop.f32.mrb[135].mxu0 }
 0x26e   : > { %v6937_v16 = vadd.f32 %v6111_v52, %v8808_v53  ;;  %v6114_v41 = vadd.f32 %v6113_v23, %v6112_v50 }
 0x270   : > { %v8982_v45 = vadd.f32 %v6937_v16, %v8895_v30  ;;  %v6945_v35 = vadd.f32 %v6114_v41, %v8816_v40 }
 0x272   : > { %v8987_v57 = vadd.f32 %v6945_v35, %v8903_v20  ;;  %v6115_v42 = vpop.f32.mrb[136].mxu0  ;;  %v2294_v17 = vadd.f32 %v8982_v45, %v2293_v43 }
 0x273   : > { %v6116_v36 = vpop.f32.mrb[137].mxu0 }
 0x274   : > { %v6117_v5 = vadd.f32 %v6116_v36, %v6115_v42  ;;  %v6118_v29 = vpop.f32.mrb[138].mxu0  ;;  %v2295_v30 = vadd.f32 %v8987_v57, %v2294_v17 }
 0x275   : > { %v6119_v24 = vpop.f32.mrb[139].mxu0 }
 0x276   : > { %v6957_v53 = vadd.f32 %v6117_v5, %v8828_v8  ;;  %v6120_v39 = vadd.f32 %v6119_v24, %v6118_v29 }
 0x278   : > { %v8993_v28 = vadd.f32 %v6957_v53, %v8918_v3  ;;  %v6965_v40 = vadd.f32 %v6120_v39, %v8835_v19 }
 0x27a   : > { %v2296_v20 = vadd.f32 %v8993_v28, %v2295_v30  ;;  %v8998_v34 = vadd.f32 %v6965_v40, %v8922_v1  ;;  %v6121_v22 = vpop.f32.mrb[140].mxu0 }
 0x27b   : > { %v6122_v52 = vpop.f32.mrb[141].mxu0 }
 0x27c   : > { %v2297_v50 = vadd.f32 %v8998_v34, %v2296_v20  ;;  %v6123_v23 = vadd.f32 %v6122_v52, %v6121_v22  ;;  %v6124_v0 = vpop.f32.mrb[142].mxu0 }
 0x27d   : > { %v6125_v8 = vpop.f32.mrb[143].mxu0 }
 0x27e   : > { %v6953_v16 = vadd.f32 %v6123_v23, %v8824_v63  ;;  %v6126_v41 = vadd.f32 %v6125_v8, %v6124_v0  ;;  %v7340_v23 = vld [vmem:[#allocation8 + $0x100] sm:$0xff]  }
 0x27f   : > { %6175 = vmatprep.subr.bf16.mxu0 %v7340_v23 }
 0x280   : > { %v9003_v3 = vadd.f32 %v6953_v16, %v8913_v58  ;;  %v6961_v19 = vadd.f32 %v6126_v41, %v8832_v10  ;;  %v7341_v16 = vld [vmem:[#allocation8 + $0xc0] sm:$0xff]  }
 0x281   : > { %v7342_v41 = vld [vmem:[#allocation8 + $0x140] sm:$0xff]   ;;  %6176 = vmatpush3.bf16.msra.mxu0 %v7341_v16 }
 0x282   : > { %v2298_v35 = vadd.f32 %v9003_v3, %v2297_v50  ;;  %v9008_v1 = vadd.f32 %v6961_v19, %v8920_v9  ;;  %v6127_v43 = vpop.f32.mrb[144].mxu0  ;;  %6727 = vmatprep.subr.bf16.mxu1 %v7342_v41 }
 0x283   : > { %v6128_v42 = vpop.f32.mrb[145].mxu0  ;;  %6728 = vmatpush3.bf16.msra.mxu1 %v7342_v41  ;;  %v7350_v41 = vld [vmem:[#allocation8 + $0x160] sm:$0xff]  }
 0x284   : > { %v2299_v36 = vadd.f32 %v9008_v1, %v2298_v35  ;;  %v6129_v17 = vadd.f32 %v6128_v42, %v6127_v43  ;;  %v6130_v5 = vpop.f32.mrb[146].mxu0 }
 0x285   : > { %v6131_v29 = vpop.f32.mrb[147].mxu0 }
 0x286   : > { %v6973_v63 = vadd.f32 %v6129_v17, %v8844_v55  ;;  %v6132_v24 = vadd.f32 %v6131_v29, %v6130_v5  ;;  %v7343_v17 = vld [vmem:[#allocation8 + $0x148] sm:$0xff]  }
 0x287   : > { %6729 = vmatprep.subr.bf16.mxu1 %v7343_v17 }
 0x288   : > { %v9013_v58 = vadd.f32 %v6973_v63, %v8934_v37  ;;  %v6981_v10 = vadd.f32 %v6132_v24, %v8851_v18  ;;  %6730 = vmatpush3.bf16.msra.mxu1 %v7343_v17  ;;  %v7348_v63 = vld [vmem:[#allocation8 + $0x110] sm:$0xff]   ;;  %v7362_v17 = vld [vmem:[#allocation8 + $0x138] sm:$0xff]  }
 0x28a   : > { %v2300_v53 = vadd.f32 %v9013_v58, %v2299_v36  ;;  %v9018_v9 = vadd.f32 %v6981_v10, %v8939_v47  ;;  %v6133_v39 = vpop.f32.mrb[148].mxu0 }
 0x28b   : > { %v6134_v30 = vpop.f32.mrb[149].mxu0 }
 0x28c   : > { %v2301_v40 = vadd.f32 %v9018_v9, %v2300_v53  ;;  %v6135_v20 = vadd.f32 %v6134_v30, %v6133_v39  ;;  %v6136_v22 = vpop.f32.mrb[150].mxu0  ;;  %v7349_v39 = vld [vmem:[#allocation8 + $0xd0] sm:$0xff]  }
 0x28d   : > { %v6137_v52 = vpop.f32.mrb[151].mxu0 }
 0x28e   : > { %v6969_v55 = vadd.f32 %v6135_v20, %v8840_v33  ;;  %v6138_v50 = vadd.f32 %v6137_v52, %v6136_v22  ;;  %v7352_v22 = vld [vmem:[#allocation8 + $0x118] sm:$0xff]  }
 0x290   : > { %v9023_v37 = vadd.f32 %v6969_v55, %v8930_v59  ;;  %v6977_v18 = vadd.f32 %v6138_v50, %v8848_v51  ;;  %v7344_v51 = vld [vmem:[#allocation8 + $0x108] sm:$0xff]   ;;  %v7347_v50 = vld [vmem:[#allocation8 + $0x158] sm:$0xff]  }
 0x291   : > { %6177 = vmatprep.subr.bf16.mxu0 %v7344_v51 }
 0x292   : > { %v2302_v0 = vadd.f32 %v9023_v37, %v2301_v40  ;;  %v9028_v47 = vadd.f32 %v6977_v18, %v8936_v46  ;;  %v6139_v8 = vpop.f32.mrb[152].mxu0  ;;  %v7345_v46 = vld [vmem:[#allocation8 + $0xc8] sm:$0xff]  }
 0x293   : > { %v6140_v19 = vpop.f32.mrb[153].mxu0  ;;  %6178 = vmatpush3.bf16.msra.mxu0 %v7345_v46 }
 0x294   : > { %v2303_v35 = vadd.f32 %v9028_v47, %v2302_v0  ;;  %v6141_v33 = vadd.f32 %v6140_v19, %v6139_v8  ;;  %v6142_v43 = vpop.f32.mrb[154].mxu0  ;;  %6179 = vmatprep.subr.bf16.mxu0 %v7348_v63  ;;  %v7354_v0 = vld [vmem:[#allocation8 + $0x120] sm:$0xff]   ;;  %v7363_v63 = vld [vmem:[#allocation8 + $0xf8] sm:$0xff]  }
 0x295   : > { %v6143_v59 = vpop.f32.mrb[155].mxu0  ;;  %v7355_v19 = vld [vmem:[#allocation8 + $0xe0] sm:$0xff]  }
 0x296   : > { %v6989_v42 = vadd.f32 %v6141_v33, %v8860_v21  ;;  %v6144_v36 = vadd.f32 %v6143_v59, %v6142_v43  ;;  %v7346_v21 = vld [vmem:[#allocation8 + $0x150] sm:$0xff]   ;;  %v7351_v43 = vld [vmem:[#allocation8 + $0x168] sm:$0xff]  }
 0x297   : > { %6731 = vmatprep.subr.bf16.mxu1 %v7346_v21  ;;  %6180 = vmatpush3.bf16.msra.mxu0 %v7349_v39  ;;  %v7359_v59 = vld [vmem:[#allocation8 + $0x130] sm:$0xff]  }
 0x298   : > { %v9033_v5 = vadd.f32 %v6989_v42, %v8951_v12  ;;  %v6997_v29 = vadd.f32 %v6144_v36, %v8867_v26  ;;  %6732 = vmatpush3.bf16.msra.mxu1 %v7346_v21  ;;  %6181 = vmatprep.subr.bf16.mxu0 %v7352_v22  ;;  %v7356_v42 = vld [vmem:[#allocation8 + $0x170] sm:$0xff]   ;;  %v9047_v21 = vld [vmem:[#allocation8 + $0x80] sm:$0xff]  }
 0x299   : > { %6733 = vmatprep.subr.bf16.mxu1 %v7347_v50 }
 0x29a   : > { %v2304_v24 = vadd.f32 %v9033_v5, %v2303_v35  ;;  %v9038_v10 = vadd.f32 %v6997_v29, %v8956_v31  ;;  %v6145_v53 = vpop.f32.mrb[156].mxu0  ;;  %v7353_v31 = vld [vmem:[#allocation8 + $0xd8] sm:$0xff]  }
 0x29b   : > { %v6146_v30 = vpop.f32.mrb[157].mxu0  ;;  %6182 = vmatpush3.bf16.msra.mxu0 %v7353_v31  ;;  %v7361_v29 = vld [vmem:[#allocation8 + $0x178] sm:$0xff]  }
 0x29c   : > { %v2305_v40 = vadd.f32 %v9038_v10, %v2304_v24  ;;  %v6147_v12 = vadd.f32 %v6146_v30, %v6145_v53  ;;  %v6148_v20 = vpop.f32.mrb[158].mxu0  ;;  %6734 = vmatpush3.bf16.msra.mxu1 %v7347_v50  ;;  %6183 = vmatprep.subr.bf16.mxu0 %v7354_v0 }
 0x29d   : > { %v6149_v26 = vpop.f32.mrb[159].mxu0  ;;  %6735 = vmatprep.subr.bf16.mxu1 %v7350_v41 }
 0x29e   : > { %v6985_v52 = vadd.f32 %v6147_v12, %v8856_v62  ;;  %v6150_v55 = vadd.f32 %v6149_v26, %v6148_v20  ;;  %v7357_v62 = vld [vmem:[#allocation8 + $0x128] sm:$0xff]  }
 0x29f   : > { %6184 = vmatpush3.bf16.msra.mxu0 %v7355_v19 }
 0x2a0   : > { %v6986_v18 = vadd.f32 %v6985_v52, %v8946_v44  ;;  %v6993_v23 = vadd.f32 %v6150_v55, %v8864_v25  ;;  %6736 = vmatpush3.bf16.msra.mxu1 %v7350_v41  ;;  %v7358_v44 = vld [vmem:[#allocation8 + $0xe8] sm:$0xff]   ;;  %6185 = vmatprep.subr.bf16.mxu0 %v7357_v62  ;;  %v10681_v41 = vld [vmem:[#allocation17_spill] sm:$0xff] }
 0x2a1   : > { %6737 = vmatprep.subr.bf16.mxu1 %v7351_v43  ;;  %v10682_v62 = vld [vmem:[#allocation18_spill] sm:$0xff] }
 0x2a2   : > { %v2306_v8 = vadd.f32 %v6986_v18, %v2305_v40  ;;  %v6994_v16 = vadd.f32 %v6993_v23, %v8953_v27  ;;  %v7360_v27 = vld [vmem:[#allocation8 + $0xf0] sm:$0xff]  }
 0x2a3   : > { %6186 = vmatpush3.bf16.msra.mxu0 %v7358_v44 }
 0x2a4   : > { %v2307_v35 = vadd.f32 %v6994_v16, %v2306_v8  ;;  %6738 = vmatpush3.bf16.msra.mxu1 %v7351_v43  ;;  %6187 = vmatprep.subr.bf16.mxu0 %v7359_v59 }
 0x2a5   : > { %6739 = vmatprep.subr.bf16.mxu1 %v7356_v42 }
 0x2a6   : > { %v2308_v33 = vrot.slane %v2307_v35, 4 }
 0x2a7   : > { %6188 = vmatpush3.bf16.msra.mxu0 %v7360_v27 }
 0x2a8   : > { %v2309_v25 = vadd.f32 %v2308_v33, %v2307_v35  ;;  %6740 = vmatpush3.bf16.msra.mxu1 %v7356_v42  ;;  %6189 = vmatprep.subr.bf16.mxu0 %v7362_v17 }
 0x2a9   : > { %6741 = vmatprep.subr.bf16.mxu1 %v7361_v29 }
 0x2aa   : > { %v2310_v51 = vrot.slane %v2309_v25, 2 }
 0x2ab   : > { %6190 = vmatpush3.bf16.msra.mxu0 %v7363_v63 }
 0x2ac   : > { %v2311_v36 = vadd.f32 %v2310_v51, %v2309_v25  ;;  %6742 = vmatpush3.bf16.msra.mxu1 %v7361_v29 }
 0x2ad   : > { %6775 = vmatprep.subr.bf16.mxu1 %v9047_v21 }
 0x2ae   : > { %v2312_v46 = vrot.slane %v2311_v36, 1 }
 0x2b0   : > { %v2313_v24 = vadd.f32 %v2312_v46, %v2311_v36 }
 0x2b2   : > { %v9045_v53 = vmul.f32 0.00390625, %v2313_v24 }
 0x2b4   : > { %v9052_v39 = vsub.f32 %v8993_v28, %v9045_v53  ;;  %v9056_v30 = vsub.f32 %v8998_v34, %v9045_v53  ;;  %v9060_v40 = vsub.f32 %v9003_v3, %v9045_v53  ;;  %v9064_v12 = vsub.f32 %v9008_v1, %v9045_v53 }
 0x2b5   : > { %v9068_v20 = vsub.f32 %v9013_v58, %v9045_v53  ;;  %v9072_v28 = vsub.f32 %v9018_v9, %v9045_v53  ;;  %v9076_v34 = vsub.f32 %v9023_v37, %v9045_v53  ;;  %v9080_v3 = vsub.f32 %v9028_v47, %v9045_v53 }
 0x2b6   : > { %v9084_v1 = vsub.f32 %v9033_v5, %v9045_v53  ;;  %v9088_v58 = vsub.f32 %v9038_v10, %v9045_v53  ;;  %v9091_v26 = vsub.f32 %v6986_v18, %v9045_v53  ;;  %v9094_v9 = vsub.f32 %v6994_v16, %v9045_v53 }
 0x2b7   : > { %v9098_v37 = vsub.f32 %v8870_v56, %v9045_v53  ;;  %v9102_v47 = vsub.f32 %v8873_v49, %v9045_v53  ;;  %v9106_v5 = vsub.f32 %v8876_v11, %v9045_v53  ;;  %v9114_v52 = vsub.f32 %v8879_v15, %v9045_v53 }
 0x2b8   : > { %v9118_v56 = vsub.f32 %v8882_v48, %v9045_v53  ;;  %v9124_v11 = vsub.f32 %v8887_v38, %v9045_v53  ;;  %v9130_v15 = vsub.f32 %v8892_v54, %v9045_v53  ;;  %v9136_v23 = vsub.f32 %v8899_v14, %v9045_v53 }
 0x2b9   : > { %v2347_v10 = vmul.f32 %v9098_v37, %v9098_v37  ;;  %v2348_v22 = vmul.f32 %v9102_v47, %v9102_v47  ;;  %v2349_v49 = vmul.f32 %v9106_v5, %v9106_v5  ;;  %v2350_v50 = vmul.f32 %v9114_v52, %v9114_v52 }
 0x2ba   : > { %v2351_v48 = vmul.f32 %v9118_v56, %v9118_v56  ;;  %v2352_v38 = vmul.f32 %v9124_v11, %v9124_v11  ;;  %v9142_v8 = vsub.f32 %v8910_v4, %v9045_v53  ;;  %v2353_v54 = vmul.f32 %v9130_v15, %v9130_v15 }
 0x2bb   : > { %v2379_v55 = vadd.f32 %v2348_v22, %v2347_v10  ;;  %v9148_v19 = vsub.f32 %v10681_v41, %v9045_v53  ;;  %v2354_v14 = vmul.f32 %v9136_v23, %v9136_v23  ;;  %v9154_v33 = vsub.f32 %v10682_v62, %v9045_v53  ;;  %v7372_v62 = vld [vmem:[#allocation8 + $0x40] sm:$0xff]  }
 0x2bc   : > { %v2355_v4 = vmul.f32 %v9142_v8, %v9142_v8  ;;  %v9160_v44 = vsub.f32 %v8932_v61, %v9045_v53  ;;  %v9166_v51 = vsub.f32 %v8943_v32, %v9045_v53  ;;  %v9172_v36 = vsub.f32 %v8949_v7, %v9045_v53  ;;  %6311 = vmatprep.subr.bf16.mxu0 %v7372_v62 }
 0x2bd   : > { %v2380_v31 = vadd.f32 %v2379_v55, %v2349_v49  ;;  %v2356_v25 = vmul.f32 %v9148_v19, %v9148_v19  ;;  %v2357_v42 = vmul.f32 %v9154_v33, %v9154_v33  ;;  %v9178_v46 = vsub.f32 %v8961_v6, %v9045_v53 }
 0x2be   : > { %v2358_v61 = vmul.f32 %v9160_v44, %v9160_v44  ;;  %v2359_v32 = vmul.f32 %v9166_v51, %v9166_v51  ;;  %v9184_v63 = vsub.f32 %v8966_v2, %v9045_v53  ;;  %v2360_v7 = vmul.f32 %v9172_v36, %v9172_v36 }
 0x2bf   : > { %v2381_v18 = vadd.f32 %v2380_v31, %v2350_v50  ;;  %v9190_v10 = vsub.f32 %v8972_v13, %v9045_v53  ;;  %v2361_v6 = vmul.f32 %v9178_v46, %v9178_v46  ;;  %v9196_v49 = vsub.f32 %v8976_v60, %v9045_v53 }
 0x2c0   : > { %v2362_v2 = vmul.f32 %v9184_v63, %v9184_v63  ;;  %v9202_v50 = vsub.f32 %v8982_v45, %v9045_v53 }
 0x2c1   : > { %v2382_v0 = vadd.f32 %v2381_v18, %v2351_v48  ;;  %v2363_v13 = vmul.f32 %v9190_v10, %v9190_v10  ;;  %v9208_v48 = vsub.f32 %v8987_v57, %v9045_v53  ;;  %v2364_v60 = vmul.f32 %v9196_v49, %v9196_v49 }
 0x2c2   : > { %v2368_v57 = vmul.f32 %v9056_v30, %v9056_v30 }
 0x2c3   : > { %v2383_v16 = vadd.f32 %v2382_v0, %v2352_v38  ;;  %v2365_v38 = vmul.f32 %v9202_v50, %v9202_v50  ;;  %v2366_v45 = vmul.f32 %v9208_v48, %v9208_v48 }
 0x2c5   : > { %v2384_v35 = vadd.f32 %v2383_v16, %v2353_v54  ;;  %v2367_v16 = vmul.f32 %v9052_v39, %v9052_v39 }
 0x2c7   : > { %v2385_v43 = vadd.f32 %v2384_v35, %v2354_v14  ;;  %v2369_v14 = vmul.f32 %v9060_v40, %v9060_v40 }
 0x2c9   : > { %v2386_v59 = vadd.f32 %v2385_v43, %v2355_v4  ;;  %v2370_v4 = vmul.f32 %v9064_v12, %v9064_v12 }
 0x2cb   : > { %v2387_v27 = vadd.f32 %v2386_v59, %v2356_v25  ;;  %v2371_v25 = vmul.f32 %v9068_v20, %v9068_v20 }
 0x2cd   : > { %v2388_v17 = vadd.f32 %v2387_v27, %v2357_v42  ;;  %v2372_v42 = vmul.f32 %v9072_v28, %v9072_v28 }
 0x2cf   : > { %v2389_v29 = vadd.f32 %v2388_v17, %v2358_v61  ;;  %v2373_v61 = vmul.f32 %v9076_v34, %v9076_v34 }
 0x2d1   : > { %v2390_v24 = vadd.f32 %v2389_v29, %v2359_v32  ;;  %v2374_v32 = vmul.f32 %v9080_v3, %v9080_v3 }
 0x2d3   : > { %v2391_v22 = vadd.f32 %v2390_v24, %v2360_v7  ;;  %v2375_v7 = vmul.f32 %v9084_v1, %v9084_v1 }
 0x2d5   : > { %v2392_v55 = vadd.f32 %v2391_v22, %v2361_v6  ;;  %v2376_v6 = vmul.f32 %v9088_v58, %v9088_v58 }
 0x2d7   : > { %v2393_v31 = vadd.f32 %v2392_v55, %v2362_v2  ;;  %v2377_v2 = vmul.f32 %v9091_v26, %v9091_v26 }
 0x2d9   : > { %v2394_v18 = vadd.f32 %v2393_v31, %v2363_v13  ;;  %v2378_v13 = vmul.f32 %v9094_v9, %v9094_v9 }
 0x2db   : > { %v2395_v0 = vadd.f32 %v2394_v18, %v2364_v60 }
 0x2dd   : > { %v2396_v54 = vadd.f32 %v2395_v0, %v2365_v38 }
 0x2df   : > { %v2397_v41 = vadd.f32 %v2396_v54, %v2366_v45 }
 0x2e1   : > { %v2398_v53 = vadd.f32 %v2397_v41, %v2367_v16 }
 0x2e3   : > { %v2399_v35 = vadd.f32 %v2398_v53, %v2368_v57 }
 0x2e5   : > { %v2400_v43 = vadd.f32 %v2399_v35, %v2369_v14 }
 0x2e7   : > { %v2401_v59 = vadd.f32 %v2400_v43, %v2370_v4 }
 0x2e9   : > { %v2402_v27 = vadd.f32 %v2401_v59, %v2371_v25 }
 0x2eb   : > { %v2403_v17 = vadd.f32 %v2402_v27, %v2372_v42 }
 0x2ed   : > { %v2404_v29 = vadd.f32 %v2403_v17, %v2373_v61 }
 0x2ef   : > { %v2405_v24 = vadd.f32 %v2404_v29, %v2374_v32 }
 0x2f1   : > { %v2406_v22 = vadd.f32 %v2405_v24, %v2375_v7 }
 0x2f3   : > { %v2407_v55 = vadd.f32 %v2406_v22, %v2376_v6 }
 0x2f5   : > { %v2408_v31 = vadd.f32 %v2407_v55, %v2377_v2 }
 0x2f7   : > { %v2409_v60 = vadd.f32 %v2408_v31, %v2378_v13 }
 0x2f9   : > { %v2410_v18 = vrot.slane %v2409_v60, 4 }
 0x2fb   : > { %v2411_v38 = vadd.f32 %v2410_v18, %v2409_v60  ;;  %v7373_v60 = vld [vmem:[#allocation8] sm:$0xff]  }
 0x2fd   : > { %v2412_v0 = vrot.slane %v2411_v38, 2 }
 0x2ff   : > { %v2413_v45 = vadd.f32 %v2412_v0, %v2411_v38 }
 0x301   : > { %v2414_v54 = vrot.slane %v2413_v45, 1 }
 0x303   : > { %v2415_v16 = vadd.f32 %v2414_v54, %v2413_v45  ;;  %v7378_v54 = vld [vmem:[#allocation8 + $0x48] sm:$0xff]  }
 0x305   : > { %v2416_v41 = vmul.f32 0.00390625, %v2415_v16 }
 0x307   : > { %v2417_v57 = vadd.f32 1e-05, %v2416_v41 }
 0x309   : > { %7412 = vrsqrt.f32 %v2417_v57 }
 0x313   : > { %v9240_v53 = vpop.eup %7412 }
 0x314   : > { %v2419_v14 = vmul.f32 %v9240_v53, %v9098_v37  ;;  %v2420_v35 = vmul.f32 %v9240_v53, %v9102_v47  ;;  %v2423_v62 = vmul.f32 %v9240_v53, %v9118_v56  ;;  %v2424_v4 = vmul.f32 %v9240_v53, %v9124_v11 }
 0x315   : > { %v2425_v43 = vmul.f32 %v9240_v53, %v9130_v15  ;;  %v2426_v25 = vmul.f32 %v9240_v53, %v9136_v23  ;;  %v2421_v37 = vmul.f32 %v9240_v53, %v9106_v5  ;;  %v2422_v47 = vmul.f32 %v9240_v53, %v9114_v52 }
 0x316   : > { %v2451_v59 = vmax.f32 %v2419_v14, 0.0  ;;  %v2452_v42 = vmax.f32 %v2420_v35, 0.0  ;;  %v2427_v56 = vmul.f32 %v9240_v53, %v9142_v8  ;;  %v2428_v11 = vmul.f32 %v9240_v53, %v9148_v19 }
 0x317   : > { %v9262_v27 = vmax.f32 %v2423_v62, 0.0  ;;  %v2429_v15 = vmul.f32 %v9240_v53, %v9154_v33  ;;  %v2430_v23 = vmul.f32 %v9240_v53, %v9160_v44  ;;  %v2431_v5 = vmul.f32 %v9240_v53, %v9166_v51  ;;  %v7405_v33 = vld [vmem:[#allocation8 + $0x208] sm:$0xff]  }
 0x318   : > { %v9270_v61 = vmax.f32 %v2424_v4, 0.0  ;;  %v9272_v52 = vmax.f32 %v2425_v43, 0.0  ;;  %v9274_v17 = vmax.f32 %v2426_v25, 0.0  ;;  %v2483_v8 = vrot.slane %v2451_v59, 7 }
 0x319   : > { %v2499_v32 = vrot.slane %v2452_v42, 7  ;;  %v2579_v19 = vrot.slane %v2451_v59, 1  ;;  %v2595_v29 = vrot.slane %v2452_v42, 1  ;;  %v9276_v7 = vpack.c.bf16 %v2452_v42, %v2451_v59 }
 0x31a   : > { %v2453_v24 = vmax.f32 %v2421_v37, 0.0  ;;  %v2454_v51 = vmax.f32 %v2422_v47, 0.0  ;;  %v2581_v22 = vrot.slane %v9262_v27, 1  ;;  %v2597_v45 = vrot.slane %v9270_v61, 1 }
 0x31b   : > { %v2515_v6 = vsel %vm295_vm1, %v2483_v8, %v2499_v32  ;;  %v2531_v44 = vsel %vm295_vm1, %v2499_v32, %v2483_v8  ;;  %3140 = vmatprep.mubr.bf16.mxu0 %v9276_v7  ;;  %v2611_v55 = vsel %vm394_vm5, %v2579_v19, %v2595_v29  ;;  %v2627_v13 = vsel %vm394_vm5, %v2595_v29, %v2579_v19  ;;  %v7384_v29 = vld [vmem:[#allocation8 + $0x50] sm:$0xff]  }
 0x31c   : > { %v9283_v2 = vpack.c.bf16 %v2515_v6, %v2531_v44  ;;  %v2580_v31 = vrot.slane %v2453_v24, 1  ;;  %v9290_v18 = vpack.c.bf16 %v2627_v13, %v2611_v55  ;;  %v2596_v38 = vrot.slane %v2454_v51, 1 }
 0x31d   : > { %v9292_v0 = vpack.c.bf16 %v2454_v51, %v2453_v24  ;;  %v9295_v16 = vmax.f32 %v2427_v56, 0.0  ;;  %v9297_v41 = vmax.f32 %v2428_v11, 0.0  ;;  %v2484_v14 = vrot.slane %v2453_v24, 7  ;;  %v7365_v56 = vld [vmem:[#allocation8 + $0x88] sm:$0xff]  }
 0x31e   : > { %5402 = vmatmul.mubr.msk.bf16.vlgmr.msra.gmra.mrb[160].mxu0 %vm7823_vm6, %v9283_v2  ;;  %v2500_v35 = vrot.slane %v2454_v51, 7  ;;  %6743 = vmatprep.mubr.msk.bf16.mxu1 %vm7809_vm4, %v9290_v18  ;;  %v2612_v4 = vsel %vm394_vm5, %v2580_v31, %v2596_v38  ;;  %v2628_v43 = vsel %vm394_vm5, %v2596_v38, %v2580_v31  ;;  %v2613_v25 = vsel %vm394_vm5, %v2581_v22, %v2597_v45  ;;  %v7379_v11 = vld [vmem:[#allocation8 + $0x8] sm:$0xff]  }
 0x31f   : > { %3148 = vmatprep.mubr.bf16.mxu0 %v9292_v0  ;;  %v2432_v59 = vmul.f32 %v9240_v53, %v9172_v36  ;;  %v9314_v42 = vpack.c.bf16 %v2628_v43, %v2612_v4  ;;  %v2629_v37 = vsel %vm394_vm5, %v2597_v45, %v2581_v22  ;;  %v2582_v47 = vrot.slane %v9272_v52, 1  ;;  %6312 = vmatpush3.bf16.msra.mxu0 %v7373_v60  ;;  %v7390_v45 = vld [vmem:[#allocation8 + $0x58] sm:$0xff]  }
 0x320   : > { %v9319_v8 = vpack.c.bf16 %v2629_v37, %v2613_v25  ;;  %v2516_v32 = vsel %vm295_vm1, %v2484_v14, %v2500_v35  ;;  %v2532_v19 = vsel %vm295_vm1, %v2500_v35, %v2484_v14  ;;  %v2598_v36 = vrot.slane %v9274_v17, 1  ;;  %6313 = vmatprep.subr.bf16.mxu0 %v7378_v54 }
 0x321   : > { %6744 = vmatmul.mubr.msk.bf16.vlgmr.msra.gmra.mrb[96].mxu1 %vm7809_vm4, %v9314_v42  ;;  %v2583_v24 = vrot.slane %v9295_v16, 1  ;;  %v2599_v6 = vrot.slane %v9297_v41, 1  ;;  %v9331_v44 = vmax.f32 %v2429_v15, 0.0  ;;  %v9333_v51 = vmax.f32 %v2430_v23, 0.0  ;;  %v7366_v15 = vld [vmem:[#allocation8 + $0x90] sm:$0xff]  }
 0x322   : > { %6747 = vmatprep.mubr.msk.bf16.mxu1 %vm7809_vm4, %v9319_v8  ;;  %6776 = vmatpush3.bf16.msra.mxu1 %v9047_v21  ;;  %v9339_v22 = vmax.f32 %v2431_v5, 0.0  ;;  %v9341_v55 = vmax.f32 %v2432_v59, 0.0  ;;  %v9343_v13 = vpack.c.bf16 %v2516_v32, %v2532_v19  ;;  %v9347_v31 = vpack.c.bf16 %v9270_v61, %v9262_v27  ;;  %v7385_v23 = vld [vmem:[#allocation8 + $0x10] sm:$0xff]   ;;  %v7367_v59 = vld [vmem:[#allocation8 + $0x98] sm:$0xff]   ;;  %v7392_v19 = vld [vmem:[#allocation8 + $0x60] sm:$0xff]  }
 0x323   : > { %6777 = vmatprep.subr.bf16.mxu1 %v7365_v56  ;;  %6314 = vmatpush3.bf16.msra.mxu0 %v7379_v11  ;;  %v2614_v60 = vsel %vm394_vm5, %v2582_v47, %v2598_v36  ;;  %v2630_v21 = vsel %vm394_vm5, %v2598_v36, %v2582_v47  ;;  %v2485_v5 = vrot.slane %v9262_v27, 7  ;;  %v2501_v38 = vrot.slane %v9270_v61, 7 }
 0x324   : > { %6315 = vmatprep.subr.bf16.mxu0 %v7384_v29  ;;  %v2615_v54 = vsel %vm394_vm5, %v2583_v24, %v2599_v6  ;;  %v2631_v14 = vsel %vm394_vm5, %v2599_v6, %v2583_v24  ;;  %v2433_v35 = vmul.f32 %v9240_v53, %v9178_v46  ;;  %v2434_v27 = vmul.f32 %v9240_v53, %v9184_v63 }
 0x325   : > { %v9367_v61 = vpack.c.bf16 %v2630_v21, %v2614_v60  ;;  %v2584_v4 = vrot.slane %v9331_v44, 1  ;;  %v2600_v43 = vrot.slane %v9333_v51, 1  ;;  %v2585_v25 = vrot.slane %v9339_v22, 1 }
 0x326   : > { %5406 = vmatmul.mubr.msk.bf16.gmra.mrb[164].mxu0 %vm7823_vm6, %v9343_v13  ;;  %6778 = vmatpush3.bf16.msra.mxu1 %v7365_v56  ;;  %v9372_v37 = vpack.c.bf16 %v2631_v14, %v2615_v54  ;;  %v2517_v46 = vsel %vm295_vm1, %v2485_v5, %v2501_v38  ;;  %v2533_v63 = vsel %vm295_vm1, %v2501_v38, %v2485_v5  ;;  %v2601_v47 = vrot.slane %v9341_v55, 1  ;;  %v7391_v56 = vld [vmem:[#allocation8 + $0x18] sm:$0xff]   ;;  %v7393_v38 = vld [vmem:[#allocation8 + $0x20] sm:$0xff]   ;;  %v7396_v14 = vld [vmem:[#allocation8 + $0x68] sm:$0xff]  }
 0x327   : > { %3156 = vmatprep.mubr.bf16.mxu0 %v9347_v31  ;;  %6779 = vmatprep.subr.bf16.mxu1 %v7366_v15  ;;  %v2435_v11 = vmul.f32 %v9240_v53, %v9190_v10  ;;  %v2436_v32 = vmul.f32 %v9240_v53, %v9196_v49  ;;  %v9386_v36 = vmax.f32 %v2433_v35, 0.0  ;;  %v9388_v29 = vmax.f32 %v2434_v27, 0.0 }
 0x328   : > { %6316 = vmatpush3.bf16.msra.mxu0 %v7385_v23  ;;  %v9393_v24 = vpack.c.bf16 %v2517_v46, %v2533_v63  ;;  %v9397_v10 = vpack.c.bf16 %v9274_v17, %v9272_v52  ;;  %v2616_v49 = vsel %vm394_vm5, %v2584_v4, %v2600_v43  ;;  %v2632_v6 = vsel %vm394_vm5, %v2600_v43, %v2584_v4  ;;  %v7368_v23 = vld [vmem:[#allocation8 + $0xa0] sm:$0xff]   ;;  %v7369_v4 = vld [vmem:[#allocation8 + $0xa8] sm:$0xff]  }
 0x329   : > { %6317 = vmatprep.subr.bf16.mxu0 %v7390_v45  ;;  %6748 = vmatmul.mubr.msk.bf16.gmra.mrb[100].mxu1 %vm7809_vm4, %v9367_v61  ;;  %v2617_v60 = vsel %vm394_vm5, %v2585_v25, %v2601_v47  ;;  %v2486_v21 = vrot.slane %v9272_v52, 7  ;;  %v2502_v5 = vrot.slane %v9274_v17, 7  ;;  %v9409_v45 = vmax.f32 %v2435_v11, 0.0 }
 0x32a   : > { %6751 = vmatprep.mubr.msk.bf16.mxu1 %vm7809_vm4, %v9372_v37  ;;  %6780 = vmatpush3.bf16.msra.mxu1 %v7366_v15  ;;  %v2633_v15 = vsel %vm394_vm5, %v2601_v47, %v2585_v25  ;;  %v9411_v54 = vmax.f32 %v2436_v32, 0.0  ;;  %v2437_v52 = vmul.f32 %v9240_v53, %v9202_v50  ;;  %v2438_v17 = vmul.f32 %v9240_v53, %v9208_v48  ;;  %v7397_v50 = vld [vmem:[#allocation8 + $0x28] sm:$0xff]  }
 0x32b   : > { %6781 = vmatprep.subr.bf16.mxu1 %v7367_v59  ;;  %v9421_v35 = vpack.c.bf16 %v2632_v6, %v2616_v49  ;;  %v9423_v27 = vpack.c.bf16 %v2633_v15, %v2617_v60  ;;  %v2518_v43 = vsel %vm295_vm1, %v2486_v21, %v2502_v5  ;;  %v2534_v25 = vsel %vm295_vm1, %v2502_v5, %v2486_v21  ;;  %v7398_v49 = vld [vmem:[#allocation8 + $0x70] sm:$0xff]  }
 0x32c   : > { %6318 = vmatpush3.bf16.msra.mxu0 %v7391_v56  ;;  %v2602_v46 = vrot.slane %v9388_v29, 1  ;;  %v2439_v48 = vmul.f32 %v9240_v53, %v9052_v39  ;;  %v2440_v63 = vmul.f32 %v9240_v53, %v9056_v30  ;;  %v2587_v47 = vrot.slane %v9409_v45, 1  ;;  %v7399_v21 = vld [vmem:[#allocation8 + $0x30] sm:$0xff]  }
 0x32d   : > { %6319 = vmatprep.subr.bf16.mxu0 %v7392_v19  ;;  %v2603_v56 = vrot.slane %v9411_v54, 1  ;;  %v9443_v11 = vmax.f32 %v2437_v52, 0.0  ;;  %v9445_v39 = vmax.f32 %v2438_v17, 0.0  ;;  %v9447_v32 = vpack.c.bf16 %v2518_v43, %v2534_v25  ;;  %v7370_v19 = vld [vmem:[#allocation8 + $0xb0] sm:$0xff]   ;;  %v7402_v17 = vld [vmem:[#allocation8 + $0x78] sm:$0xff]  }
 0x32e   : > { %5410 = vmatmul.mubr.msk.bf16.gmra.mrb[168].mxu0 %vm7823_vm6, %v9393_v24  ;;  %6782 = vmatpush3.bf16.msra.mxu1 %v7367_v59  ;;  %v2586_v59 = vrot.slane %v9386_v36, 1  ;;  %v9451_v30 = vpack.c.bf16 %v9297_v41, %v9295_v16  ;;  %v2503_v15 = vrot.slane %v9297_v41, 7  ;;  %v9459_v5 = vmax.f32 %v2439_v48, 0.0  ;;  %v7403_v48 = vld [vmem:[#allocation8 + $0x38] sm:$0xff]  }
 0x32f   : > { %3164 = vmatprep.mubr.bf16.mxu0 %v9397_v10  ;;  %6783 = vmatprep.subr.bf16.mxu1 %v7368_v23  ;;  %v2635_v52 = vsel %vm394_vm5, %v2603_v56, %v2587_v47  ;;  %v2442_v41 = vmul.f32 %v9240_v53, %v9064_v12  ;;  %v2588_v25 = vrot.slane %v9443_v11, 1  ;;  %v2443_v12 = vmul.f32 %v9240_v53, %v9068_v20 }
 0x330   : > { %6320 = vmatpush3.bf16.msra.mxu0 %v7393_v38  ;;  %v2618_v6 = vsel %vm394_vm5, %v2586_v59, %v2602_v46  ;;  %v2634_v60 = vsel %vm394_vm5, %v2602_v46, %v2586_v59  ;;  %v9461_v38 = vmax.f32 %v2440_v63, 0.0  ;;  %v7371_v59 = vld [vmem:[#allocation8 + $0xb8] sm:$0xff]   ;;  %v2444_v63 = vmul.f32 %v9240_v53, %v9072_v28 }
 0x331   : > { %6752 = vmatmul.mubr.msk.bf16.gmra.mrb[104].mxu1 %vm7809_vm4, %v9421_v35  ;;  %6321 = vmatprep.subr.bf16.mxu0 %v7396_v14  ;;  %v2619_v14 = vsel %vm394_vm5, %v2587_v47, %v2603_v56  ;;  %v9475_v43 = vpack.c.bf16 %v2634_v60, %v2618_v6  ;;  %v2589_v47 = vrot.slane %v9459_v5, 1  ;;  %v9499_v20 = vmax.f32 %v2442_v41, 0.0  ;;  %v7374_v60 = vld [vmem:[#allocation8 + $0x1c0] sm:$0xff]  }
 0x332   : > { %6755 = vmatprep.mubr.msk.bf16.mxu1 %vm7809_vm4, %v9423_v27  ;;  %6784 = vmatpush3.bf16.msra.mxu1 %v7368_v23  ;;  %v2487_v23 = vrot.slane %v9295_v16, 7  ;;  %v2441_v16 = vmul.f32 %v9240_v53, %v9060_v40  ;;  %v9478_v46 = vpack.c.bf16 %v2635_v52, %v2619_v14  ;;  %v2604_v40 = vrot.slane %v9445_v39, 1 }
 0x333   : > { %6785 = vmatprep.subr.bf16.mxu1 %v7369_v4  ;;  %v2605_v56 = vrot.slane %v9461_v38, 1  ;;  %v9505_v28 = vpack.c.bf16 %v9333_v51, %v9331_v44  ;;  %v9513_v14 = vmax.f32 %v2443_v12, 0.0  ;;  %v9515_v52 = vmax.f32 %v2444_v63, 0.0 }
 0x334   : > { %6322 = vmatpush3.bf16.msra.mxu0 %v7397_v50  ;;  %v2519_v50 = vsel %vm295_vm1, %v2487_v23, %v2503_v15  ;;  %v2447_v41 = vmul.f32 %v9240_v53, %v9084_v1 }
 0x335   : > { %6323 = vmatprep.subr.bf16.mxu0 %v7398_v49  ;;  %v9497_v49 = vmax.f32 %v2441_v16, 0.0  ;;  %v2637_v16 = vsel %vm394_vm5, %v2605_v56, %v2589_v47  ;;  %v2591_v1 = vrot.slane %v9513_v14, 1 }
 0x336   : > { %5414 = vmatmul.mubr.msk.bf16.gmra.mrb[172].mxu0 %vm7823_vm6, %v9447_v32  ;;  %6786 = vmatpush3.bf16.msra.mxu1 %v7369_v4  ;;  %v2535_v4 = vsel %vm295_vm1, %v2503_v15, %v2487_v23  ;;  %v2620_v23 = vsel %vm394_vm5, %v2588_v25, %v2604_v40  ;;  %v2636_v15 = vsel %vm394_vm5, %v2604_v40, %v2588_v25  ;;  %v9555_v63 = vmax.f32 %v2447_v41, 0.0 }
 0x337   : > { %3172 = vmatprep.mubr.bf16.mxu0 %v9451_v30  ;;  %6787 = vmatprep.subr.bf16.mxu1 %v7370_v19  ;;  %v9501_v6 = vpack.c.bf16 %v2519_v50, %v2535_v4  ;;  %v2448_v25 = vmul.f32 %v9240_v53, %v9088_v58  ;;  %v9533_v50 = vpack.c.bf16 %v2636_v15, %v2620_v23  ;;  %v2590_v4 = vrot.slane %v9497_v49, 1 }
 0x338   : > { %6324 = vmatpush3.bf16.msra.mxu0 %v7399_v21  ;;  %v2504_v21 = vrot.slane %v9333_v51, 7  ;;  %v2446_v51 = vmul.f32 %v9240_v53, %v9080_v3  ;;  %v2607_v58 = vrot.slane %v9515_v52, 1 }
 0x339   : > { %6756 = vmatmul.mubr.msk.bf16.gmra.mrb[108].mxu1 %vm7809_vm4, %v9475_v43  ;;  %6325 = vmatprep.subr.bf16.mxu0 %v7402_v17  ;;  %v2621_v17 = vsel %vm394_vm5, %v2589_v47, %v2605_v56  ;;  %v9557_v47 = vmax.f32 %v2448_v25, 0.0  ;;  %v2593_v25 = vrot.slane %v9555_v63, 1 }
 0x33a   : > { %6759 = vmatprep.mubr.msk.bf16.mxu1 %vm7809_vm4, %v9478_v46  ;;  %6788 = vmatpush3.bf16.msra.mxu1 %v7370_v19  ;;  %v2488_v19 = vrot.slane %v9331_v44, 7  ;;  %v2445_v44 = vmul.f32 %v9240_v53, %v9076_v34  ;;  %v9536_v40 = vpack.c.bf16 %v2637_v16, %v2621_v17  ;;  %v9550_v12 = vmax.f32 %v2446_v51, 0.0 }
 0x33b   : > { %6789 = vmatprep.subr.bf16.mxu1 %v7371_v59  ;;  %v2623_v17 = vsel %vm394_vm5, %v2591_v1, %v2607_v58  ;;  %v2639_v16 = vsel %vm394_vm5, %v2607_v58, %v2591_v1  ;;  %v2449_v51 = vmul.f32 %v9240_v53, %v9091_v26  ;;  %v2609_v26 = vrot.slane %v9557_v47, 1 }
 0x33c   : > { %6326 = vmatpush3.bf16.msra.mxu0 %v7403_v48  ;;  %v2520_v34 = vsel %vm295_vm1, %v2488_v19, %v2504_v21  ;;  %v2536_v3 = vsel %vm295_vm1, %v2504_v21, %v2488_v19  ;;  %v9548_v48 = vmax.f32 %v2445_v44, 0.0  ;;  %v2489_v19 = vrot.slane %v9339_v22, 7 }
 0x33d   : > { %v9559_v56 = vpack.c.bf16 %v2520_v34, %v2536_v3  ;;  %v2505_v21 = vrot.slane %v9341_v55, 7  ;;  %v2450_v44 = vmul.f32 %v9240_v53, %v9094_v9  ;;  %v2608_v41 = vrot.slane %v9550_v12, 1 }
 0x33e   : > { %5418 = vmatmul.mubr.msk.bf16.gmra.mrb[176].mxu0 %vm7823_vm6, %v9501_v6  ;;  %6790 = vmatpush3.bf16.msra.mxu1 %v7371_v59  ;;  %v2606_v59 = vrot.slane %v9499_v20, 1  ;;  %v9600_v3 = vmax.f32 %v2449_v51, 0.0  ;;  %v9609_v1 = vpack.c.bf16 %v9388_v29, %v9386_v36 }
 0x33f   : > { %3180 = vmatprep.mubr.bf16.mxu0 %v9505_v28  ;;  %6447 = vmatprep.subr.bf16.mxu1 %v7374_v60  ;;  %v9563_v60 = vpack.c.bf16 %v9341_v55, %v9339_v22  ;;  %v2592_v55 = vrot.slane %v9548_v48, 1  ;;  %v2521_v34 = vsel %vm295_vm1, %v2489_v19, %v2505_v21  ;;  %v2537_v9 = vsel %vm295_vm1, %v2505_v21, %v2489_v19 }
 0x340   : > { %v2622_v23 = vsel %vm394_vm5, %v2590_v4, %v2606_v59  ;;  %v2638_v15 = vsel %vm394_vm5, %v2606_v59, %v2590_v4  ;;  %v9588_v4 = vpack.c.bf16 %v2639_v16, %v2623_v17  ;;  %v9598_v53 = vmax.f32 %v2450_v44, 0.0 }
 0x341   : > { %6760 = vmatmul.mubr.msk.bf16.gmra.mrb[112].mxu1 %vm7809_vm4, %v9533_v50  ;;  %v9583_v22 = vpack.c.bf16 %v2638_v15, %v2622_v23  ;;  %v9605_v59 = vpack.c.bf16 %v2521_v34, %v2537_v9  ;;  %v2624_v58 = vsel %vm394_vm5, %v2592_v55, %v2608_v41  ;;  %v2640_v23 = vsel %vm394_vm5, %v2608_v41, %v2592_v55 }
 0x342   : > { %6763 = vmatprep.mubr.msk.bf16.mxu1 %vm7809_vm4, %v9536_v40  ;;  %v2625_v15 = vsel %vm394_vm5, %v2593_v25, %v2609_v26  ;;  %v2641_v19 = vsel %vm394_vm5, %v2609_v26, %v2593_v25  ;;  %v2490_v21 = vrot.slane %v9386_v36, 7  ;;  %v2506_v17 = vrot.slane %v9388_v29, 7 }
 0x343   : > { %v9625_v16 = vpack.c.bf16 %v2640_v23, %v2624_v58  ;;  %v9627_v44 = vpack.c.bf16 %v2641_v19, %v2625_v15  ;;  %v2594_v36 = vrot.slane %v9600_v3, 1  ;;  %v2610_v29 = vrot.slane %v9598_v53, 1 }
 0x344   : > { %v2522_v51 = vsel %vm295_vm1, %v2490_v21, %v2506_v17  ;;  %v2538_v55 = vsel %vm295_vm1, %v2506_v17, %v2490_v21  ;;  %v9645_v25 = vpack.c.bf16 %v9411_v54, %v9409_v45  ;;  %v2491_v26 = vrot.slane %v9409_v45, 7 }
 0x345   : > { %v9641_v41 = vpack.c.bf16 %v2522_v51, %v2538_v55  ;;  %v2626_v34 = vsel %vm394_vm5, %v2594_v36, %v2610_v29  ;;  %v2642_v9 = vsel %vm394_vm5, %v2610_v29, %v2594_v36  ;;  %v2507_v58 = vrot.slane %v9411_v54, 7  ;;  %v7375_v55 = vld [vmem:[#allocation8 + $0x180] sm:$0xff]   ;;  %v7376_v36 = vld [vmem:[#allocation8 + $0x1c8] sm:$0xff]  }
 0x346   : > { %5422 = vmatmul.mubr.msk.bf16.gmra.mrb[180].mxu0 %vm7823_vm6, %v9559_v56  ;;  %v9657_v23 = vpack.c.bf16 %v2642_v9, %v2626_v34  ;;  %v10686_v45 = vmov 0   ;;  %v9671_v21 = vpack.c.bf16 %v9445_v39, %v9443_v11  ;;  %v2492_v17 = vrot.slane %v9443_v11, 7  ;;  %v7377_v11 = vld [vmem:[#allocation8 + $0x188] sm:$0xff]   ;;  %v7380_v9 = vld [vmem:[#allocation8 + $0x1d0] sm:$0xff]  }
 0x347   : > { %3188 = vmatprep.mubr.bf16.mxu0 %v9563_v60  ;;  %v2523_v15 = vsel %vm295_vm1, %v2491_v26, %v2507_v58  ;;  %v2539_v19 = vsel %vm295_vm1, %v2507_v58, %v2491_v26  ;;  %v2508_v51 = vrot.slane %v9445_v39, 7  ;;  %v9693_v26 = vpack.c.bf16 %v9461_v38, %v9459_v5 }
 0x348   : > { %v9667_v54 = vpack.c.bf16 %v2523_v15, %v2539_v19  ;;  %v2493_v58 = vrot.slane %v9459_v5, 7  ;;  %v2509_v15 = vrot.slane %v9461_v38, 7  ;;  %v7382_v19 = vld [vmem:[#allocation8 + $0x1d8] sm:$0xff]  }
 0x349   : > { %6764 = vmatmul.mubr.msk.bf16.gmra.mrb[116].mxu1 %vm7809_vm4, %v9583_v22  ;;  %v2524_v29 = vsel %vm295_vm1, %v2492_v17, %v2508_v51  ;;  %v2540_v34 = vsel %vm295_vm1, %v2508_v51, %v2492_v17  ;;  %v7383_v5 = vld [vmem:[#allocation8 + $0x198] sm:$0xff]  }
 0x34a   : > { %6767 = vmatprep.mubr.msk.bf16.mxu1 %vm7809_vm4, %v9588_v4  ;;  %v9689_v39 = vpack.c.bf16 %v2524_v29, %v2540_v34  ;;  %v2525_v17 = vsel %vm295_vm1, %v2493_v58, %v2509_v15  ;;  %v2541_v51 = vsel %vm295_vm1, %v2509_v15, %v2493_v58  ;;  %v2494_v29 = vrot.slane %v9497_v49, 7 }
 0x34b   : > { %v9711_v38 = vpack.c.bf16 %v2525_v17, %v2541_v51  ;;  %v2510_v34 = vrot.slane %v9499_v20, 7  ;;  %v2495_v17 = vrot.slane %v9513_v14, 7  ;;  %v2511_v51 = vrot.slane %v9515_v52, 7 }
 0x34d   : > { %v2526_v58 = vsel %vm295_vm1, %v2494_v29, %v2510_v34  ;;  %v2542_v15 = vsel %vm295_vm1, %v2510_v34, %v2494_v29  ;;  %v2527_v29 = vsel %vm295_vm1, %v2495_v17, %v2511_v51  ;;  %v2543_v34 = vsel %vm295_vm1, %v2511_v51, %v2495_v17 }
 0x34e   : > { %5426 = vmatmul.mubr.msk.bf16.gmra.mrb[184].mxu0 %vm7823_vm6, %v9605_v59  ;;  %v2497_v17 = vrot.slane %v9555_v63, 7  ;;  %v2513_v51 = vrot.slane %v9557_v47, 7 }
 0x34f   : > { %3196 = vmatprep.mubr.bf16.mxu0 %v9609_v1 }
 0x351   : > { %6768 = vmatmul.mubr.msk.bf16.gmra.mrb[120].mxu1 %vm7809_vm4, %v9625_v16 }
 0x352   : > { %6771 = vmatprep.mubr.msk.bf16.mxu1 %vm7809_vm4, %v9627_v44 }
 0x356   : > { %5430 = vmatmul.mubr.msk.bf16.gmra.mrb[188].mxu0 %vm7823_vm6, %v9641_v41 }
 0x357   : > { %3204 = vmatprep.mubr.bf16.mxu0 %v9645_v25 }
 0x359   : > { %6772 = vmatmul.mubr.msk.bf16.gmra.mrb[124].mxu1 %vm7809_vm4, %v9657_v23 }
 0x35a   : > { %6791 = vmatprep.mubr.bf16.mxu1 %v10686_v45 }
 0x35e   : > { %5434 = vmatmul.mubr.msk.bf16.gmra.mrb[192].mxu0 %vm7823_vm6, %v9667_v54 }
 0x35f   : > { %3212 = vmatprep.mubr.bf16.mxu0 %v9671_v21 }
 0x361   : > { %6792 = vmatmul.mubr.msk.bf16.vlgmr.msra.gmra.mrb[96].mxu1 %vm7809_vm4, %v9290_v18  ;;  %v7381_v18 = vld [vmem:[#allocation8 + $0x190] sm:$0xff]  }
 0x362   : > { %6795 = vmatprep.mubr.msk.bf16.mxu1 %vm7809_vm4, %v9314_v42  ;;  %6448 = vmatpush3.bf16.msra.mxu1 %v7375_v55  ;;  %v7386_v55 = vld [vmem:[#allocation8 + $0x1e0] sm:$0xff]  }
 0x363   : > { %6449 = vmatprep.subr.bf16.mxu1 %v7376_v36  ;;  %v9715_v36 = vpack.c.bf16 %v9499_v20, %v9497_v49  ;;  %v7389_v49 = vld [vmem:[#allocation8 + $0x1a8] sm:$0xff]   ;;  %v9733_v20 = vpack.c.bf16 %v2526_v58, %v2542_v15  ;;  %v2496_v58 = vrot.slane %v9548_v48, 7  ;;  %v2512_v15 = vrot.slane %v9550_v12, 7 }
 0x366   : > { %5438 = vmatmul.mubr.msk.bf16.gmra.mrb[196].mxu0 %vm7823_vm6, %v9689_v39  ;;  %6450 = vmatpush3.bf16.msra.mxu1 %v7377_v11  ;;  %v7387_v11 = vld [vmem:[#allocation8 + $0x1a0] sm:$0xff]  }
 0x367   : > { %3220 = vmatprep.mubr.bf16.mxu0 %v9693_v26  ;;  %6451 = vmatprep.subr.bf16.mxu1 %v7380_v9  ;;  %v7388_v9 = vld [vmem:[#allocation8 + $0x1e8] sm:$0xff]  }
 0x369   : > { %6796 = vmatmul.mubr.msk.bf16.gmra.mrb[100].mxu1 %vm7809_vm4, %v9319_v8 }
 0x36a   : > { %6799 = vmatprep.mubr.msk.bf16.mxu1 %vm7809_vm4, %v9367_v61  ;;  %6452 = vmatpush3.bf16.msra.mxu1 %v7381_v18  ;;  %v7394_v18 = vld [vmem:[#allocation8 + $0x1f0] sm:$0xff]  }
 0x36b   : > { %6453 = vmatprep.subr.bf16.mxu1 %v7382_v19  ;;  %v9737_v19 = vpack.c.bf16 %v9515_v52, %v9513_v14  ;;  %v7401_v14 = vld [vmem:[#allocation8 + $0x1b8] sm:$0xff]   ;;  %v9755_v52 = vpack.c.bf16 %v2527_v29, %v2543_v34  ;;  %v2498_v29 = vrot.slane %v9600_v3, 7  ;;  %v2514_v34 = vrot.slane %v9598_v53, 7 }
 0x36e   : > { %5442 = vmatmul.mubr.msk.bf16.gmra.mrb[200].mxu0 %vm7823_vm6, %v9711_v38  ;;  %6454 = vmatpush3.bf16.msra.mxu1 %v7383_v5  ;;  %v7395_v5 = vld [vmem:[#allocation8 + $0x1b0] sm:$0xff]  }
 0x36f   : > { %3228 = vmatprep.mubr.bf16.mxu0 %v9715_v36  ;;  %6455 = vmatprep.subr.bf16.mxu1 %v7386_v55  ;;  %v7400_v55 = vld [vmem:[#allocation8 + $0x1f8] sm:$0xff]  }
 0x371   : > { %6800 = vmatmul.mubr.msk.bf16.gmra.mrb[104].mxu1 %vm7809_vm4, %v9372_v37 }
 0x372   : > { %6803 = vmatprep.mubr.msk.bf16.mxu1 %vm7809_vm4, %v9421_v35  ;;  %6456 = vmatpush3.bf16.msra.mxu1 %v7387_v11  ;;  %v7404_v11 = vld [vmem:[#allocation8 + $0x200] sm:$0xff]  }
 0x373   : > { %6457 = vmatprep.subr.bf16.mxu1 %v7388_v9  ;;  %v9759_v9 = vpack.c.bf16 %v9550_v12, %v9548_v48  ;;  %v9781_v12 = vpack.c.bf16 %v9557_v47, %v9555_v63  ;;  %v9803_v47 = vpack.c.bf16 %v9598_v53, %v9600_v3  ;;  %v7406_v3 = vld [vmem:[#allocation8 + $0x210] sm:$0xff]  }
 0x376   : > { %5446 = vmatmul.mubr.msk.bf16.gmra.mrb[204].mxu0 %vm7823_vm6, %v9733_v20  ;;  %6458 = vmatpush3.bf16.msra.mxu1 %v7389_v49  ;;  %v2528_v49 = vsel %vm295_vm1, %v2496_v58, %v2512_v15 }
 0x377   : > { %3236 = vmatprep.mubr.bf16.mxu0 %v9737_v19  ;;  %6459 = vmatprep.subr.bf16.mxu1 %v7394_v18  ;;  %v2544_v18 = vsel %vm295_vm1, %v2512_v15, %v2496_v58  ;;  %v2546_v58 = vsel %vm295_vm1, %v2514_v34, %v2498_v29  ;;  %v7407_v15 = vld [vmem:[#allocation8 + $0x218] sm:$0xff]  }
 0x378   : > { %v9777_v48 = vpack.c.bf16 %v2528_v49, %v2544_v18 }
 0x379   : > { %6804 = vmatmul.mubr.msk.bf16.gmra.mrb[108].mxu1 %vm7809_vm4, %v9423_v27 }
 0x37a   : > { %6807 = vmatprep.mubr.msk.bf16.mxu1 %vm7809_vm4, %v9475_v43  ;;  %6460 = vmatpush3.bf16.msra.mxu1 %v7395_v5  ;;  %v2529_v5 = vsel %vm295_vm1, %v2497_v17, %v2513_v51 }
 0x37b   : > { %6461 = vmatprep.subr.bf16.mxu1 %v7400_v55  ;;  %v2545_v55 = vsel %vm295_vm1, %v2513_v51, %v2497_v17 }
 0x37c   : > { %v9799_v63 = vpack.c.bf16 %v2529_v5, %v2545_v55 }
 0x37e   : > { %5450 = vmatmul.mubr.msk.bf16.gmra.mrb[208].mxu0 %vm7823_vm6, %v9755_v52  ;;  %6462 = vmatpush3.bf16.msra.mxu1 %v7401_v14  ;;  %v2530_v14 = vsel %vm295_vm1, %v2498_v29, %v2514_v34 }
 0x37f   : > { %3244 = vmatprep.mubr.bf16.mxu0 %v9759_v9  ;;  %6823 = vmatprep.subr.bf16.mxu1 %v7404_v11  ;;  %v9821_v53 = vpack.c.bf16 %v2530_v14, %v2546_v58 }
 0x381   : > { %6808 = vmatmul.mubr.msk.bf16.gmra.mrb[112].mxu1 %vm7809_vm4, %v9478_v46 }
 0x382   : > { %6811 = vmatprep.mubr.msk.bf16.mxu1 %vm7809_vm4, %v9533_v50 }
 0x386   : > { %5454 = vmatmul.mubr.msk.bf16.gmra.mrb[212].mxu0 %vm7823_vm6, %v9777_v48 }
 0x387   : > { %3252 = vmatprep.mubr.bf16.mxu0 %v9781_v12 }
 0x389   : > { %6812 = vmatmul.mubr.msk.bf16.gmra.mrb[116].mxu1 %vm7809_vm4, %v9536_v40 }
 0x38a   : > { %6815 = vmatprep.mubr.msk.bf16.mxu1 %vm7809_vm4, %v9583_v22 }
 0x38e   : > { %5458 = vmatmul.mubr.msk.bf16.gmra.mrb[216].mxu0 %vm7823_vm6, %v9799_v63 }
 0x38f   : > { %3260 = vmatprep.mubr.bf16.mxu0 %v9803_v47 }
 0x391   : > { %6816 = vmatmul.mubr.msk.bf16.gmra.mrb[120].mxu1 %vm7809_vm4, %v9588_v4 }
 0x392   : > { %6819 = vmatprep.mubr.msk.bf16.mxu1 %vm7809_vm4, %v9625_v16 }
 0x396   : > { %5462 = vmatmul.mubr.msk.bf16.gmra.mrb[220].mxu0 %vm7823_vm6, %v9821_v53 }
 0x397   : > { %3606 = vmatprep.mubr.bf16.mxu0 %v10686_v45 }
 0x399   : > { %6820 = vmatmul.mubr.msk.bf16.gmra.mrb[124].mxu1 %vm7809_vm4, %v9627_v44 }
 0x39a   : > { %4169 = vmatprep.mubr.bf16.mxu1 %v9292_v0 }
 0x39e   : > { %3607 = vmatmul.mubr.bf16.vlgmr.msra.gmra.mrb[224].mxu0 %v10686_v45 }
 0x39f   : > { %3614 = vmatprep.mubr.bf16.mxu0 %v9276_v7  ;;  %v7408_v7 = vld [vmem:[#allocation8 + $0x220] sm:$0xff]  }
 0x3a1   : > { %5650 = vmatmul.mubr.msk.bf16.vlgmr.msra.gmra.mrb[128].mxu1 %vm7823_vm6, %v9343_v13 }
 0x3a2   : > { %4177 = vmatprep.mubr.bf16.mxu1 %v9347_v31  ;;  %6824 = vmatpush3.bf16.msra.mxu1 %v7404_v11 }
 0x3a3   : > { %6825 = vmatprep.subr.bf16.mxu1 %v7405_v33 }
 0x3a6   : > { %5530 = vmatmul.mubr.msk.bf16.gmra.mrb[228].mxu0 %vm7823_vm6, %v9283_v2  ;;  %6826 = vmatpush3.bf16.msra.mxu1 %v7405_v33  ;;  %v7409_v2 = vld [vmem:[#allocation8 + $0x228] sm:$0xff]  }
 0x3a7   : > { %3622 = vmatprep.mubr.bf16.mxu0 %v9292_v0  ;;  %6827 = vmatprep.subr.bf16.mxu1 %v7406_v3  ;;  %v7410_v0 = vld [vmem:[#allocation8 + $0x230] sm:$0xff]  }
 0x3a9   : > { %5654 = vmatmul.mubr.msk.bf16.gmra.mrb[132].mxu1 %vm7823_vm6, %v9393_v24 }
 0x3aa   : > { %4185 = vmatprep.mubr.bf16.mxu1 %v9397_v10  ;;  %6828 = vmatpush3.bf16.msra.mxu1 %v7406_v3 }
 0x3ab   : > { %6829 = vmatprep.subr.bf16.mxu1 %v7407_v15 }
 0x3ae   : > { %5534 = vmatmul.mubr.msk.bf16.gmra.mrb[232].mxu0 %vm7823_vm6, %v9343_v13  ;;  %6830 = vmatpush3.bf16.msra.mxu1 %v7407_v15  ;;  %v7411_v13 = vld [vmem:[#allocation8 + $0x238] sm:$0xff]  }
 0x3af   : > { %3630 = vmatprep.mubr.bf16.mxu0 %v9347_v31  ;;  %6831 = vmatprep.subr.bf16.mxu1 %v7408_v7 }
 0x3b1   : > { %5658 = vmatmul.mubr.msk.bf16.gmra.mrb[136].mxu1 %vm7823_vm6, %v9447_v32 }
 0x3b2   : > { %4193 = vmatprep.mubr.bf16.mxu1 %v9451_v30  ;;  %6832 = vmatpush3.bf16.msra.mxu1 %v7408_v7 }
 0x3b3   : > { %6833 = vmatprep.subr.bf16.mxu1 %v7409_v2 }
 0x3b6   : > { %5538 = vmatmul.mubr.msk.bf16.gmra.mrb[236].mxu0 %vm7823_vm6, %v9393_v24  ;;  %6834 = vmatpush3.bf16.msra.mxu1 %v7409_v2 }
 0x3b7   : > { %3638 = vmatprep.mubr.bf16.mxu0 %v9397_v10  ;;  %6835 = vmatprep.subr.bf16.mxu1 %v7410_v0 }
 0x3b9   : > { %5662 = vmatmul.mubr.msk.bf16.gmra.mrb[140].mxu1 %vm7823_vm6, %v9501_v6 }
 0x3ba   : > { %4201 = vmatprep.mubr.bf16.mxu1 %v9505_v28  ;;  %6836 = vmatpush3.bf16.msra.mxu1 %v7410_v0 }
 0x3bb   : > { %6837 = vmatprep.subr.bf16.mxu1 %v7411_v13 }
 0x3be   : > { %5542 = vmatmul.mubr.msk.bf16.gmra.mrb[240].mxu0 %vm7823_vm6, %v9447_v32  ;;  %6838 = vmatpush3.bf16.msra.mxu1 %v7411_v13 }
 0x3bf   : > { %3646 = vmatprep.mubr.bf16.mxu0 %v9451_v30 }
 0x3c1   : > { %5666 = vmatmul.mubr.msk.bf16.gmra.mrb[144].mxu1 %vm7823_vm6, %v9559_v56 }
 0x3c2   : > { %4209 = vmatprep.mubr.bf16.mxu1 %v9563_v60 }
 0x3c6   : > { %5546 = vmatmul.mubr.msk.bf16.gmra.mrb[244].mxu0 %vm7823_vm6, %v9501_v6 }
 0x3c7   : > { %3654 = vmatprep.mubr.bf16.mxu0 %v9505_v28 }
 0x3c9   : > { %5670 = vmatmul.mubr.msk.bf16.gmra.mrb[148].mxu1 %vm7823_vm6, %v9605_v59 }
 0x3ca   : > { %4217 = vmatprep.mubr.bf16.mxu1 %v9609_v1 }
 0x3ce   : > { %5550 = vmatmul.mubr.msk.bf16.gmra.mrb[248].mxu0 %vm7823_vm6, %v9559_v56 }
 0x3cf   : > { %3662 = vmatprep.mubr.bf16.mxu0 %v9563_v60 }
 0x3d1   : > { %5674 = vmatmul.mubr.msk.bf16.gmra.mrb[152].mxu1 %vm7823_vm6, %v9641_v41 }
 0x3d2   : > { %4225 = vmatprep.mubr.bf16.mxu1 %v9645_v25 }
 0x3d6   : > { %5554 = vmatmul.mubr.msk.bf16.gmra.mrb[252].mxu0 %vm7823_vm6, %v9605_v59 }
 0x3d7   : > { %3670 = vmatprep.mubr.bf16.mxu0 %v9609_v1 }
 0x3d9   : > { %5678 = vmatmul.mubr.msk.bf16.gmra.mrb[156].mxu1 %vm7823_vm6, %v9667_v54 }
 0x3da   : > { %4233 = vmatprep.mubr.bf16.mxu1 %v9671_v21 }
 0x3de   : > { %5558 = vmatmul.mubr.msk.bf16.gmra.mrb[0].mxu0 %vm7823_vm6, %v9641_v41 }
 0x3df   : > { %3678 = vmatprep.mubr.bf16.mxu0 %v9645_v25 }
 0x3e1   : > { %5682 = vmatmul.mubr.msk.bf16.gmra.mrb[160].mxu1 %vm7823_vm6, %v9689_v39 }
 0x3e2   : > { %4241 = vmatprep.mubr.bf16.mxu1 %v9693_v26 }
 0x3e6   : > { %5562 = vmatmul.mubr.msk.bf16.gmra.mrb[4].mxu0 %vm7823_vm6, %v9667_v54 }
 0x3e7   : > { %3686 = vmatprep.mubr.bf16.mxu0 %v9671_v21 }
 0x3e9   : > { %5686 = vmatmul.mubr.msk.bf16.gmra.mrb[164].mxu1 %vm7823_vm6, %v9711_v38 }
 0x3ea   : > { %4249 = vmatprep.mubr.bf16.mxu1 %v9715_v36 }
 0x3ee   : > { %5566 = vmatmul.mubr.msk.bf16.gmra.mrb[8].mxu0 %vm7823_vm6, %v9689_v39 }
 0x3ef   : > { %3694 = vmatprep.mubr.bf16.mxu0 %v9693_v26 }
 0x3f1   : > { %v6191_v31 = vpop.f32.mrb[160].mxu0  ;;  %5690 = vmatmul.mubr.msk.bf16.gmra.mrb[168].mxu1 %vm7823_vm6, %v9733_v20 }
 0x3f2   : > { %v6192_v24 = vpop.f32.mrb[161].mxu0  ;;  %4257 = vmatprep.mubr.bf16.mxu1 %v9737_v19 }
 0x3f3   : > { %v9917_v10 = vadd.f32 %v6192_v24, %v6191_v31  ;;  %v6194_v32 = vpop.f32.mrb[162].mxu0 }
 0x3f4   : > { %v6195_v30 = vpop.f32.mrb[163].mxu0 }
 0x3f5   : > { %v9919_v6 = vadd.f32 %v6195_v30, %v6194_v32 }
 0x3f6   : > { %5570 = vmatmul.mubr.msk.bf16.gmra.mrb[12].mxu0 %vm7823_vm6, %v9711_v38 }
 0x3f7   : > { %3702 = vmatprep.mubr.bf16.mxu0 %v9715_v36 }
 0x3f9   : > { %v6197_v28 = vpop.f32.mrb[164].mxu0  ;;  %5694 = vmatmul.mubr.msk.bf16.gmra.mrb[172].mxu1 %vm7823_vm6, %v9755_v52 }
 0x3fa   : > { %v6198_v56 = vpop.f32.mrb[165].mxu0  ;;  %4265 = vmatprep.mubr.bf16.mxu1 %v9759_v9 }
 0x3fb   : > { %v9929_v60 = vadd.f32 %v6198_v56, %v6197_v28  ;;  %v6200_v59 = vpop.f32.mrb[166].mxu0 }
 0x3fc   : > { %v6201_v1 = vpop.f32.mrb[167].mxu0 }
 0x3fd   : > { %v9931_v41 = vadd.f32 %v6201_v1, %v6200_v59 }
 0x3fe   : > { %5574 = vmatmul.mubr.msk.bf16.gmra.mrb[16].mxu0 %vm7823_vm6, %v9733_v20 }
 0x3ff   : > { %3710 = vmatprep.mubr.bf16.mxu0 %v9737_v19 }
 0x401   : > { %v6203_v25 = vpop.f32.mrb[168].mxu0  ;;  %5698 = vmatmul.mubr.msk.bf16.gmra.mrb[176].mxu1 %vm7823_vm6, %v9777_v48 }
 0x402   : > { %v6204_v54 = vpop.f32.mrb[169].mxu0  ;;  %4273 = vmatprep.mubr.bf16.mxu1 %v9781_v12 }
 0x403   : > { %v9941_v21 = vadd.f32 %v6204_v54, %v6203_v25  ;;  %v6206_v39 = vpop.f32.mrb[170].mxu0 }
 0x404   : > { %v6207_v26 = vpop.f32.mrb[171].mxu0 }
 0x405   : > { %v9943_v38 = vadd.f32 %v6207_v26, %v6206_v39 }
 0x406   : > { %5578 = vmatmul.mubr.msk.bf16.gmra.mrb[20].mxu0 %vm7823_vm6, %v9755_v52 }
 0x407   : > { %3718 = vmatprep.mubr.bf16.mxu0 %v9759_v9 }
 0x409   : > { %v6209_v36 = vpop.f32.mrb[172].mxu0  ;;  %5702 = vmatmul.mubr.msk.bf16.gmra.mrb[180].mxu1 %vm7823_vm6, %v9799_v63 }
 0x40a   : > { %v6210_v20 = vpop.f32.mrb[173].mxu0  ;;  %4281 = vmatprep.mubr.bf16.mxu1 %v9803_v47 }
 0x40b   : > { %v9953_v19 = vadd.f32 %v6210_v20, %v6209_v36  ;;  %v6212_v11 = vpop.f32.mrb[174].mxu0 }
 0x40c   : > { %v6213_v49 = vpop.f32.mrb[175].mxu0 }
 0x40d   : > { %v9955_v18 = vadd.f32 %v6213_v49, %v6212_v11 }
 0x40e   : > { %5582 = vmatmul.mubr.msk.bf16.gmra.mrb[24].mxu0 %vm7823_vm6, %v9777_v48 }
 0x40f   : > { %3726 = vmatprep.mubr.bf16.mxu0 %v9781_v12 }
 0x411   : > { %v6215_v52 = vpop.f32.mrb[176].mxu0  ;;  %5706 = vmatmul.mubr.msk.bf16.gmra.mrb[184].mxu1 %vm7823_vm6, %v9821_v53 }
 0x412   : > { %v6216_v9 = vpop.f32.mrb[177].mxu0  ;;  %4289 = vmatprep.mubr.bf16.mxu1 %v10686_v45 }
 0x413   : > { %v9964_v17 = vadd.f32 %v6216_v9, %v6215_v52  ;;  %v6218_v51 = vpop.f32.mrb[178].mxu0 }
 0x414   : > { %v6219_v5 = vpop.f32.mrb[179].mxu0 }
 0x415   : > { %v9967_v55 = vadd.f32 %v6219_v5, %v6218_v51 }
 0x416   : > { %5586 = vmatmul.mubr.msk.bf16.gmra.mrb[28].mxu0 %vm7823_vm6, %v9799_v63 }
 0x419   : > { %v6221_v48 = vpop.f32.mrb[180].mxu0  ;;  %4290 = vmatmul.mubr.bf16.gmra.mrb[188].mxu1 %v10686_v45 }
 0x41a   : > { %v6222_v12 = vpop.f32.mrb[181].mxu0  ;;  %6839 = vmatprep.mubr.msk.bf16.mxu1 %vm7809_vm4, %v9314_v42 }
 0x41b   : > { %v9976_v47 = vadd.f32 %v6222_v12, %v6221_v48  ;;  %v6224_v29 = vpop.f32.mrb[182].mxu0 }
 0x41c   : > { %v6225_v34 = vpop.f32.mrb[183].mxu0 }
 0x41d   : > { %v9978_v14 = vadd.f32 %v6225_v34, %v6224_v29 }
 0x421   : > { %v6227_v58 = vpop.f32.mrb[184].mxu0  ;;  %6840 = vmatmul.mubr.msk.bf16.vlgmr.msra.gmra.mrb[96].mxu1 %vm7809_vm4, %v9319_v8 }
 0x422   : > { %v6228_v57 = vpop.f32.mrb[185].mxu0  ;;  %6843 = vmatprep.mubr.msk.bf16.mxu1 %vm7809_vm4, %v9367_v61 }
 0x423   : > { %v9986_v63 = vadd.f32 %v6228_v57, %v6227_v58  ;;  %v6230_v53 = vpop.f32.mrb[186].mxu0 }
 0x424   : > { %v6231_v42 = vpop.f32.mrb[187].mxu0 }
 0x425   : > { %v9988_v33 = vadd.f32 %v6231_v42, %v6230_v53 }
 0x429   : > { %v6233_v3 = vpop.f32.mrb[188].mxu0  ;;  %6844 = vmatmul.mubr.msk.bf16.gmra.mrb[100].mxu1 %vm7809_vm4, %v9372_v37 }
 0x42a   : > { %v6234_v15 = vpop.f32.mrb[189].mxu0  ;;  %6847 = vmatprep.mubr.msk.bf16.mxu1 %vm7809_vm4, %v9421_v35 }
 0x42b   : > { %v9996_v8 = vadd.f32 %v6234_v15, %v6233_v3  ;;  %v6236_v7 = vpop.f32.mrb[190].mxu0 }
 0x42c   : > { %v6237_v61 = vpop.f32.mrb[191].mxu0 }
 0x42d   : > { %v9998_v2 = vadd.f32 %v6237_v61, %v6236_v7 }
 0x431   : > { %v6239_v0 = vpop.f32.mrb[192].mxu0  ;;  %6848 = vmatmul.mubr.msk.bf16.gmra.mrb[104].mxu1 %vm7809_vm4, %v9423_v27 }
 0x432   : > { %v6240_v13 = vpop.f32.mrb[193].mxu0  ;;  %6851 = vmatprep.mubr.msk.bf16.mxu1 %vm7809_vm4, %v9475_v43 }
 0x433   : > { %v10006_v37 = vadd.f32 %v6240_v13, %v6239_v0  ;;  %v6242_v31 = vpop.f32.mrb[194].mxu0 }
 0x434   : > { %v6243_v35 = vpop.f32.mrb[195].mxu0 }
 0x435   : > { %v10008_v24 = vadd.f32 %v6243_v35, %v6242_v31 }
 0x439   : > { %v6245_v32 = vpop.f32.mrb[196].mxu0  ;;  %6852 = vmatmul.mubr.msk.bf16.gmra.mrb[108].mxu1 %vm7809_vm4, %v9478_v46 }
 0x43a   : > { %v6246_v30 = vpop.f32.mrb[197].mxu0  ;;  %6855 = vmatprep.mubr.msk.bf16.mxu1 %vm7809_vm4, %v9533_v50 }
 0x43b   : > { %v10016_v27 = vadd.f32 %v6246_v30, %v6245_v32  ;;  %v6248_v28 = vpop.f32.mrb[198].mxu0 }
 0x43c   : > { %v6249_v43 = vpop.f32.mrb[199].mxu0 }
 0x43d   : > { %v10018_v56 = vadd.f32 %v6249_v43, %v6248_v28 }
 0x441   : > { %v6251_v59 = vpop.f32.mrb[200].mxu0  ;;  %6856 = vmatmul.mubr.msk.bf16.gmra.mrb[112].mxu1 %vm7809_vm4, %v9536_v40 }
 0x442   : > { %v6252_v1 = vpop.f32.mrb[201].mxu0  ;;  %6859 = vmatprep.mubr.msk.bf16.mxu1 %vm7809_vm4, %v9583_v22 }
 0x443   : > { %v10026_v46 = vadd.f32 %v6252_v1, %v6251_v59  ;;  %v6254_v25 = vpop.f32.mrb[202].mxu0 }
 0x444   : > { %v6255_v50 = vpop.f32.mrb[203].mxu0 }
 0x445   : > { %v10028_v54 = vadd.f32 %v6255_v50, %v6254_v25 }
 0x449   : > { %v6257_v39 = vpop.f32.mrb[204].mxu0  ;;  %6860 = vmatmul.mubr.msk.bf16.gmra.mrb[116].mxu1 %vm7809_vm4, %v9588_v4 }
 0x44a   : > { %v6258_v26 = vpop.f32.mrb[205].mxu0  ;;  %6863 = vmatprep.mubr.msk.bf16.mxu1 %vm7809_vm4, %v9625_v16 }
 0x44b   : > { %v10036_v40 = vadd.f32 %v6258_v26, %v6257_v39  ;;  %v6260_v36 = vpop.f32.mrb[206].mxu0 }
 0x44c   : > { %v6261_v22 = vpop.f32.mrb[207].mxu0 }
 0x44d   : > { %v10038_v20 = vadd.f32 %v6261_v22, %v6260_v36 }
 0x451   : > { %v6263_v11 = vpop.f32.mrb[208].mxu0  ;;  %6864 = vmatmul.mubr.msk.bf16.gmra.mrb[120].mxu1 %vm7809_vm4, %v9627_v44 }
 0x452   : > { %v6264_v49 = vpop.f32.mrb[209].mxu0  ;;  %6867 = vmatprep.mubr.msk.bf16.mxu1 %vm7809_vm4, %v9657_v23 }
 0x453   : > { %v10046_v4 = vadd.f32 %v6264_v49, %v6263_v11  ;;  %v6266_v52 = vpop.f32.mrb[210].mxu0 }
 0x454   : > { %v6267_v16 = vpop.f32.mrb[211].mxu0 }
 0x455   : > { %v10048_v9 = vadd.f32 %v6267_v16, %v6266_v52 }
 0x459   : > { %v6269_v51 = vpop.f32.mrb[212].mxu0  ;;  %6868 = vmatmul.mubr.bf16.gmra.mrb[124].mxu1 %v10686_v45 }
 0x45a   : > { %v6270_v5 = vpop.f32.mrb[213].mxu0 }
 0x45b   : > { %v10051_v48 = vadd.f32 %v6270_v5, %v6269_v51  ;;  %v6272_v12 = vpop.f32.mrb[214].mxu0 }
 0x45c   : > { %v6273_v29 = vpop.f32.mrb[215].mxu0 }
 0x45d   : > { %v10053_v44 = vadd.f32 %v6273_v29, %v6272_v12 }
 0x461   : > { %v6275_v34 = vpop.f32.mrb[216].mxu0 }
 0x462   : > { %v6276_v58 = vpop.f32.mrb[217].mxu0 }
 0x463   : > { %v10055_v62 = vadd.f32 %v6276_v58, %v6275_v34  ;;  %v6278_v23 = vpop.f32.mrb[218].mxu0 }
 0x464   : > { %v6279_v57 = vpop.f32.mrb[219].mxu0 }
 0x465   : > { %v10057_v53 = vadd.f32 %v6279_v57, %v6278_v23 }
 0x469   : > { %v6281_v42 = vpop.f32.mrb[220].mxu0 }
 0x46a   : > { %v6282_v3 = vpop.f32.mrb[221].mxu0 }
 0x46b   : > { %v10059_v15 = vadd.f32 %v6282_v3, %v6281_v42  ;;  %v6284_v45 = vpop.f32.mrb[222].mxu0 }
 0x46c   : > { %v6285_v7 = vpop.f32.mrb[223].mxu0 }
 0x46d   : > { %v10061_v61 = vadd.f32 %v6285_v7, %v6284_v45 }
 0x471   : > { %v6327_v0 = vpop.f32.mrb[224].mxu0 }
 0x472   : > { %v6328_v13 = vpop.f32.mrb[225].mxu0 }
 0x473   : > { %v6329_v31 = vadd.f32 %v6328_v13, %v6327_v0  ;;  %v6330_v35 = vpop.f32.mrb[226].mxu0 }
 0x474   : > { %v6331_v32 = vpop.f32.mrb[227].mxu0  ;;  %v6463_v28 = vpop.f32.mrb[128].mxu1 }
 0x475   : > { %v7002_v30 = vadd.f32 %v6329_v31, %v9917_v10  ;;  %v6332_v43 = vadd.f32 %v6331_v32, %v6330_v35  ;;  %v6464_v59 = vpop.f32.mrb[129].mxu1 }
 0x476   : > { %v6465_v1 = vadd.f32 %v6464_v59, %v6463_v28  ;;  %v6466_v50 = vpop.f32.mrb[130].mxu1 }
 0x477   : > { %v7008_v25 = vadd.f32 %v6332_v43, %v9919_v6  ;;  %v6467_v39 = vpop.f32.mrb[131].mxu1 }
 0x478   : > { %v6468_v26 = vadd.f32 %v6467_v39, %v6466_v50  ;;  %v10065_v22 = vadd.f32 %v7002_v30, %v6465_v1 }
 0x479   : > { %v6333_v36 = vpop.f32.mrb[228].mxu0 }
 0x47a   : > { %v6334_v11 = vpop.f32.mrb[229].mxu0  ;;  %v10067_v16 = vadd.f32 %v7008_v25, %v6468_v26 }
 0x47b   : > { %v6335_v49 = vadd.f32 %v6334_v11, %v6333_v36  ;;  %v6336_v52 = vpop.f32.mrb[230].mxu0 }
 0x47c   : > { %v6337_v51 = vpop.f32.mrb[231].mxu0  ;;  %v6469_v5 = vpop.f32.mrb[132].mxu1 }
 0x47d   : > { %v6999_v10 = vadd.f32 %v6335_v49, %v9929_v60  ;;  %v6338_v12 = vadd.f32 %v6337_v51, %v6336_v52  ;;  %v6470_v29 = vpop.f32.mrb[133].mxu1 }
 0x47e   : > { %v6471_v34 = vadd.f32 %v6470_v29, %v6469_v5  ;;  %v6472_v58 = vpop.f32.mrb[134].mxu1 }
 0x47f   : > { %v7005_v6 = vadd.f32 %v6338_v12, %v9931_v41  ;;  %v6473_v23 = vpop.f32.mrb[135].mxu1 }
 0x480   : > { %v6474_v57 = vadd.f32 %v6473_v23, %v6472_v58  ;;  %v10071_v3 = vadd.f32 %v6999_v10, %v6471_v34 }
 0x481   : > { %v6339_v42 = vpop.f32.mrb[232].mxu0 }
 0x482   : > { %v6340_v45 = vpop.f32.mrb[233].mxu0  ;;  %v10073_v13 = vadd.f32 %v7005_v6, %v6474_v57 }
 0x483   : > { %v6341_v7 = vadd.f32 %v6340_v45, %v6339_v42  ;;  %v6342_v0 = vpop.f32.mrb[234].mxu0 }
 0x484   : > { %v6343_v31 = vpop.f32.mrb[235].mxu0  ;;  %v6475_v35 = vpop.f32.mrb[136].mxu1 }
 0x485   : > { %v7014_v60 = vadd.f32 %v6341_v7, %v9941_v21  ;;  %v6344_v32 = vadd.f32 %v6343_v31, %v6342_v0  ;;  %v6476_v30 = vpop.f32.mrb[137].mxu1 }
 0x486   : > { %v6477_v28 = vadd.f32 %v6476_v30, %v6475_v35  ;;  %v6478_v43 = vpop.f32.mrb[138].mxu1 }
 0x487   : > { %v7020_v41 = vadd.f32 %v6344_v32, %v9943_v38  ;;  %v6479_v59 = vpop.f32.mrb[139].mxu1 }
 0x488   : > { %v6480_v1 = vadd.f32 %v6479_v59, %v6478_v43  ;;  %v10077_v50 = vadd.f32 %v7014_v60, %v6477_v28 }
 0x489   : > { %v6345_v25 = vpop.f32.mrb[236].mxu0 }
 0x48a   : > { %v6346_v39 = vpop.f32.mrb[237].mxu0  ;;  %v10079_v11 = vadd.f32 %v7020_v41, %v6480_v1 }
 0x48b   : > { %v6347_v26 = vadd.f32 %v6346_v39, %v6345_v25  ;;  %v6348_v36 = vpop.f32.mrb[238].mxu0 }
 0x48c   : > { %v6349_v49 = vpop.f32.mrb[239].mxu0  ;;  %v6481_v52 = vpop.f32.mrb[140].mxu1 }
 0x48d   : > { %v7011_v21 = vadd.f32 %v6347_v26, %v9953_v19  ;;  %v6350_v51 = vadd.f32 %v6349_v49, %v6348_v36  ;;  %v6482_v10 = vpop.f32.mrb[141].mxu1 }
 0x48e   : > { %v6483_v5 = vadd.f32 %v6482_v10, %v6481_v52  ;;  %v6484_v12 = vpop.f32.mrb[142].mxu1 }
 0x48f   : > { %v7017_v38 = vadd.f32 %v6350_v51, %v9955_v18  ;;  %v6485_v29 = vpop.f32.mrb[143].mxu1 }
 0x490   : > { %v6486_v34 = vadd.f32 %v6485_v29, %v6484_v12  ;;  %v10083_v58 = vadd.f32 %v7011_v21, %v6483_v5 }
 0x491   : > { %v6351_v6 = vpop.f32.mrb[240].mxu0 }
 0x492   : > { %v6352_v23 = vpop.f32.mrb[241].mxu0  ;;  %v10085_v45 = vadd.f32 %v7017_v38, %v6486_v34 }
 0x493   : > { %v6353_v57 = vadd.f32 %v6352_v23, %v6351_v6  ;;  %v6354_v42 = vpop.f32.mrb[242].mxu0 }
 0x494   : > { %v6355_v7 = vpop.f32.mrb[243].mxu0  ;;  %v6487_v0 = vpop.f32.mrb[144].mxu1 }
 0x495   : > { %v7026_v19 = vadd.f32 %v6353_v57, %v9964_v17  ;;  %v6356_v31 = vadd.f32 %v6355_v7, %v6354_v42  ;;  %v6488_v60 = vpop.f32.mrb[145].mxu1 }
 0x496   : > { %v6489_v35 = vadd.f32 %v6488_v60, %v6487_v0  ;;  %v6490_v32 = vpop.f32.mrb[146].mxu1 }
 0x497   : > { %v7032_v18 = vadd.f32 %v6356_v31, %v9967_v55  ;;  %v6491_v30 = vpop.f32.mrb[147].mxu1 }
 0x498   : > { %v6492_v28 = vadd.f32 %v6491_v30, %v6490_v32  ;;  %v10089_v43 = vadd.f32 %v7026_v19, %v6489_v35 }
 0x499   : > { %v6357_v41 = vpop.f32.mrb[244].mxu0 }
 0x49a   : > { %v6358_v59 = vpop.f32.mrb[245].mxu0  ;;  %v10091_v39 = vadd.f32 %v7032_v18, %v6492_v28 }
 0x49b   : > { %v6359_v1 = vadd.f32 %v6358_v59, %v6357_v41  ;;  %v6360_v25 = vpop.f32.mrb[246].mxu0 }
 0x49c   : > { %v6361_v26 = vpop.f32.mrb[247].mxu0  ;;  %v6493_v36 = vpop.f32.mrb[148].mxu1 }
 0x49d   : > { %v7023_v17 = vadd.f32 %v6359_v1, %v9976_v47  ;;  %v6362_v49 = vadd.f32 %v6361_v26, %v6360_v25  ;;  %v6494_v21 = vpop.f32.mrb[149].mxu1 }
 0x49e   : > { %v6495_v52 = vadd.f32 %v6494_v21, %v6493_v36  ;;  %v6496_v51 = vpop.f32.mrb[150].mxu1 }
 0x49f   : > { %v7029_v55 = vadd.f32 %v6362_v49, %v9978_v14  ;;  %v6497_v10 = vpop.f32.mrb[151].mxu1 }
 0x4a0   : > { %v6498_v5 = vadd.f32 %v6497_v10, %v6496_v51  ;;  %v10095_v12 = vadd.f32 %v7023_v17, %v6495_v52 }
 0x4a1   : > { %v6363_v38 = vpop.f32.mrb[248].mxu0 }
 0x4a2   : > { %v6364_v29 = vpop.f32.mrb[249].mxu0  ;;  %v10097_v23 = vadd.f32 %v7029_v55, %v6498_v5 }
 0x4a3   : > { %v6365_v34 = vadd.f32 %v6364_v29, %v6363_v38  ;;  %v6366_v6 = vpop.f32.mrb[250].mxu0 }
 0x4a4   : > { %v6367_v57 = vpop.f32.mrb[251].mxu0  ;;  %v6499_v42 = vpop.f32.mrb[152].mxu1 }
 0x4a5   : > { %v7038_v47 = vadd.f32 %v6365_v34, %v9986_v63  ;;  %v6368_v7 = vadd.f32 %v6367_v57, %v6366_v6  ;;  %v6500_v19 = vpop.f32.mrb[153].mxu1 }
 0x4a6   : > { %v6501_v0 = vadd.f32 %v6500_v19, %v6499_v42  ;;  %v6502_v31 = vpop.f32.mrb[154].mxu1 }
 0x4a7   : > { %v7044_v14 = vadd.f32 %v6368_v7, %v9988_v33  ;;  %v6503_v60 = vpop.f32.mrb[155].mxu1 }
 0x4a8   : > { %v6504_v35 = vadd.f32 %v6503_v60, %v6502_v31  ;;  %v10101_v32 = vadd.f32 %v7038_v47, %v6501_v0 }
 0x4a9   : > { %v6369_v18 = vpop.f32.mrb[252].mxu0 }
 0x4aa   : > { %v6370_v30 = vpop.f32.mrb[253].mxu0  ;;  %v10103_v59 = vadd.f32 %v7044_v14, %v6504_v35 }
 0x4ab   : > { %v6371_v28 = vadd.f32 %v6370_v30, %v6369_v18  ;;  %v6372_v41 = vpop.f32.mrb[254].mxu0 }
 0x4ac   : > { %v6373_v1 = vpop.f32.mrb[255].mxu0  ;;  %v6505_v25 = vpop.f32.mrb[156].mxu1 }
 0x4ad   : > { %v7035_v63 = vadd.f32 %v6371_v28, %v9996_v8  ;;  %v6374_v26 = vadd.f32 %v6373_v1, %v6372_v41  ;;  %v6506_v17 = vpop.f32.mrb[157].mxu1 }
 0x4ae   : > { %v6507_v36 = vadd.f32 %v6506_v17, %v6505_v25  ;;  %v6508_v49 = vpop.f32.mrb[158].mxu1 }
 0x4af   : > { %v7041_v33 = vadd.f32 %v6374_v26, %v9998_v2  ;;  %v6509_v21 = vpop.f32.mrb[159].mxu1 }
 0x4b0   : > { %v6510_v52 = vadd.f32 %v6509_v21, %v6508_v49  ;;  %v10107_v51 = vadd.f32 %v7035_v63, %v6507_v36 }
 0x4b1   : > { %v6375_v55 = vpop.f32.mrb[0].mxu0 }
 0x4b2   : > { %v6376_v10 = vpop.f32.mrb[1].mxu0  ;;  %v10109_v29 = vadd.f32 %v7041_v33, %v6510_v52 }
 0x4b3   : > { %v6377_v5 = vadd.f32 %v6376_v10, %v6375_v55  ;;  %v6378_v38 = vpop.f32.mrb[2].mxu0 }
 0x4b4   : > { %v6379_v34 = vpop.f32.mrb[3].mxu0  ;;  %v6511_v6 = vpop.f32.mrb[160].mxu1 }
 0x4b5   : > { %v7050_v8 = vadd.f32 %v6377_v5, %v10006_v37  ;;  %v6380_v57 = vadd.f32 %v6379_v34, %v6378_v38  ;;  %v6512_v47 = vpop.f32.mrb[161].mxu1 }
 0x4b6   : > { %v6513_v42 = vadd.f32 %v6512_v47, %v6511_v6  ;;  %v6514_v7 = vpop.f32.mrb[162].mxu1 }
 0x4b7   : > { %v7056_v2 = vadd.f32 %v6380_v57, %v10008_v24  ;;  %v6515_v19 = vpop.f32.mrb[163].mxu1 }
 0x4b8   : > { %v6516_v0 = vadd.f32 %v6515_v19, %v6514_v7  ;;  %v10113_v31 = vadd.f32 %v7050_v8, %v6513_v42 }
 0x4b9   : > { %v6381_v14 = vpop.f32.mrb[4].mxu0 }
 0x4ba   : > { %v6382_v60 = vpop.f32.mrb[5].mxu0  ;;  %v10115_v30 = vadd.f32 %v7056_v2, %v6516_v0 }
 0x4bb   : > { %v6383_v35 = vadd.f32 %v6382_v60, %v6381_v14  ;;  %v6384_v18 = vpop.f32.mrb[6].mxu0 }
 0x4bc   : > { %v6385_v28 = vpop.f32.mrb[7].mxu0  ;;  %v6517_v41 = vpop.f32.mrb[164].mxu1 }
 0x4bd   : > { %v7047_v37 = vadd.f32 %v6383_v35, %v10016_v27  ;;  %v6386_v1 = vadd.f32 %v6385_v28, %v6384_v18  ;;  %v6518_v63 = vpop.f32.mrb[165].mxu1 }
 0x4be   : > { %v6519_v25 = vadd.f32 %v6518_v63, %v6517_v41  ;;  %v6520_v26 = vpop.f32.mrb[166].mxu1 }
 0x4bf   : > { %v7053_v24 = vadd.f32 %v6386_v1, %v10018_v56  ;;  %v6521_v17 = vpop.f32.mrb[167].mxu1 }
 0x4c0   : > { %v6522_v36 = vadd.f32 %v6521_v17, %v6520_v26  ;;  %v10119_v49 = vadd.f32 %v7047_v37, %v6519_v25 }
 0x4c1   : > { %v6387_v33 = vpop.f32.mrb[8].mxu0 }
 0x4c2   : > { %v6388_v21 = vpop.f32.mrb[9].mxu0  ;;  %v10121_v10 = vadd.f32 %v7053_v24, %v6522_v36 }
 0x4c3   : > { %v6389_v52 = vadd.f32 %v6388_v21, %v6387_v33  ;;  %v6390_v55 = vpop.f32.mrb[10].mxu0 }
 0x4c4   : > { %v6391_v5 = vpop.f32.mrb[11].mxu0  ;;  %v6523_v38 = vpop.f32.mrb[168].mxu1 }
 0x4c5   : > { %v7062_v27 = vadd.f32 %v6389_v52, %v10026_v46  ;;  %v6392_v34 = vadd.f32 %v6391_v5, %v6390_v55  ;;  %v6524_v8 = vpop.f32.mrb[169].mxu1 }
 0x4c6   : > { %v6525_v6 = vadd.f32 %v6524_v8, %v6523_v38  ;;  %v6526_v57 = vpop.f32.mrb[170].mxu1 }
 0x4c7   : > { %v7068_v56 = vadd.f32 %v6392_v34, %v10028_v54  ;;  %v6527_v47 = vpop.f32.mrb[171].mxu1 }
 0x4c8   : > { %v6528_v42 = vadd.f32 %v6527_v47, %v6526_v57  ;;  %v10125_v7 = vadd.f32 %v7062_v27, %v6525_v6 }
 0x4c9   : > { %v6393_v2 = vpop.f32.mrb[12].mxu0 }
 0x4ca   : > { %v6394_v19 = vpop.f32.mrb[13].mxu0  ;;  %v10127_v60 = vadd.f32 %v7068_v56, %v6528_v42 }
 0x4cb   : > { %v6395_v0 = vadd.f32 %v6394_v19, %v6393_v2  ;;  %v6396_v14 = vpop.f32.mrb[14].mxu0 }
 0x4cc   : > { %v6397_v35 = vpop.f32.mrb[15].mxu0  ;;  %v6529_v18 = vpop.f32.mrb[172].mxu1 }
 0x4cd   : > { %v7059_v46 = vadd.f32 %v6395_v0, %v10036_v40  ;;  %v6398_v28 = vadd.f32 %v6397_v35, %v6396_v14  ;;  %v6530_v37 = vpop.f32.mrb[173].mxu1 }
 0x4ce   : > { %v6531_v41 = vadd.f32 %v6530_v37, %v6529_v18  ;;  %v6532_v1 = vpop.f32.mrb[174].mxu1 }
 0x4cf   : > { %v7065_v54 = vadd.f32 %v6398_v28, %v10038_v20  ;;  %v6533_v63 = vpop.f32.mrb[175].mxu1 }
 0x4d0   : > { %v6534_v25 = vadd.f32 %v6533_v63, %v6532_v1  ;;  %v10131_v26 = vadd.f32 %v7059_v46, %v6531_v41 }
 0x4d1   : > { %v6399_v24 = vpop.f32.mrb[16].mxu0 }
 0x4d2   : > { %v6400_v17 = vpop.f32.mrb[17].mxu0  ;;  %v10133_v21 = vadd.f32 %v7065_v54, %v6534_v25 }
 0x4d3   : > { %v6401_v36 = vadd.f32 %v6400_v17, %v6399_v24  ;;  %v6402_v33 = vpop.f32.mrb[18].mxu0 }
 0x4d4   : > { %v6403_v52 = vpop.f32.mrb[19].mxu0  ;;  %v6535_v55 = vpop.f32.mrb[176].mxu1 }
 0x4d5   : > { %v7074_v40 = vadd.f32 %v6401_v36, %v10046_v4  ;;  %v6404_v5 = vadd.f32 %v6403_v52, %v6402_v33  ;;  %v6536_v27 = vpop.f32.mrb[177].mxu1 }
 0x4d6   : > { %v6537_v38 = vadd.f32 %v6536_v27, %v6535_v55  ;;  %v6538_v34 = vpop.f32.mrb[178].mxu1 }
 0x4d7   : > { %v7080_v20 = vadd.f32 %v6404_v5, %v10048_v9  ;;  %v6539_v8 = vpop.f32.mrb[179].mxu1 }
 0x4d8   : > { %v6540_v6 = vadd.f32 %v6539_v8, %v6538_v34  ;;  %v10137_v57 = vadd.f32 %v7074_v40, %v6537_v38 }
 0x4d9   : > { %v6405_v56 = vpop.f32.mrb[20].mxu0 }
 0x4da   : > { %v6406_v47 = vpop.f32.mrb[21].mxu0  ;;  %v10139_v19 = vadd.f32 %v7080_v20, %v6540_v6 }
 0x4db   : > { %v6407_v42 = vadd.f32 %v6406_v47, %v6405_v56  ;;  %v6408_v2 = vpop.f32.mrb[22].mxu0 }
 0x4dc   : > { %v6409_v0 = vpop.f32.mrb[23].mxu0  ;;  %v6541_v14 = vpop.f32.mrb[180].mxu1 }
 0x4dd   : > { %v7071_v4 = vadd.f32 %v6407_v42, %v10051_v48  ;;  %v6410_v35 = vadd.f32 %v6409_v0, %v6408_v2  ;;  %v6542_v46 = vpop.f32.mrb[181].mxu1 }
 0x4de   : > { %v6543_v18 = vadd.f32 %v6542_v46, %v6541_v14  ;;  %v6544_v28 = vpop.f32.mrb[182].mxu1 }
 0x4df   : > { %v7077_v9 = vadd.f32 %v6410_v35, %v10053_v44  ;;  %v6545_v37 = vpop.f32.mrb[183].mxu1 }
 0x4e0   : > { %v6546_v41 = vadd.f32 %v6545_v37, %v6544_v28  ;;  %v10143_v1 = vadd.f32 %v7071_v4, %v6543_v18 }
 0x4e1   : > { %v6411_v54 = vpop.f32.mrb[24].mxu0 }
 0x4e2   : > { %v6412_v63 = vpop.f32.mrb[25].mxu0  ;;  %v10145_v17 = vadd.f32 %v7077_v9, %v6546_v41 }
 0x4e3   : > { %v6413_v25 = vadd.f32 %v6412_v63, %v6411_v54  ;;  %v6414_v24 = vpop.f32.mrb[26].mxu0 }
 0x4e4   : > { %v6415_v36 = vpop.f32.mrb[27].mxu0  ;;  %v6547_v33 = vpop.f32.mrb[184].mxu1 }
 0x4e5   : > { %v7086_v48 = vadd.f32 %v6413_v25, %v10055_v62  ;;  %v6416_v52 = vadd.f32 %v6415_v36, %v6414_v24  ;;  %v6548_v40 = vpop.f32.mrb[185].mxu1 }
 0x4e6   : > { %v6549_v55 = vadd.f32 %v6548_v40, %v6547_v33  ;;  %v6550_v5 = vpop.f32.mrb[186].mxu1 }
 0x4e7   : > { %v7092_v44 = vadd.f32 %v6416_v52, %v10057_v53  ;;  %v6551_v27 = vpop.f32.mrb[187].mxu1 }
 0x4e8   : > { %v6552_v38 = vadd.f32 %v6551_v27, %v6550_v5  ;;  %v10149_v34 = vadd.f32 %v7086_v48, %v6549_v55 }
 0x4e9   : > { %v6417_v20 = vpop.f32.mrb[28].mxu0 }
 0x4ea   : > { %v6418_v8 = vpop.f32.mrb[29].mxu0  ;;  %v10151_v47 = vadd.f32 %v7092_v44, %v6552_v38 }
 0x4eb   : > { %v6419_v6 = vadd.f32 %v6418_v8, %v6417_v20  ;;  %v6420_v56 = vpop.f32.mrb[30].mxu0 }
 0x4ec   : > { %v6421_v42 = vpop.f32.mrb[31].mxu0  ;;  %v6553_v2 = vpop.f32.mrb[188].mxu1 }
 0x4ed   : > { %v7083_v62 = vadd.f32 %v6419_v6, %v10059_v15  ;;  %v6422_v0 = vadd.f32 %v6421_v42, %v6420_v56  ;;  %v6554_v4 = vpop.f32.mrb[189].mxu1 }
 0x4ee   : > { %v6555_v14 = vadd.f32 %v6554_v4, %v6553_v2  ;;  %v6556_v35 = vpop.f32.mrb[190].mxu1 }
 0x4ef   : > { %v7089_v53 = vadd.f32 %v6422_v0, %v10061_v61  ;;  %v6557_v46 = vpop.f32.mrb[191].mxu1 }
 0x4f0   : > { %v6558_v18 = vadd.f32 %v6557_v46, %v6556_v35  ;;  %v10155_v9 = vadd.f32 %v7083_v62, %v6555_v14 }
 0x4f2   : > { %v10157_v28 = vadd.f32 %v7089_v53, %v6558_v18 }
 0x4f4   : > { %v6841_v37 = vpop.f32.mrb[96].mxu1 }
 0x4f5   : > { %v10160_v41 = vadd.f32 %v10071_v3, %v6841_v37  ;;  %v4332_v54 = vpop.f32.mrb[97].mxu1 }
 0x4f6   : > { %v10163_v15 = vadd.f32 %v10065_v22, %v4332_v54  ;;  %v6842_v63 = vpop.f32.mrb[98].mxu1 }
 0x4f7   : > { %v10166_v25 = vadd.f32 %v10073_v13, %v6842_v63  ;;  %v4335_v61 = vpop.f32.mrb[99].mxu1 }
 0x4f8   : > { %v10169_v24 = vadd.f32 %v10067_v16, %v4335_v61 }
 0x4fa   : > { %v4491_v36 = vadd.f32 %v10169_v24, %v10163_v15 }
 0x4fc   : > { %v4492_v48 = vadd.f32 %v10160_v41, %v4491_v36  ;;  %v6845_v33 = vpop.f32.mrb[100].mxu1 }
 0x4fd   : > { %v10175_v3 = vadd.f32 %v10083_v58, %v6845_v33  ;;  %v4348_v52 = vpop.f32.mrb[101].mxu1 }
 0x4fe   : > { %v10178_v22 = vadd.f32 %v10077_v50, %v4348_v52  ;;  %v4493_v13 = vadd.f32 %v10166_v25, %v4492_v48  ;;  %v6846_v40 = vpop.f32.mrb[102].mxu1 }
 0x4ff   : > { %v10182_v55 = vadd.f32 %v10085_v45, %v6846_v40  ;;  %v4351_v16 = vpop.f32.mrb[103].mxu1 }
 0x500   : > { %v4494_v44 = vadd.f32 %v10178_v22, %v4493_v13  ;;  %v10186_v5 = vadd.f32 %v10079_v11, %v4351_v16 }
 0x502   : > { %v4495_v27 = vadd.f32 %v10186_v5, %v4494_v44 }
 0x504   : > { %v4496_v58 = vadd.f32 %v10175_v3, %v4495_v27  ;;  %v6849_v38 = vpop.f32.mrb[104].mxu1 }
 0x505   : > { %v10191_v50 = vadd.f32 %v10095_v12, %v6849_v38  ;;  %v4364_v20 = vpop.f32.mrb[105].mxu1 }
 0x506   : > { %v10194_v8 = vadd.f32 %v10089_v43, %v4364_v20  ;;  %v4497_v45 = vadd.f32 %v10182_v55, %v4496_v58  ;;  %v6850_v6 = vpop.f32.mrb[106].mxu1 }
 0x507   : > { %v10198_v56 = vadd.f32 %v10097_v23, %v6850_v6  ;;  %v4367_v11 = vpop.f32.mrb[107].mxu1 }
 0x508   : > { %v4498_v42 = vadd.f32 %v10194_v8, %v4497_v45  ;;  %v10202_v62 = vadd.f32 %v10091_v39, %v4367_v11 }
 0x50a   : > { %v4499_v2 = vadd.f32 %v10202_v62, %v4498_v42 }
 0x50c   : > { %v4500_v12 = vadd.f32 %v10191_v50, %v4499_v2  ;;  %v6853_v0 = vpop.f32.mrb[108].mxu1 }
 0x50d   : > { %v10207_v43 = vadd.f32 %v10107_v51, %v6853_v0  ;;  %v4380_v4 = vpop.f32.mrb[109].mxu1 }
 0x50e   : > { %v10210_v14 = vadd.f32 %v10101_v32, %v4380_v4  ;;  %v4501_v23 = vadd.f32 %v10198_v56, %v4500_v12  ;;  %v6854_v53 = vpop.f32.mrb[110].mxu1 }
 0x50f   : > { %v10214_v35 = vadd.f32 %v10109_v29, %v6854_v53  ;;  %v4383_v39 = vpop.f32.mrb[111].mxu1 }
 0x510   : > { %v4502_v46 = vadd.f32 %v10210_v14, %v4501_v23  ;;  %v10218_v18 = vadd.f32 %v10103_v59, %v4383_v39 }
 0x512   : > { %v4503_v37 = vadd.f32 %v10218_v18, %v4502_v46 }
 0x514   : > { %v4504_v51 = vadd.f32 %v10207_v43, %v4503_v37  ;;  %v6857_v54 = vpop.f32.mrb[112].mxu1 }
 0x515   : > { %v10223_v32 = vadd.f32 %v10119_v49, %v6857_v54  ;;  %v4396_v63 = vpop.f32.mrb[113].mxu1 }
 0x516   : > { %v7052_v61 = vadd.f32 %v10113_v31, %v4396_v63  ;;  %v4505_v29 = vadd.f32 %v10214_v35, %v4504_v51  ;;  %v6858_v36 = vpop.f32.mrb[114].mxu1 }
 0x517   : > { %v7055_v48 = vadd.f32 %v10121_v10, %v6858_v36  ;;  %v4399_v33 = vpop.f32.mrb[115].mxu1 }
 0x518   : > { %v4506_v52 = vadd.f32 %v7052_v61, %v4505_v29  ;;  %v7058_v59 = vadd.f32 %v10115_v30, %v4399_v33 }
 0x51a   : > { %v4507_v13 = vadd.f32 %v7058_v59, %v4506_v52 }
 0x51c   : > { %v4508_v40 = vadd.f32 %v10223_v32, %v4507_v13  ;;  %v6861_v16 = vpop.f32.mrb[116].mxu1 }
 0x51d   : > { %v7061_v44 = vadd.f32 %v10131_v26, %v6861_v16  ;;  %v4412_v49 = vpop.f32.mrb[117].mxu1 }
 0x51e   : > { %v7064_v27 = vadd.f32 %v10125_v7, %v4412_v49  ;;  %v4509_v58 = vadd.f32 %v7055_v48, %v4508_v40  ;;  %v6862_v31 = vpop.f32.mrb[118].mxu1 }
 0x51f   : > { %v7067_v38 = vadd.f32 %v10133_v21, %v6862_v31  ;;  %v4415_v20 = vpop.f32.mrb[119].mxu1 }
 0x520   : > { %v4510_v45 = vadd.f32 %v7064_v27, %v4509_v58  ;;  %v7070_v10 = vadd.f32 %v10127_v60, %v4415_v20 }
 0x522   : > { %v4511_v6 = vadd.f32 %v7070_v10, %v4510_v45 }
 0x524   : > { %v4512_v11 = vadd.f32 %v7061_v44, %v4511_v6  ;;  %v6865_v30 = vpop.f32.mrb[120].mxu1 }
 0x525   : > { %v7073_v42 = vadd.f32 %v10143_v1, %v6865_v30  ;;  %v4428_v2 = vpop.f32.mrb[121].mxu1 }
 0x526   : > { %v7076_v12 = vadd.f32 %v10137_v57, %v4428_v2  ;;  %v4513_v26 = vadd.f32 %v7067_v38, %v4512_v11  ;;  %v6866_v0 = vpop.f32.mrb[122].mxu1 }
 0x527   : > { %v7079_v7 = vadd.f32 %v10145_v17, %v6866_v0  ;;  %v4431_v4 = vpop.f32.mrb[123].mxu1 }
 0x528   : > { %v4514_v23 = vadd.f32 %v7076_v12, %v4513_v26  ;;  %v7082_v21 = vadd.f32 %v10139_v19, %v4431_v4 }
 0x52a   : > { %v4515_v53 = vadd.f32 %v7082_v21, %v4514_v23 }
 0x52c   : > { %v4516_v39 = vadd.f32 %v7073_v42, %v4515_v53  ;;  %v6869_v46 = vpop.f32.mrb[124].mxu1 }
 0x52d   : > { %v7085_v60 = vadd.f32 %v10155_v9, %v6869_v46  ;;  %v4444_v37 = vpop.f32.mrb[125].mxu1 }
 0x52e   : > { %v7088_v51 = vadd.f32 %v10149_v34, %v4444_v37  ;;  %v4517_v1 = vadd.f32 %v7079_v7, %v4516_v39  ;;  %v6870_v54 = vpop.f32.mrb[126].mxu1 }
 0x52f   : > { %v7091_v57 = vadd.f32 %v10157_v28, %v6870_v54  ;;  %v4447_v63 = vpop.f32.mrb[127].mxu1 }
 0x530   : > { %v4518_v29 = vadd.f32 %v7088_v51, %v4517_v1  ;;  %v7094_v17 = vadd.f32 %v10151_v47, %v4447_v63 }
 0x532   : > { %v4519_v36 = vadd.f32 %v7094_v17, %v4518_v29 }
 0x534   : > { %v4520_v33 = vadd.f32 %v7085_v60, %v4519_v36 }
 0x536   : > { %v4521_v52 = vadd.f32 %v7091_v57, %v4520_v33 }
 0x538   : > { %v4522_v19 = vrot.slane %v4521_v52, 4 }
 0x53a   : > { %v4523_v13 = vadd.f32 %v4522_v19, %v4521_v52 }
 0x53c   : > { %v4524_v40 = vrot.slane %v4523_v13, 2 }
 0x53e   : > { %v4525_v16 = vadd.f32 %v4524_v40, %v4523_v13 }
 0x540   : > { %v4526_v49 = vrot.slane %v4525_v16, 1 }
 0x542   : > { %v4527_v9 = vadd.f32 %v4526_v49, %v4525_v16 }
 0x544   : > { %v4528_v58 = vmul.f32 0.00390625, %v4527_v9 }
 0x546   : > { %v10243_v34 = vsub.f32 %v10194_v8, %v4528_v58  ;;  %v10246_v31 = vsub.f32 %v10202_v62, %v4528_v58  ;;  %v10249_v28 = vsub.f32 %v10191_v50, %v4528_v58  ;;  %v10252_v47 = vsub.f32 %v10198_v56, %v4528_v58 }
 0x547   : > { %v10255_v20 = vsub.f32 %v10210_v14, %v4528_v58  ;;  %v10258_v45 = vsub.f32 %v10218_v18, %v4528_v58  ;;  %v10261_v6 = vsub.f32 %v10207_v43, %v4528_v58  ;;  %v10264_v8 = vsub.f32 %v10214_v35, %v4528_v58 }
 0x548   : > { %v10266_v62 = vsub.f32 %v7052_v61, %v4528_v58  ;;  %v10268_v11 = vsub.f32 %v7058_v59, %v4528_v58  ;;  %v10271_v50 = vsub.f32 %v10223_v32, %v4528_v58  ;;  %v10273_v56 = vsub.f32 %v7055_v48, %v4528_v58 }
 0x549   : > { %v10275_v14 = vsub.f32 %v7064_v27, %v4528_v58  ;;  %v10277_v30 = vsub.f32 %v7070_v10, %v4528_v58  ;;  %v10279_v18 = vsub.f32 %v7061_v44, %v4528_v58  ;;  %v10281_v43 = vsub.f32 %v7067_v38, %v4528_v58 }
 0x54a   : > { %v10283_v2 = vsub.f32 %v7076_v12, %v4528_v58  ;;  %v10285_v35 = vsub.f32 %v7082_v21, %v4528_v58  ;;  %v10287_v61 = vsub.f32 %v7073_v42, %v4528_v58  ;;  %v10289_v59 = vsub.f32 %v7079_v7, %v4528_v58 }
 0x54b   : > { %v10291_v32 = vsub.f32 %v7088_v51, %v4528_v58  ;;  %v10293_v48 = vsub.f32 %v7094_v17, %v4528_v58  ;;  %v10295_v27 = vsub.f32 %v7085_v60, %v4528_v58  ;;  %v10297_v10 = vsub.f32 %v7091_v57, %v4528_v58 }
 0x54c   : > { %v10300_v44 = vsub.f32 %v10163_v15, %v4528_v58  ;;  %v10303_v38 = vsub.f32 %v10169_v24, %v4528_v58  ;;  %v10306_v12 = vsub.f32 %v10160_v41, %v4528_v58  ;;  %v10313_v0 = vsub.f32 %v10166_v25, %v4528_v58 }
 0x54d   : > { %v10316_v7 = vsub.f32 %v10178_v22, %v4528_v58  ;;  %v10321_v4 = vsub.f32 %v10186_v5, %v4528_v58  ;;  %v10326_v21 = vsub.f32 %v10175_v3, %v4528_v58  ;;  %v10331_v22 = vsub.f32 %v10182_v55, %v4528_v58 }
 0x54e   : > { %v4561_v42 = vmul.f32 %v10300_v44, %v10300_v44  ;;  %v4562_v26 = vmul.f32 %v10303_v38, %v10303_v38  ;;  %v4563_v15 = vmul.f32 %v10306_v12, %v10306_v12  ;;  %v4564_v41 = vmul.f32 %v10313_v0, %v10313_v0 }
 0x54f   : > { %v4565_v25 = vmul.f32 %v10316_v7, %v10316_v7  ;;  %v4566_v39 = vmul.f32 %v10321_v4, %v10321_v4  ;;  %v4567_v5 = vmul.f32 %v10326_v21, %v10326_v21  ;;  %v4568_v37 = vmul.f32 %v10331_v22, %v10331_v22 }
 0x550   : > { %v4593_v24 = vadd.f32 %v4562_v26, %v4561_v42  ;;  %v4569_v51 = vmul.f32 %v10243_v34, %v10243_v34  ;;  %v4570_v55 = vmul.f32 %v10246_v31, %v10246_v31  ;;  %v4571_v57 = vmul.f32 %v10249_v28, %v10249_v28 }
 0x551   : > { %v4572_v29 = vmul.f32 %v10252_v47, %v10252_v47  ;;  %v4573_v36 = vmul.f32 %v10255_v20, %v10255_v20  ;;  %v4574_v52 = vmul.f32 %v10258_v45, %v10258_v45  ;;  %v4575_v13 = vmul.f32 %v10261_v6, %v10261_v6 }
 0x552   : > { %v4594_v23 = vadd.f32 %v4593_v24, %v4563_v15  ;;  %v4576_v16 = vmul.f32 %v10264_v8, %v10264_v8  ;;  %v4577_v9 = vmul.f32 %v10266_v62, %v10266_v62  ;;  %v4578_v42 = vmul.f32 %v10268_v11, %v10268_v11 }
 0x553   : > { %v4579_v15 = vmul.f32 %v10271_v50, %v10271_v50 }
 0x554   : > { %v4595_v53 = vadd.f32 %v4594_v23, %v4564_v41  ;;  %v4580_v41 = vmul.f32 %v10273_v56, %v10273_v56 }
 0x556   : > { %v4596_v46 = vadd.f32 %v4595_v53, %v4565_v25  ;;  %v4581_v25 = vmul.f32 %v10275_v14, %v10275_v14 }
 0x558   : > { %v4597_v60 = vadd.f32 %v4596_v46, %v4566_v39  ;;  %v4582_v39 = vmul.f32 %v10277_v30, %v10277_v30 }
 0x55a   : > { %v4598_v3 = vadd.f32 %v4597_v60, %v4567_v5  ;;  %v4583_v5 = vmul.f32 %v10279_v18, %v10279_v18 }
 0x55c   : > { %v4599_v1 = vadd.f32 %v4598_v3, %v4568_v37  ;;  %v4584_v37 = vmul.f32 %v10281_v43, %v10281_v43 }
 0x55e   : > { %v4600_v54 = vadd.f32 %v4599_v1, %v4569_v51  ;;  %v4585_v51 = vmul.f32 %v10283_v2, %v10283_v2 }
 0x560   : > { %v4601_v63 = vadd.f32 %v4600_v54, %v4570_v55  ;;  %v4586_v55 = vmul.f32 %v10285_v35, %v10285_v35 }
 0x562   : > { %v4602_v17 = vadd.f32 %v4601_v63, %v4571_v57  ;;  %v4587_v57 = vmul.f32 %v10287_v61, %v10287_v61 }
 0x564   : > { %v4603_v33 = vadd.f32 %v4602_v17, %v4572_v29  ;;  %v4588_v29 = vmul.f32 %v10289_v59, %v10289_v59 }
 0x566   : > { %v4604_v19 = vadd.f32 %v4603_v33, %v4573_v36  ;;  %v4589_v36 = vmul.f32 %v10291_v32, %v10291_v32 }
 0x568   : > { %v4605_v40 = vadd.f32 %v4604_v19, %v4574_v52  ;;  %v4590_v52 = vmul.f32 %v10293_v48, %v10293_v48 }
 0x56a   : > { %v4606_v49 = vadd.f32 %v4605_v40, %v4575_v13  ;;  %v4591_v13 = vmul.f32 %v10295_v27, %v10295_v27 }
 0x56c   : > { %v4607_v58 = vadd.f32 %v4606_v49, %v4576_v16  ;;  %v4592_v16 = vmul.f32 %v10297_v10, %v10297_v10 }
 0x56e   : > { %v4608_v26 = vadd.f32 %v4607_v58, %v4577_v9 }
 0x570   : > { %v4609_v24 = vadd.f32 %v4608_v26, %v4578_v42 }
 0x572   : > { %v4610_v23 = vadd.f32 %v4609_v24, %v4579_v15 }
 0x574   : > { %v4611_v53 = vadd.f32 %v4610_v23, %v4580_v41 }
 0x576   : > { %v4612_v46 = vadd.f32 %v4611_v53, %v4581_v25 }
 0x578   : > { %v4613_v60 = vadd.f32 %v4612_v46, %v4582_v39  ;;  %v4694_v39 = vld [vmem:[%s7784_s30 + $0xe8] sm:$0xff] }
 0x57a   : > { %v4614_v3 = vadd.f32 %v4613_v60, %v4583_v5 }
 0x57c   : > { %v4615_v1 = vadd.f32 %v4614_v3, %v4584_v37 }
 0x57e   : > { %v4616_v54 = vadd.f32 %v4615_v1, %v4585_v51 }
 0x580   : > { %v4617_v63 = vadd.f32 %v4616_v54, %v4586_v55 }
 0x582   : > { %v4618_v17 = vadd.f32 %v4617_v63, %v4587_v57  ;;  %v4665_v57 = vld [vmem:[%s7784_s30] sm:$0xff]  ;;  %v4668_v63 = vld [vmem:[%s7784_s30 + $0x18] sm:$0xff] }
 0x584   : > { %v4619_v33 = vadd.f32 %v4618_v17, %v4588_v29  ;;  %v4671_v29 = vld [vmem:[%s7784_s30 + $0x30] sm:$0xff]  ;;  %v4670_v17 = vld [vmem:[%s7784_s30 + $0x28] sm:$0xff] }
 0x586   : > { %v4620_v19 = vadd.f32 %v4619_v33, %v4589_v36  ;;  %v4675_v36 = vld [vmem:[%s7784_s30 + $0x50] sm:$0xff]  ;;  %v4673_v33 = vld [vmem:[%s7784_s30 + $0x40] sm:$0xff] }
 0x588   : > { %v4621_v40 = vadd.f32 %v4620_v19, %v4590_v52  ;;  %v4674_v19 = vld [vmem:[%s7784_s30 + $0x48] sm:$0xff] }
 0x58a   : > { %v4622_v49 = vadd.f32 %v4621_v40, %v4591_v13  ;;  %v4679_v13 = vld [vmem:[%s7784_s30 + $0x70] sm:$0xff] }
 0x58c   : > { %v4623_v9 = vadd.f32 %v4622_v49, %v4592_v16  ;;  %v4678_v49 = vld [vmem:[%s7784_s30 + $0x68] sm:$0xff] }
 0x58e   : > { %v4624_v58 = vrot.slane %v4623_v9, 4 }
 0x590   : > { %v4625_v42 = vadd.f32 %v4624_v58, %v4623_v9  ;;  %v4681_v58 = vld [vmem:[%s7784_s30 + $0x80] sm:$0xff] }
 0x592   : > { %v4626_v26 = vrot.slane %v4625_v42, 2 }
 0x594   : > { %v4627_v15 = vadd.f32 %v4626_v26, %v4625_v42  ;;  %v4684_v42 = vld [vmem:[%s7784_s30 + $0x98] sm:$0xff] }
 0x596   : > { %v4628_v24 = vrot.slane %v4627_v15, 1 }
 0x598   : > { %v4629_v41 = vadd.f32 %v4628_v24, %v4627_v15  ;;  %v4682_v24 = vld [vmem:[%s7784_s30 + $0x88] sm:$0xff] }
 0x59a   : > { %v4630_v23 = vmul.f32 0.00390625, %v4629_v41  ;;  %v4685_v41 = vld [vmem:[%s7784_s30 + $0xa0] sm:$0xff] }
 0x59c   : > { %v4631_v25 = vadd.f32 1e-05, %v4630_v23 }
 0x59e   : > { %7414 = vrsqrt.f32 %v4631_v25 }
 0x5a8   : > { %v7415_v53 = vpop.eup %7414 }
 0x5a9   : > { %v4662_v46 = vmul.f32 %v7415_v53, %v10293_v48  ;;  %v4633_v5 = vmul.f32 %v7415_v53, %v10300_v44  ;;  %v4634_v60 = vmul.f32 %v7415_v53, %v10303_v38  ;;  %v4635_v37 = vmul.f32 %v7415_v53, %v10306_v12  ;;  %v4667_v12 = vld [vmem:[%s7784_s30 + $0x10] sm:$0xff] }
 0x5aa   : > { %v4636_v3 = vmul.f32 %v7415_v53, %v10313_v0  ;;  %v4637_v51 = vmul.f32 %v7415_v53, %v10316_v7  ;;  %v4638_v1 = vmul.f32 %v7415_v53, %v10321_v4  ;;  %v4639_v55 = vmul.f32 %v7415_v53, %v10326_v21 }
 0x5ab   : > { %v4726_v48 = vadd.f32 %v4694_v39, %v4662_v46  ;;  %v4640_v44 = vmul.f32 %v7415_v53, %v10331_v22  ;;  %v4641_v38 = vmul.f32 %v7415_v53, %v10243_v34  ;;  %v4642_v54 = vmul.f32 %v7415_v53, %v10246_v31  ;;  %v4666_v22 = vld [vmem:[%s7784_s30 + $0x8] sm:$0xff]  ;;  %v4669_v34 = vld [vmem:[%s7784_s30 + $0x20] sm:$0xff]  ;;  %v4688_v46 = vld [vmem:[%s7784_s30 + $0xb8] sm:$0xff] }
 0x5ac   : > { %v4643_v0 = vmul.f32 %v7415_v53, %v10249_v28  ;;  %v4644_v7 = vmul.f32 %v7415_v53, %v10252_v47  ;;  %v4645_v4 = vmul.f32 %v7415_v53, %v10255_v20  ;;  %v4646_v21 = vmul.f32 %v7415_v53, %v10258_v45  ;;  %v4672_v45 = vld [vmem:[%s7784_s30 + $0x38] sm:$0xff] }
 0x5ad   : > { %4758 = vst [vmem:[%s10411_s18 + $0xe8] sm:$0xff] %v4726_v48  ;;  %v4647_v31 = vmul.f32 %v7415_v53, %v10261_v6  ;;  %v10416_v28 = vmul.f32 %v7415_v53, %v10264_v8  ;;  %v10419_v47 = vmul.f32 %v7415_v53, %v10266_v62  ;;  %v10422_v20 = vmul.f32 %v7415_v53, %v10268_v11  ;;  %v4676_v11 = vld [vmem:[%s7784_s30 + $0x58] sm:$0xff]  ;;  %v4686_v48 = vld [vmem:[%s7784_s30 + $0xa8] sm:$0xff] }
 0x5ae   : > { %v4651_v52 = vmul.f32 %v7415_v53, %v10271_v50  ;;  %v10430_v6 = vmul.f32 %v7415_v53, %v10273_v56  ;;  %v10433_v8 = vmul.f32 %v7415_v53, %v10275_v14  ;;  %v10436_v62 = vmul.f32 %v7415_v53, %v10277_v30  ;;  %v4677_v14 = vld [vmem:[%s7784_s30 + $0x60] sm:$0xff]  ;;  %v4680_v30 = vld [vmem:[%s7784_s30 + $0x78] sm:$0xff] }
 0x5af   : > { %v4655_v40 = vmul.f32 %v7415_v53, %v10279_v18  ;;  %v10443_v16 = vmul.f32 %v7415_v53, %v10281_v43  ;;  %v10446_v50 = vmul.f32 %v7415_v53, %v10283_v2  ;;  %v10449_v56 = vmul.f32 %v7415_v53, %v10285_v35  ;;  %v4683_v35 = vld [vmem:[%s7784_s30 + $0x90] sm:$0xff] }
 0x5b0   : > { %v10455_v9 = vmul.f32 %v7415_v53, %v10287_v61  ;;  %v10458_v18 = vmul.f32 %v7415_v53, %v10289_v59  ;;  %v10461_v43 = vmul.f32 %v7415_v53, %v10291_v32  ;;  %v10464_v2 = vmul.f32 %v7415_v53, %v10295_v27  ;;  %v4687_v32 = vld [vmem:[%s7784_s30 + $0xb0] sm:$0xff] }
 0x5b1   : > { %v10470_v26 = vmul.f32 %v7415_v53, %v10297_v10  ;;  %v4697_v61 = vadd.f32 %v4665_v57, %v4633_v5  ;;  %v4698_v15 = vadd.f32 %v4666_v22, %v4634_v60  ;;  %v4699_v59 = vadd.f32 %v4667_v12, %v4635_v37  ;;  %v4691_v10 = vld [vmem:[%s7784_s30 + $0xd0] sm:$0xff]  ;;  %v4693_v57 = vld [vmem:[%s7784_s30 + $0xe0] sm:$0xff] }
 0x5b2   : > { %v4700_v27 = vadd.f32 %v4668_v63, %v4636_v3  ;;  %v4701_v23 = vadd.f32 %v4669_v34, %v4637_v51  ;;  %v4702_v25 = vadd.f32 %v4670_v17, %v4638_v1  ;;  %v4703_v39 = vadd.f32 %v4671_v29, %v4639_v55  ;;  %v4689_v3 = vld [vmem:[%s7784_s30 + $0xc0] sm:$0xff]  ;;  %v4692_v51 = vld [vmem:[%s7784_s30 + $0xd8] sm:$0xff]  ;;  %v4690_v1 = vld [vmem:[%s7784_s30 + $0xc8] sm:$0xff] }
 0x5b3   : > { %v4704_v53 = vadd.f32 %v4672_v45, %v4640_v44  ;;  %v4705_v5 = vadd.f32 %v4673_v33, %v4641_v38  ;;  %v4706_v60 = vadd.f32 %v4674_v19, %v4642_v54  ;;  %v4707_v37 = vadd.f32 %v4675_v36, %v4643_v0  ;;  %4729 = vst [vmem:[%s10411_s18] sm:$0xff] %v4697_v61  ;;  %v4695_v54 = vld [vmem:[%s7784_s30 + $0xf0] sm:$0xff]  ;;  %v4696_v0 = vld [vmem:[%s7784_s30 + $0xf8] sm:$0xff] }
 0x5b4   : > { %4730 = vst [vmem:[%s10411_s18 + $0x8] sm:$0xff] %v4698_v15  ;;  %4731 = vst [vmem:[%s10411_s18 + $0x10] sm:$0xff] %v4699_v59  ;;  %v4708_v55 = vadd.f32 %v4676_v11, %v4644_v7  ;;  %v4709_v12 = vadd.f32 %v4677_v14, %v4645_v4  ;;  %v4710_v44 = vadd.f32 %v4678_v49, %v4646_v21 }
 0x5b5   : > { %v4711_v38 = vadd.f32 %v4679_v13, %v4647_v31  ;;  %4732 = vst [vmem:[%s10411_s18 + $0x18] sm:$0xff] %v4700_v27  ;;  %4733 = vst [vmem:[%s10411_s18 + $0x20] sm:$0xff] %v4701_v23  ;;  %v4712_v7 = vadd.f32 %v4680_v30, %v10416_v28  ;;  %v4713_v4 = vadd.f32 %v4681_v58, %v10419_v47 }
 0x5b6   : > { %4734 = vst [vmem:[%s10411_s18 + $0x28] sm:$0xff] %v4702_v25  ;;  %4735 = vst [vmem:[%s10411_s18 + $0x30] sm:$0xff] %v4703_v39  ;;  %v4714_v21 = vadd.f32 %v4682_v24, %v10422_v20  ;;  %v4715_v63 = vadd.f32 %v4683_v35, %v4651_v52  ;;  %v4716_v22 = vadd.f32 %v4684_v42, %v10430_v6 }
 0x5b7   : > { %4736 = vst [vmem:[%s10411_s18 + $0x38] sm:$0xff] %v4704_v53  ;;  %4737 = vst [vmem:[%s10411_s18 + $0x40] sm:$0xff] %v4705_v5  ;;  %v4717_v29 = vadd.f32 %v4685_v41, %v10433_v8  ;;  %v4718_v34 = vadd.f32 %v4686_v48, %v10436_v62  ;;  %v4719_v31 = vadd.f32 %v4687_v32, %v4655_v40 }
 0x5b8   : > { %4738 = vst [vmem:[%s10411_s18 + $0x48] sm:$0xff] %v4706_v60  ;;  %4739 = vst [vmem:[%s10411_s18 + $0x50] sm:$0xff] %v4707_v37  ;;  %v4720_v28 = vadd.f32 %v4688_v46, %v10443_v16  ;;  %v4721_v47 = vadd.f32 %v4689_v3, %v10446_v50  ;;  %v4722_v20 = vadd.f32 %v4690_v1, %v10449_v56 }
 0x5b9   : > { %4740 = vst [vmem:[%s10411_s18 + $0x58] sm:$0xff] %v4708_v55  ;;  %4741 = vst [vmem:[%s10411_s18 + $0x60] sm:$0xff] %v4709_v12  ;;  %v4723_v45 = vadd.f32 %v4691_v10, %v10455_v9  ;;  %v4724_v17 = vadd.f32 %v4692_v51, %v10458_v18  ;;  %v4725_v36 = vadd.f32 %v4693_v57, %v10461_v43 }
 0x5ba   : > { %4742 = vst [vmem:[%s10411_s18 + $0x68] sm:$0xff] %v4710_v44  ;;  %4743 = vst [vmem:[%s10411_s18 + $0x70] sm:$0xff] %v4711_v38  ;;  %v4727_v33 = vadd.f32 %v4695_v54, %v10464_v2  ;;  %v4728_v52 = vadd.f32 %v4696_v0, %v10470_v26 }
 0x5bb   : > { %4744 = vst [vmem:[%s10411_s18 + $0x78] sm:$0xff] %v4712_v7  ;;  %4745 = vst [vmem:[%s10411_s18 + $0x80] sm:$0xff] %v4713_v4 }
 0x5bc   : > { %4746 = vst [vmem:[%s10411_s18 + $0x88] sm:$0xff] %v4714_v21  ;;  %4747 = vst [vmem:[%s10411_s18 + $0x90] sm:$0xff] %v4715_v63 }
 0x5bd   : > { %4748 = vst [vmem:[%s10411_s18 + $0x98] sm:$0xff] %v4716_v22  ;;  %4749 = vst [vmem:[%s10411_s18 + $0xa0] sm:$0xff] %v4717_v29 }
 0x5be   : > { %4750 = vst [vmem:[%s10411_s18 + $0xa8] sm:$0xff] %v4718_v34  ;;  %4751 = vst [vmem:[%s10411_s18 + $0xb0] sm:$0xff] %v4719_v31 }
 0x5bf   : > { %4752 = vst [vmem:[%s10411_s18 + $0xb8] sm:$0xff] %v4720_v28  ;;  %4753 = vst [vmem:[%s10411_s18 + $0xc0] sm:$0xff] %v4721_v47 }
 0x5c0   : > { %4754 = vst [vmem:[%s10411_s18 + $0xc8] sm:$0xff] %v4722_v20  ;;  %4755 = vst [vmem:[%s10411_s18 + $0xd0] sm:$0xff] %v4723_v45 }
 0x5c1   : > { %4756 = vst [vmem:[%s10411_s18 + $0xd8] sm:$0xff] %v4724_v17  ;;  %4757 = vst [vmem:[%s10411_s18 + $0xe0] sm:$0xff] %v4725_v36 }
 0x5c2   : > { %4759 = vst [vmem:[%s10411_s18 + $0xf0] sm:$0xff] %v4727_v33  ;;  %4760 = vst [vmem:[%s10411_s18 + $0xf8] sm:$0xff] %v4728_v52 }
 0x5c3   : > { %7515 = shalt.err (!%p7512_p2)
}
 0x5c4   : > { %s7516_s25 = scalar_lea.hbm %s10520_s27, 4096  ;;  %s7520_s21 = scalar_lea.hbm %s10587_s3, 8192 }
 0x5c5   : > { %p7517_p13 = scmp.ne.s32.totalorder %s10520_s27, %s7516_s25  ;;  %p7521_p4 = scmp.lt.u32.totalorder %s10520_s27, %s10587_s3 }
 0x5c6   : > { %p7522_p5 = scmp.lt.u32.totalorder %s7520_s21, %s7516_s25  ;;  %p7524_p11 = scmp.lt.u32.totalorder %s7516_s25, %s10520_s27 }
 0x5c7   : > { %p7518_p6 = pnand %p7517_p13, %p10687_p0 }
 0x5c8   : > { %p7523_p8 = por %p7522_p5, %p7521_p4 }
 0x5c9   : > { %p7519_p10 = pneg %p7518_p6 }
 0x5ca   : > { %p7525_p1 = por %p7524_p11, %p7523_p8 }
 0x5cc   : > { %p7526_p3 = pnand %p7525_p1, %p7519_p10 }
 0x5ce   : > { %7529 = shalt.err (!%p7526_p3)
}
 0x5cf   : > { %s7584_s30 = smov 128   ;;  %s7585_s18 = smov 8  }
 0x5d0   : > { %7201 = dma.vmem_to_hbm [thread:$0]  (%p10687_p0), %s10524_s17, 4096, %s10520_s27, %s4762_s16, %s7584_s30, %s7584_s30, %s7585_s18  }
 0x5d1 PF: > { %s4790_s20 = sand.u32 1, %s7560_s12   ;;  %p10688_p7 = scmp.ne.s32.totalorder %s10608_s19, 0 }
 0x5d2   : > { %p10689_p9 = scmp.ge.s32.totalorder %s7572_s15, 2  ;;  %s4791_s24 = scalar_lea.sflag [#allocation5], %s4790_s20 }
 0x5d4   : > { %p7215_p12 = pnand %p10689_p9, %p10688_p7 }
 0x5d6   : > { %7555 = dma.done.wait (!%p7215_p12), %s4791_s24, 4096  }
 0x5d7   : > { %7557 = vsyncadd (!%p7215_p12), %s4791_s24, 4294963200  ;;  %p17_p2 = scmp.ge.s32.totalorder %s7716_s4, 4   ;;  %s10690_s12 = smov %s7564_s13 }
 0x5d8   : > { %s10691_s13 = smov %s7568_s14  ;;  %s10692_s14 = smov %s7732_s9 }
 0x5d9   : > { %s10693_s15 = smov %s7716_s4  ;;  %19 = sbr.rel (!%p17_p2) target bundleno = 6 (0x6), region = 92 }
 0x5e0   :  { %4796 = vsyncpa [#allocation4], 1 }
 0x5e1   :  { %4798 = vsyncpa [#allocation4 + $0x1], 1 }
 0x5e2   :  { %4799 = vsyncpa [#allocation7], 1 }
 0x5e3   :  { %4800 = vsyncpa [#allocation5], 1 }
 0x5e4   :  { %4802 = vsyncpa [#allocation5 + $0x1], 1 }

</bundles_post_ra>
